<compile_context>
chip_gen: v5e
topology: v5e:2x2
jax: 0.10.0
libtpu: 0.0.40
codegen_flags: <defaults>
</compile_context>

<pallas_src>
import functools

import jax
import jax.numpy as jnp
from jax.experimental import pallas as pl
from jax.experimental.pallas import tpu as pltpu

# hyper-parameters from the PyTorch `params` dict (conv_layers=1 path)
HIDDEN = 200        # params['hidden_units']
FEATURES = 150      # params['features']
K_CONV = 2
PAD_CONV = 2
STRIDE_CONV = 2
K_POOL = 2
PAD_POOL = 2
STRIDE_POOL = 2
BN_EPS = 1e-5

# geometry for 28x28 inputs (the module's out_size formula assumes 28)
H_IN = 28
CONV_OUT = (H_IN - K_CONV + 2 * PAD_CONV) // STRIDE_CONV + 1       # 16
POOL_OUT = (CONV_OUT - K_POOL + 2 * PAD_POOL) // STRIDE_POOL + 1   # 10
POOL_INT = CONV_OUT // STRIDE_POOL                                 # 8 (interior)
N_POS = CONV_OUT * CONV_OUT                                        # 256 conv positions
N_OUTPOS = POOL_INT * POOL_INT                                     # 64 pooled interior positions

C_PAD = 256                       # HIDDEN 200 -> 256 (lane-dense channels)
F1_PAD = 256                      # FEATURES 150 -> 256 (two 128-lane halves)
FLAT_PAD = N_OUTPOS * C_PAD       # 16384 classifier contraction width


# --------------------------- Pallas kernels ---------------------------------

def conv_pool_kernel(patch_ref, w_ref, bias_ref, o_ref, *, tb):
    # patch_ref: (tb*256, Kc) f32 -- im2col patches; rows = b*256 + s*64 + i*8 + j
    #            where s in 0..3 indexes the 2x2 pooling sub-position.
    # w_ref:     (Kc, 256) f32  -- conv weight with BN scale folded, 200->256 pad.
    # bias_ref:  (1, 256)  f32  -- conv bias * bn_scale + bn_shift (fused).
    # o_ref:     (tb*64, 256) bf16 -- 8x8 interior of the 2x2/stride-2 max-pool.
    y = jnp.dot(patch_ref[...], w_ref[...], preferred_element_type=jnp.float32)
    y = jnp.maximum(y + bias_ref[...], 0.0)           # Conv + folded BN + ReLU
    for t in range(tb):                               # static unroll over batch tile
        base = t * N_POS
        m = jnp.maximum(
            jnp.maximum(y[base:base + N_OUTPOS],
                        y[base + N_OUTPOS:base + 2 * N_OUTPOS]),
            jnp.maximum(y[base + 2 * N_OUTPOS:base + 3 * N_OUTPOS],
                        y[base + 3 * N_OUTPOS:base + 4 * N_OUTPOS]))
        o_ref[t * N_OUTPOS:(t + 1) * N_OUTPOS, :] = m.astype(o_ref.dtype)


def classifier_kernel(x_ref, w1_ref, b1_ref, w2_ref, o_ref, acc_ref):
    # Grid: (j = F1 half [parallel], k = K tile [arbitrary/reduction]).
    # x_ref: (B, tk) bf16, w1_ref: (tk, 128) bf16, b1_ref: (1, 128) f32,
    # w2_ref: (128, F2p) f32, o_ref: (1, B, F2p) f32 partial, acc_ref: (B, 128) f32.
    k = pl.program_id(1)

    @pl.when(k == 0)
    def _():
        acc_ref[...] = jnp.zeros_like(acc_ref)

    acc_ref[...] += jnp.dot(x_ref[...], w1_ref[...],
                            preferred_element_type=jnp.float32)

    @pl.when(k == pl.num_programs(1) - 1)
    def _():
        h = acc_ref[...] + b1_ref[...]        # Linear-1 bias (this F1 half)
        # TODO(synk): Dropout(p=0.5) is identity in eval mode (no RNG mask).
        o_ref[0] = jnp.dot(h, w2_ref[...],
                           preferred_element_type=jnp.float32).astype(o_ref.dtype)


# --------------------------- pallas_call wrappers ----------------------------

def conv_bn_relu_pool(patches, w_mat, bias, batch, tb):
    rows, kc = patches.shape
    assert rows == batch * N_POS and batch % tb == 0
    kernel = functools.partial(conv_pool_kernel, tb=tb)
    return pl.pallas_call(
        kernel,
        out_shape=jax.ShapeDtypeStruct((batch * N_OUTPOS, C_PAD), jnp.bfloat16),
        grid_spec=pltpu.PrefetchScalarGridSpec(
            num_scalar_prefetch=0,
            grid=(batch // tb,),
            in_specs=[
                pl.BlockSpec((tb * N_POS, kc), lambda b: (b, 0)),
                pl.BlockSpec((kc, C_PAD), lambda b: (0, 0)),
                pl.BlockSpec((1, C_PAD), lambda b: (0, 0)),
            ],
            out_specs=pl.BlockSpec((tb * N_OUTPOS, C_PAD), lambda b: (b, 0)),
        ),
        compiler_params=pltpu.CompilerParams(
            dimension_semantics=("parallel",)),
    )(patches, w_mat, bias)


def classifier(x_flat, w1, b1, w2, tk):
    b, kp = x_flat.shape
    f1 = w1.shape[1]            # 256
    f2 = w2.shape[1]            # 128 (padded output width)
    nj = f1 // 128
    assert kp % tk == 0 and f1 % 128 == 0 and f2 % 128 == 0
    return pl.pallas_call(
        classifier_kernel,
        out_shape=jax.ShapeDtypeStruct((nj, b, f2), jnp.float32),
        grid_spec=pltpu.PrefetchScalarGridSpec(
            num_scalar_prefetch=0,
            grid=(nj, kp // tk),
            in_specs=[
                pl.BlockSpec((b, tk), lambda j, k: (0, k)),
                pl.BlockSpec((tk, 128), lambda j, k: (k, j)),
                pl.BlockSpec((1, 128), lambda j, k: (0, j)),
                pl.BlockSpec((128, f2), lambda j, k: (j, 0)),
            ],
            out_specs=pl.BlockSpec((1, b, f2), lambda j, k: (j, 0, 0)),
            scratch_shapes=[pltpu.VMEM((b, 128), jnp.float32)],
        ),
        compiler_params=pltpu.CompilerParams(
            dimension_semantics=("parallel", "arbitrary")),
    )(x_flat, w1, b1, w2)


# --------------------------- parameters --------------------------------------

def init_params(key, in_channels, output_shape):
    """PyTorch-equivalent parameters (Linear weights stored transposed)."""
    flat_dim = HIDDEN * POOL_OUT * POOL_OUT   # 20000 (conv_layers == 1)
    k1, k2, k3, k4, k5, k6 = jax.random.split(key, 6)
    return {
        "conv_w": jax.random.normal(k1, (HIDDEN, in_channels, K_CONV, K_CONV),
                                    jnp.float32) * 0.1,
        "conv_b": jax.random.normal(k2, (HIDDEN,), jnp.float32) * 0.1,
        # BatchNorm2d eval mode / default-initialized running stats
        "bn_gamma": jnp.ones((HIDDEN,), jnp.float32),
        "bn_beta": jnp.zeros((HIDDEN,), jnp.float32),
        "bn_mean": jnp.zeros((HIDDEN,), jnp.float32),
        "bn_var": jnp.ones((HIDDEN,), jnp.float32),
        "w1": jax.random.normal(k3, (flat_dim, FEATURES), jnp.float32) * 0.01,
        "b1": jax.random.normal(k4, (FEATURES,), jnp.float32) * 0.01,
        "w2": jax.random.normal(k5, (FEATURES, output_shape), jnp.float32) * 0.05,
        "b2": jax.random.normal(k6, (output_shape,), jnp.float32) * 0.05,
    }


def prepare_params(p):
    """One-time fold/permute/pad so the per-call forward has no layout glue."""
    in_channels = p["conv_w"].shape[1]
    output_shape = p["w2"].shape[1]
    kc = in_channels * K_CONV * K_CONV

    # Fold eval-mode BatchNorm into the conv weight / bias.
    scale = p["bn_gamma"] / jnp.sqrt(p["bn_var"] + BN_EPS)
    shift = p["bn_beta"] - p["bn_mean"] * scale
    w_mat = p["conv_w"].reshape(HIDDEN, kc).T * scale[None, :]       # (kc, 200)
    w_mat = jnp.pad(w_mat, ((0, 0), (0, C_PAD - HIDDEN)))            # (kc, 256)
    bias = jnp.pad(p["conv_b"] * scale + shift,
                   (0, C_PAD - HIDDEN)).reshape(1, C_PAD)

    # Pre-permute w1 (NCHW-flatten rows) to pooled NHWC-interior order with
    # padded channels/F1; border pooled positions are exactly 0 so their rows
    # are dropped. Stored bf16 to halve the dominant HBM stream.
    w1 = p["w1"].reshape(HIDDEN, POOL_OUT, POOL_OUT, FEATURES)       # (c, ph, pw, f)
    w1 = w1[:, 1:1 + POOL_INT, 1:1 + POOL_INT, :]                    # interior (c,8,8,f)
    w1 = jnp.transpose(w1, (1, 2, 0, 3))                             # (8, 8, c, f)
    w1 = jnp.pad(w1, ((0, 0), (0, 0),
                      (0, C_PAD - HIDDEN), (0, F1_PAD - FEATURES)))  # (8,8,256,256)
    w1 = w1.reshape(FLAT_PAD, F1_PAD).astype(jnp.bfloat16)

    b1 = jnp.pad(p["b1"], (0, F1_PAD - FEATURES)).reshape(1, F1_PAD)
    f2_pad = ((output_shape + 127) // 128) * 128
    w2 = jnp.pad(p["w2"], ((0, F1_PAD - FEATURES), (0, f2_pad - output_shape)))
    return {"conv_w": w_mat, "conv_b": bias, "w1": w1, "b1": b1,
            "w2": w2, "b2": p["b2"]}


# --------------------------- model forward ----------------------------------

def _batch_tile(b):
    for tb in range(min(b, 8), 0, -1):
        if b % tb == 0:
            return tb
    return 1


def cnn_forward(x, fp):
    # x: (B, C, 28, 28) NCHW float32
    b, c, h, w = x.shape
    assert h == H_IN and w == H_IN, "classifier flat-dim is derived from 28x28 input"
    kc = c * K_CONV * K_CONV

    # im2col for k=2 / stride=2 / pad=2 (non-overlapping windows -> reshape glue
    # on the tiny input), arranged by the 4 pooling sub-positions so the fused
    # kernel can take the 2x2 pool max with aligned sublane slices.
    xp = jnp.pad(x, ((0, 0), (0, 0), (PAD_CONV, PAD_CONV), (PAD_CONV, PAD_CONV)))
    pt = xp.reshape(b, c, CONV_OUT, K_CONV, CONV_OUT, K_CONV)
    pt = pt.transpose(0, 2, 4, 1, 3, 5).reshape(b, CONV_OUT, CONV_OUT, kc)
    subs = [pt[:, a::2, bb::2, :] for a in (0, 1) for bb in (0, 1)]
    patches = jnp.stack(subs, axis=1).reshape(b * 4 * N_OUTPOS, kc)

    tb = _batch_tile(b)
    pooled = conv_bn_relu_pool(patches, fp["conv_w"], fp["conv_b"], b, tb)
    x_flat = pooled.reshape(b, FLAT_PAD)          # (B, 16384) bf16, layout-free reshape

    # Linear(20000->150) [only the 12800 nonzero rows, pre-permuted/padded]
    # -> Dropout(identity in eval) -> Linear(150->out)
    parts = classifier(x_flat, fp["w1"], fp["b1"], fp["w2"], tk=FLAT_PAD // 2)
    n_out = fp["b2"].shape[0]
    return parts.sum(axis=0)[:, :n_out] + fp["b2"][None, :]


# --------------------------- demo / self-test --------------------------------

if __name__ == "__main__":
    B, C_IN, OUT = 2, 1, 10            # input_shape=1 channel, output_shape=10
    key = jax.random.PRNGKey(0)
    key_p, key_x = jax.random.split(key)

    raw_params = init_params(key_p, C_IN, OUT)
    fused_params = prepare_params(raw_params)     # one-time fold/permute/pad
    x = jax.random.normal(key_x, (B, C_IN, H_IN, H_IN), jnp.float32)

    y = jax.jit(cnn_forward)(x, fused_params)
    y = jax.block_until_ready(y)

    assert y.shape == (B, OUT), y.shape
    assert bool(jnp.all(jnp.isfinite(y)))
    print("KERNEL_OK")
</pallas_src>

<mosaic_0001>
module attributes {stable_mosaic.version = 11 : i64} {
  func.func @conv_pool_kernel(%arg0: i32, %arg1: memref<512x4xf32, #tpu.memory_space<vmem>>, %arg2: memref<4x256xf32, #tpu.memory_space<vmem>>, %arg3: memref<1x256xf32, #tpu.memory_space<vmem>>, %arg4: memref<128x256xbf16, #tpu.memory_space<vmem>>) attributes {dimension_semantics = [#tpu.dimension_semantics<parallel>], iteration_bounds = array<i64: 1>, scalar_prefetch = 0 : i64, scratch_operands = 0 : i64, tpu.core_type = #tpu.core_type<tc>, window_params = [{transform_indices = @transform_0, window_bounds = array<i64: 512, 4>}, {pipeline_mode = #tpu.pipeline_mode<synchronous>, transform_indices = @transform_1, window_bounds = array<i64: 4, 256>}, {pipeline_mode = #tpu.pipeline_mode<synchronous>, transform_indices = @transform_2, window_bounds = array<i64: 1, 256>}, {transform_indices = @transform_3, window_bounds = array<i64: 128, 256>}]} {
    %c0 = arith.constant 0 : index
    %c0_0 = arith.constant 0 : index
    %0 = vector.load %arg1[%c0, %c0_0] : memref<512x4xf32, #tpu.memory_space<vmem>>, vector<512x4xf32>
    %c0_1 = arith.constant 0 : index
    %c0_2 = arith.constant 0 : index
    %1 = vector.load %arg2[%c0_1, %c0_2] : memref<4x256xf32, #tpu.memory_space<vmem>>, vector<4x256xf32>
    %cst = arith.constant dense<0.000000e+00> : vector<512x256xf32>
    %2 = tpu.matmul %0, %1, %cst {dimension_numbers = #tpu.dot_dimension_numbers<[1], [0], [0], [1], [0, 0, 1, 1], [], []>} : vector<512x4xf32>, vector<4x256xf32>, vector<512x256xf32> -> vector<512x256xf32>
    %c0_3 = arith.constant 0 : index
    %c0_4 = arith.constant 0 : index
    %3 = vector.load %arg3[%c0_3, %c0_4] : memref<1x256xf32, #tpu.memory_space<vmem>>, vector<1x256xf32>
    %4 = vector.broadcast %3 : vector<1x256xf32> to vector<512x256xf32>
    %5 = arith.addf %2, %4 : vector<512x256xf32>
    %cst_5 = arith.constant 0.000000e+00 : f32
    %6 = vector.broadcast %cst_5 : f32 to vector<512x256xf32>
    %7 = arith.maximumf %5, %6 : vector<512x256xf32>
    %8 = vector.extract_strided_slice %7 {offsets = [0, 0], sizes = [64, 256], strides = [1, 1]} : vector<512x256xf32> to vector<64x256xf32>
    %9 = vector.extract_strided_slice %7 {offsets = [64, 0], sizes = [64, 256], strides = [1, 1]} : vector<512x256xf32> to vector<64x256xf32>
    %10 = arith.maximumf %8, %9 : vector<64x256xf32>
    %11 = vector.extract_strided_slice %7 {offsets = [128, 0], sizes = [64, 256], strides = [1, 1]} : vector<512x256xf32> to vector<64x256xf32>
    %12 = vector.extract_strided_slice %7 {offsets = [192, 0], sizes = [64, 256], strides = [1, 1]} : vector<512x256xf32> to vector<64x256xf32>
    %13 = arith.maximumf %11, %12 : vector<64x256xf32>
    %14 = arith.maximumf %10, %13 : vector<64x256xf32>
    %15 = arith.truncf %14 : vector<64x256xf32> to vector<64x256xbf16>
    %c0_6 = arith.constant 0 : index
    %c0_7 = arith.constant 0 : index
    %16 = vector.load %arg4[%c0_6, %c0_7] : memref<128x256xbf16, #tpu.memory_space<vmem>>, vector<64x256xbf16>
    tpu.vector_store %arg4[%c0_6, %c0_7], %15 {strides = array<i32>} : memref<128x256xbf16, #tpu.memory_space<vmem>>, vector<64x256xbf16>,
    %17 = vector.extract_strided_slice %7 {offsets = [256, 0], sizes = [64, 256], strides = [1, 1]} : vector<512x256xf32> to vector<64x256xf32>
    %18 = vector.extract_strided_slice %7 {offsets = [320, 0], sizes = [64, 256], strides = [1, 1]} : vector<512x256xf32> to vector<64x256xf32>
    %19 = arith.maximumf %17, %18 : vector<64x256xf32>
    %20 = vector.extract_strided_slice %7 {offsets = [384, 0], sizes = [64, 256], strides = [1, 1]} : vector<512x256xf32> to vector<64x256xf32>
    %21 = vector.extract_strided_slice %7 {offsets = [448, 0], sizes = [64, 256], strides = [1, 1]} : vector<512x256xf32> to vector<64x256xf32>
    %22 = arith.maximumf %20, %21 : vector<64x256xf32>
    %23 = arith.maximumf %19, %22 : vector<64x256xf32>
    %24 = arith.truncf %23 : vector<64x256xf32> to vector<64x256xbf16>
    %c64 = arith.constant 64 : index
    %c0_8 = arith.constant 0 : index
    %25 = vector.load %arg4[%c64, %c0_8] : memref<128x256xbf16, #tpu.memory_space<vmem>>, vector<64x256xbf16>
    tpu.vector_store %arg4[%c64, %c0_8], %24 {strides = array<i32>} : memref<128x256xbf16, #tpu.memory_space<vmem>>, vector<64x256xbf16>,
    return
  }
  func.func @transform_0(%arg0: i32) -> (i32, i32) {
    %c0_i32 = arith.constant 0 : i32
    %c0_i32_0 = arith.constant 0 : i32
    return %arg0, %c0_i32 : i32, i32
  }
  func.func @transform_1(%arg0: i32) -> (i32, i32) {
    %c0_i32 = arith.constant 0 : i32
    %c0_i32_0 = arith.constant 0 : i32
    %c0_i32_1 = arith.constant 0 : i32
    return %c0_i32, %c0_i32_0 : i32, i32
  }
  func.func @transform_2(%arg0: i32) -> (i32, i32) {
    %c0_i32 = arith.constant 0 : i32
    %c0_i32_0 = arith.constant 0 : i32
    %c0_i32_1 = arith.constant 0 : i32
    return %c0_i32, %c0_i32_0 : i32, i32
  }
  func.func @transform_3(%arg0: i32) -> (i32, i32) {
    %c0_i32 = arith.constant 0 : i32
    %c0_i32_0 = arith.constant 0 : i32
    return %arg0, %c0_i32 : i32, i32
  }
}

module attributes {stable_mosaic.version = 11 : i64} {
  func.func @classifier_kernel(%arg0: i32, %arg1: i32, %arg2: memref<2x8192xbf16, #tpu.memory_space<vmem>>, %arg3: memref<8192x128xbf16, #tpu.memory_space<vmem>>, %arg4: memref<1x128xf32, #tpu.memory_space<vmem>>, %arg5: memref<128x128xf32, #tpu.memory_space<vmem>>, %arg6: memref<1x2x128xf32, #tpu.memory_space<vmem>>, %arg7: memref<2x128xf32, #tpu.memory_space<vmem>>) attributes {dimension_semantics = [#tpu.dimension_semantics<parallel>, #tpu.dimension_semantics<arbitrary>], iteration_bounds = array<i64: 2, 2>, scalar_prefetch = 0 : i64, scratch_operands = 1 : i64, tpu.core_type = #tpu.core_type<tc>, window_params = [{transform_indices = @transform_0, window_bounds = array<i64: 2, 8192>}, {transform_indices = @transform_1, window_bounds = array<i64: 8192, 128>}, {transform_indices = @transform_2, window_bounds = array<i64: 1, 128>}, {transform_indices = @transform_3, window_bounds = array<i64: 128, 128>}, {transform_indices = @transform_4, window_bounds = array<i64: 1, 2, 128>}]} {
    %c0_i32 = arith.constant 0 : i32
    %0 = arith.cmpi eq, %arg1, %c0_i32 : i32
    %1 = arith.extui %0 : i1 to i32
    %c0_i32_0 = arith.constant 0 : i32
    %2 = arith.cmpi ne, %1, %c0_i32_0 : i32
    scf.if %2 {
      %cst_9 = arith.constant 0.000000e+00 : f32
      %12 = vector.broadcast %cst_9 : f32 to vector<2x128xf32>
      %c0_10 = arith.constant 0 : index
      %c0_11 = arith.constant 0 : index
      %13 = vector.load %arg7[%c0_10, %c0_11] : memref<2x128xf32, #tpu.memory_space<vmem>>, vector<2x128xf32>
      tpu.vector_store %arg7[%c0_10, %c0_11], %12 {strides = array<i32>} : memref<2x128xf32, #tpu.memory_space<vmem>>, vector<2x128xf32>,
    } else {
    }
    %c0 = arith.constant 0 : index
    %c0_1 = arith.constant 0 : index
    %3 = vector.load %arg7[%c0, %c0_1] : memref<2x128xf32, #tpu.memory_space<vmem>>, vector<2x128xf32>
    %c0_2 = arith.constant 0 : index
    %c0_3 = arith.constant 0 : index
    %4 = vector.load %arg2[%c0_2, %c0_3] : memref<2x8192xbf16, #tpu.memory_space<vmem>>, vector<2x8192xbf16>
    %c0_4 = arith.constant 0 : index
    %c0_5 = arith.constant 0 : index
    %5 = vector.load %arg3[%c0_4, %c0_5] : memref<8192x128xbf16, #tpu.memory_space<vmem>>, vector<8192x128xbf16>
    %cst = arith.constant dense<0.000000e+00> : vector<2x128xf32>
    %6 = tpu.matmul %4, %5, %cst {dimension_numbers = #tpu.dot_dimension_numbers<[1], [0], [0], [1], [0, 0, 1, 1], [], []>} : vector<2x8192xbf16>, vector<8192x128xbf16>, vector<2x128xf32> -> vector<2x128xf32>
    %7 = arith.addf %3, %6 : vector<2x128xf32>
    %c0_6 = arith.constant 0 : index
    %c0_7 = arith.constant 0 : index
    %8 = vector.load %arg7[%c0_6, %c0_7] : memref<2x128xf32, #tpu.memory_space<vmem>>, vector<2x128xf32>
    tpu.vector_store %arg7[%c0_6, %c0_7], %7 {strides = array<i32>} : memref<2x128xf32, #tpu.memory_space<vmem>>, vector<2x128xf32>,
    %c1_i32 = arith.constant 1 : i32
    %9 = arith.cmpi eq, %arg1, %c1_i32 : i32
    %10 = arith.extui %9 : i1 to i32
    %c0_i32_8 = arith.constant 0 : i32
    %11 = arith.cmpi ne, %10, %c0_i32_8 : i32
    scf.if %11 {
      %c0_9 = arith.constant 0 : index
      %c0_10 = arith.constant 0 : index
      %12 = vector.load %arg7[%c0_9, %c0_10] : memref<2x128xf32, #tpu.memory_space<vmem>>, vector<2x128xf32>
      %c0_11 = arith.constant 0 : index
      %c0_12 = arith.constant 0 : index
      %13 = vector.load %arg4[%c0_11, %c0_12] : memref<1x128xf32, #tpu.memory_space<vmem>>, vector<1x128xf32>
      %14 = vector.broadcast %13 : vector<1x128xf32> to vector<2x128xf32>
      %15 = arith.addf %12, %14 : vector<2x128xf32>
      %c0_13 = arith.constant 0 : index
      %c0_14 = arith.constant 0 : index
      %16 = vector.load %arg5[%c0_13, %c0_14] : memref<128x128xf32, #tpu.memory_space<vmem>>, vector<128x128xf32>
      %cst_15 = arith.constant dense<0.000000e+00> : vector<2x128xf32>
      %17 = tpu.matmul %15, %16, %cst_15 {dimension_numbers = #tpu.dot_dimension_numbers<[1], [0], [0], [1], [0, 0, 1, 1], [], []>} : vector<2x128xf32>, vector<128x128xf32>, vector<2x128xf32> -> vector<2x128xf32>
      %c0_16 = arith.constant 0 : index
      %c0_17 = arith.constant 0 : index
      %c0_18 = arith.constant 0 : index
      %18 = vector.load %arg6[%c0_16, %c0_17, %c0_18] : memref<1x2x128xf32, #tpu.memory_space<vmem>>, vector<1x2x128xf32>
      %19 = vector.shape_cast %18 : vector<1x2x128xf32> to vector<2x128xf32>
      %20 = vector.shape_cast %17 : vector<2x128xf32> to vector<1x2x128xf32>
      tpu.vector_store %arg6[%c0_16, %c0_17, %c0_18], %20 {strides = array<i32>} : memref<1x2x128xf32, #tpu.memory_space<vmem>>, vector<1x2x128xf32>,
    } else {
    }
    return
  }
  func.func @transform_0(%arg0: i32, %arg1: i32) -> (i32, i32) {
    %c0_i32 = arith.constant 0 : i32
    %c0_i32_0 = arith.constant 0 : i32
    return %c0_i32, %arg1 : i32, i32
  }
  func.func @transform_1(%arg0: i32, %arg1: i32) -> (i32, i32) {
    %c0_i32 = arith.constant 0 : i32
    return %arg1, %arg0 : i32, i32
  }
  func.func @transform_2(%arg0: i32, %arg1: i32) -> (i32, i32) {
    %c0_i32 = arith.constant 0 : i32
    %c0_i32_0 = arith.constant 0 : i32
    return %c0_i32, %arg0 : i32, i32
  }
  func.func @transform_3(%arg0: i32, %arg1: i32) -> (i32, i32) {
    %c0_i32 = arith.constant 0 : i32
    %c0_i32_0 = arith.constant 0 : i32
    return %arg0, %c0_i32 : i32, i32
  }
  func.func @transform_4(%arg0: i32, %arg1: i32) -> (i32, i32, i32) {
    %c0_i32 = arith.constant 0 : i32
    %c0_i32_0 = arith.constant 0 : i32
    %c0_i32_1 = arith.constant 0 : i32
    return %arg0, %c0_i32, %c0_i32_0 : i32, i32, i32
  }
}

</mosaic_0001>

<bundles_post_ra>
// kernel: cnn_forward.2
= control target key start
LH: loop header
LB: loop body
LE: loop exit
PB: predicated region body
PF: predicated region fallthrough
CT: control target
= control target key end

     0   :  { %8 = vsyncpa [#allocation3], 0  ;;  %s2057_s0 = inlined_call_operand.vmem [shape: f32[512,4], index: 0, kind: input, shape index: {}]   ;;  %s2058_s1 = inlined_call_operand.hbm [shape: f32[4,256], index: 1, kind: input, shape index: {}]   ;;  %s2059_s2 = inlined_call_operand.hbm [shape: f32[1,256], index: 2, kind: input, shape index: {}]   ;;  %s2060_s3 = inlined_call_operand.vmem [shape: bf16[128,256], index: 3, kind: output, shape index: {}]  }
   0x1   :  { %s17_s14 = sshll.u32 %s2058_s1, 4  ;;  %s18_s14 = int_to_ptr.hbm [resolvable:$true] %s17_s14 }
   0x2   :  { %9 = vsyncpa [#allocation5], 0  ;;  %s1181_s15 = smov [#allocation2]   ;;  %s28_s19 = sshll.u32 %s2059_s2, 4  ;;  %s29_s19 = int_to_ptr.hbm [resolvable:$true] %s28_s19 }
   0x3   :  { %s19_s16 = sshll.u32 %s1181_s15, 4  ;;  %s1182_s20 = smov [#allocation4]   ;;  %s20_s16 = int_to_ptr.vmem [resolvable:$true] %s19_s16 }
   0x4   :  { %22 = dma.hbm_to_vmem [thread:$0]  %s18_s14, 128, %s20_s16, [#allocation3]  }
   0x5   :  { %s30_s21 = sshll.u32 %s1182_s20, 4  ;;  %s31_s21 = int_to_ptr.vmem [resolvable:$true] %s30_s21 }
   0x6   :  { %33 = dma.hbm_to_vmem [thread:$0]  %s29_s19, 32, %s31_s21, [#allocation5]  }
   0x7   :  { %1177 = dma.done.wait [#allocation3], 128  }
   0x8   :  { %1178 = vsyncadd [#allocation3], 4294967168 }
   0x9   :  { %1179 = dma.done.wait [#allocation5], 32  }
   0xa   :  { %1180 = vsyncadd [#allocation5], 4294967264  ;;  %v106_v0 = vld [vmem:[#allocation2] sm:$0xff]  ;;  %vm310_vm0 = vcmask 1043456   ;;  %v42_v1 = vld [vmem:[%s2057_s0] sm:$0xff]  ;;  %vm117_vm1 = vcmask 31744  }
   0xb   :  { %114 = vst [vmem:[#allocation1] ss:$2 sm:$0xff] %v106_v0  ;;  %v74_v2 = vld [vmem:[%s2057_s0 + $0x100] sm:$0xff]  ;;  %v43_v5 = vld [vmem:[%s2057_s0 + $0x8] sm:$0xff]  ;;  %v44_v7 = vld [vmem:[%s2057_s0 + $0x10] sm:$0xff] }
   0xc   :  { %v75_v6 = vld [vmem:[%s2057_s0 + $0x108] sm:$0xff]  ;;  %v76_v8 = vld [vmem:[%s2057_s0 + $0x110] sm:$0xff]  ;;  %v45_v9 = vld [vmem:[%s2057_s0 + $0x18] sm:$0xff] }
   0xd   :  { %v77_v10 = vld [vmem:[%s2057_s0 + $0x118] sm:$0xff]  ;;  %v46_v11 = vld [vmem:[%s2057_s0 + $0x20] sm:$0xff]  ;;  %v47_v13 = vld [vmem:[%s2057_s0 + $0x28] sm:$0xff] }
   0xe   :  { %v78_v12 = vld [vmem:[%s2057_s0 + $0x120] sm:$0xff]  ;;  %v79_v14 = vld [vmem:[%s2057_s0 + $0x128] sm:$0xff]  ;;  %v48_v15 = vld [vmem:[%s2057_s0 + $0x30] sm:$0xff] }
   0xf   :  { %v80_v16 = vld [vmem:[%s2057_s0 + $0x130] sm:$0xff]  ;;  %v49_v17 = vld [vmem:[%s2057_s0 + $0x38] sm:$0xff]  ;;  %v50_v19 = vld [vmem:[%s2057_s0 + $0x40] sm:$0xff] }
  0x10   :  { %v81_v18 = vld [vmem:[%s2057_s0 + $0x138] sm:$0xff]  ;;  %v82_v20 = vld [vmem:[%s2057_s0 + $0x140] sm:$0xff]  ;;  %v51_v21 = vld [vmem:[%s2057_s0 + $0x48] sm:$0xff] }
  0x11   :  { %v83_v22 = vld [vmem:[%s2057_s0 + $0x148] sm:$0xff]  ;;  %v52_v23 = vld [vmem:[%s2057_s0 + $0x50] sm:$0xff]  ;;  %v53_v25 = vld [vmem:[%s2057_s0 + $0x58] sm:$0xff] }
  0x12   :  { %v115_v3 = vld.sshfl [vmem:[#allocation1] sm:$0xff pattern:$0x75316420]  ;;  %v116_v4 = vld.sshfl [vmem:[#allocation1 + $0x8] sm:$0xff pattern:$0x75316420] }
  0x13   :  { %995 = vmatpush.msk.msra.mxu0 %vm310_vm0, %v115_v3  ;;  %1125 = vmatpush.msk.msra.mxu2 %vm310_vm0, %v115_v3  ;;  %v84_v24 = vld [vmem:[%s2057_s0 + $0x150] sm:$0xff]  ;;  %v85_v26 = vld [vmem:[%s2057_s0 + $0x158] sm:$0xff]  ;;  %v54_v27 = vld [vmem:[%s2057_s0 + $0x60] sm:$0xff] }
  0x14   :  { %1060 = vmatpush.msk.msra.mxu1 %vm310_vm0, %v116_v4  ;;  %1126 = vmatpush.msk.msra.mxu3 %vm310_vm0, %v116_v4  ;;  %v86_v28 = vld [vmem:[%s2057_s0 + $0x160] sm:$0xff]  ;;  %v55_v29 = vld [vmem:[%s2057_s0 + $0x68] sm:$0xff]  ;;  %v56_v31 = vld [vmem:[%s2057_s0 + $0x70] sm:$0xff] }
  0x15   :  { %996 = vmatmul.msk.f32.vlgmr.msra.gmra.mxu0 %vm117_vm1, %v42_v1  ;;  %1028 = vmatmul.msk.f32.vlgmr.msra.gmra.mxu2 %vm117_vm1, %v74_v2  ;;  %v87_v30 = vld [vmem:[%s2057_s0 + $0x168] sm:$0xff]  ;;  %v88_v32 = vld [vmem:[%s2057_s0 + $0x170] sm:$0xff]  ;;  %v57_v33 = vld [vmem:[%s2057_s0 + $0x78] sm:$0xff] }
  0x16   :  { %1061 = vmatmul.msk.f32.vlgmr.msra.gmra.mxu1 %vm117_vm1, %v42_v1  ;;  %1093 = vmatmul.msk.f32.vlgmr.msra.gmra.mxu3 %vm117_vm1, %v74_v2  ;;  %v89_v34 = vld [vmem:[%s2057_s0 + $0x178] sm:$0xff]  ;;  %v58_v36 = vld [vmem:[%s2057_s0 + $0x80] sm:$0xff]  ;;  %v59_v42 = vld [vmem:[%s2057_s0 + $0x88] sm:$0xff] }
  0x17   :  { %v90_v37 = vld [vmem:[%s2057_s0 + $0x180] sm:$0xff]  ;;  %v91_v43 = vld [vmem:[%s2057_s0 + $0x188] sm:$0xff]  ;;  %v60_v48 = vld [vmem:[%s2057_s0 + $0x90] sm:$0xff] }
  0x18   :  { %v92_v49 = vld [vmem:[%s2057_s0 + $0x190] sm:$0xff]  ;;  %v61_v54 = vld [vmem:[%s2057_s0 + $0x98] sm:$0xff]  ;;  %v62_v60 = vld [vmem:[%s2057_s0 + $0xa0] sm:$0xff] }
  0x19   :  { %v93_v55 = vld [vmem:[%s2057_s0 + $0x198] sm:$0xff]  ;;  %v94_v61 = vld [vmem:[%s2057_s0 + $0x1a0] sm:$0xff]  ;;  %v63_v2 = vld [vmem:[%s2057_s0 + $0xa8] sm:$0xff] }
  0x1a   :  { %v95_v3 = vld [vmem:[%s2057_s0 + $0x1a8] sm:$0xff] }
  0x1d   :  { %997 = vmatmul.msk.f32.gmra.mxu0 %vm117_vm1, %v43_v5  ;;  %1029 = vmatmul.msk.f32.gmra.mxu2 %vm117_vm1, %v75_v6 }
  0x1e   :  { %1062 = vmatmul.msk.f32.gmra.mxu1 %vm117_vm1, %v43_v5  ;;  %1094 = vmatmul.msk.f32.gmra.mxu3 %vm117_vm1, %v75_v6 }
  0x25   :  { %998 = vmatmul.msk.f32.gmra.mxu0 %vm117_vm1, %v44_v7  ;;  %1030 = vmatmul.msk.f32.gmra.mxu2 %vm117_vm1, %v76_v8 }
  0x26   :  { %1063 = vmatmul.msk.f32.gmra.mxu1 %vm117_vm1, %v44_v7  ;;  %1095 = vmatmul.msk.f32.gmra.mxu3 %vm117_vm1, %v76_v8  ;;  %v64_v8 = vld [vmem:[%s2057_s0 + $0xb0] sm:$0xff] }
  0x2d   :  { %999 = vmatmul.msk.f32.gmra.mxu0 %vm117_vm1, %v45_v9  ;;  %1031 = vmatmul.msk.f32.gmra.mxu2 %vm117_vm1, %v77_v10 }
  0x2e   :  { %1064 = vmatmul.msk.f32.gmra.mxu1 %vm117_vm1, %v45_v9  ;;  %1096 = vmatmul.msk.f32.gmra.mxu3 %vm117_vm1, %v77_v10  ;;  %v96_v9 = vld [vmem:[%s2057_s0 + $0x1b0] sm:$0xff] }
  0x35   :  { %1000 = vmatmul.msk.f32.gmra.mxu0 %vm117_vm1, %v46_v11  ;;  %1032 = vmatmul.msk.f32.gmra.mxu2 %vm117_vm1, %v78_v12 }
  0x36   :  { %1065 = vmatmul.msk.f32.gmra.mxu1 %vm117_vm1, %v46_v11  ;;  %1097 = vmatmul.msk.f32.gmra.mxu3 %vm117_vm1, %v78_v12 }
  0x3d   :  { %1001 = vmatmul.msk.f32.gmra.mxu0 %vm117_vm1, %v47_v13  ;;  %1033 = vmatmul.msk.f32.gmra.mxu2 %vm117_vm1, %v79_v14 }
  0x3e   :  { %1066 = vmatmul.msk.f32.gmra.mxu1 %vm117_vm1, %v47_v13  ;;  %1098 = vmatmul.msk.f32.gmra.mxu3 %vm117_vm1, %v79_v14  ;;  %v65_v14 = vld [vmem:[%s2057_s0 + $0xb8] sm:$0xff] }
  0x45   :  { %1002 = vmatmul.msk.f32.gmra.mxu0 %vm117_vm1, %v48_v15  ;;  %1034 = vmatmul.msk.f32.gmra.mxu2 %vm117_vm1, %v80_v16 }
  0x46   :  { %1067 = vmatmul.msk.f32.gmra.mxu1 %vm117_vm1, %v48_v15  ;;  %1099 = vmatmul.msk.f32.gmra.mxu3 %vm117_vm1, %v80_v16  ;;  %v97_v15 = vld [vmem:[%s2057_s0 + $0x1b8] sm:$0xff] }
  0x4d   :  { %1003 = vmatmul.msk.f32.gmra.mxu0 %vm117_vm1, %v49_v17  ;;  %1035 = vmatmul.msk.f32.gmra.mxu2 %vm117_vm1, %v81_v18 }
  0x4e   :  { %1068 = vmatmul.msk.f32.gmra.mxu1 %vm117_vm1, %v49_v17  ;;  %1100 = vmatmul.msk.f32.gmra.mxu3 %vm117_vm1, %v81_v18  ;;  %v107_v17 = vld [vmem:[#allocation4] sm:$0x3] }
  0x55   :  { %1004 = vmatmul.msk.f32.gmra.mxu0 %vm117_vm1, %v50_v19  ;;  %1036 = vmatmul.msk.f32.gmra.mxu2 %vm117_vm1, %v82_v20 }
  0x56   :  { %1069 = vmatmul.msk.f32.gmra.mxu1 %vm117_vm1, %v50_v19  ;;  %1101 = vmatmul.msk.f32.gmra.mxu3 %vm117_vm1, %v82_v20 }
  0x5d   :  { %1005 = vmatmul.msk.f32.gmra.mxu0 %vm117_vm1, %v51_v21  ;;  %1037 = vmatmul.msk.f32.gmra.mxu2 %vm117_vm1, %v83_v22 }
  0x5e   :  { %1070 = vmatmul.msk.f32.gmra.mxu1 %vm117_vm1, %v51_v21  ;;  %1102 = vmatmul.msk.f32.gmra.mxu3 %vm117_vm1, %v83_v22  ;;  %v66_v21 = vld [vmem:[%s2057_s0 + $0xc0] sm:$0xff] }
  0x5f   :  { %v98_v22 = vld [vmem:[%s2057_s0 + $0x1c0] sm:$0xff] }
  0x65   :  { %1006 = vmatmul.msk.f32.gmra.mxu0 %vm117_vm1, %v52_v23  ;;  %1038 = vmatmul.msk.f32.gmra.mxu2 %vm117_vm1, %v84_v24 }
  0x66   :  { %1071 = vmatmul.msk.f32.gmra.mxu1 %vm117_vm1, %v52_v23  ;;  %1103 = vmatmul.msk.f32.gmra.mxu3 %vm117_vm1, %v84_v24  ;;  %v1521_v23 = vperm.slane %v107_v17, 0 }
  0x6d   :  { %1007 = vmatmul.msk.f32.gmra.mxu0 %vm117_vm1, %v53_v25  ;;  %1039 = vmatmul.msk.f32.gmra.mxu2 %vm117_vm1, %v85_v26 }
  0x6e   :  { %1072 = vmatmul.msk.f32.gmra.mxu1 %vm117_vm1, %v53_v25  ;;  %1104 = vmatmul.msk.f32.gmra.mxu3 %vm117_vm1, %v85_v26  ;;  %v1525_v25 = vperm.slane %v107_v17, 1 }
  0x75   :  { %1008 = vmatmul.msk.f32.gmra.mxu0 %vm117_vm1, %v54_v27  ;;  %1040 = vmatmul.msk.f32.gmra.mxu2 %vm117_vm1, %v86_v28 }
  0x76   :  { %1073 = vmatmul.msk.f32.gmra.mxu1 %vm117_vm1, %v54_v27  ;;  %1105 = vmatmul.msk.f32.gmra.mxu3 %vm117_vm1, %v86_v28 }
  0x7d   :  { %1009 = vmatmul.msk.f32.gmra.mxu0 %vm117_vm1, %v55_v29  ;;  %1041 = vmatmul.msk.f32.gmra.mxu2 %vm117_vm1, %v87_v30 }
  0x7e   :  { %1074 = vmatmul.msk.f32.gmra.mxu1 %vm117_vm1, %v55_v29  ;;  %1106 = vmatmul.msk.f32.gmra.mxu3 %vm117_vm1, %v87_v30 }
  0x85   :  { %1010 = vmatmul.msk.f32.gmra.mxu0 %vm117_vm1, %v56_v31  ;;  %1042 = vmatmul.msk.f32.gmra.mxu2 %vm117_vm1, %v88_v32 }
  0x86   :  { %1075 = vmatmul.msk.f32.gmra.mxu1 %vm117_vm1, %v56_v31  ;;  %1107 = vmatmul.msk.f32.gmra.mxu3 %vm117_vm1, %v88_v32 }
  0x8d   :  { %1011 = vmatmul.msk.f32.gmra.mxu0 %vm117_vm1, %v57_v33  ;;  %1043 = vmatmul.msk.f32.gmra.mxu2 %vm117_vm1, %v89_v34 }
  0x8e   :  { %1076 = vmatmul.msk.f32.gmra.mxu1 %vm117_vm1, %v57_v33  ;;  %1108 = vmatmul.msk.f32.gmra.mxu3 %vm117_vm1, %v89_v34  ;;  %v67_v33 = vld [vmem:[%s2057_s0 + $0xc8] sm:$0xff] }
  0x8f   :  { %v99_v34 = vld [vmem:[%s2057_s0 + $0x1c8] sm:$0xff] }
  0x92   :  { %v1369_v35 = vpop.f32.mrf.mxu0 }
  0x93   :  { %v1377_v38 = vpop.f32.mrf.mxu1 }
  0x95   :  { %1012 = vmatmul.msk.f32.gmra.mxu0 %vm117_vm1, %v58_v36  ;;  %1044 = vmatmul.msk.f32.gmra.mxu2 %vm117_vm1, %v90_v37 }
  0x96   :  { %1077 = vmatmul.msk.f32.gmra.mxu1 %vm117_vm1, %v58_v36  ;;  %1109 = vmatmul.msk.f32.gmra.mxu3 %vm117_vm1, %v90_v37 }
  0x98   :  { %v1383_v39 = vpop.f32.mrf.mxu2 }
  0x99   :  { %v1385_v40 = vpop.f32.mrf.mxu3  ;;  %v429_v26 = vadd.f32 %v1383_v39, %v1521_v23 }
  0x9a   :  { %v1387_v41 = vpop.f32.mrf.mxu0  ;;  %v638_v27 = vadd.f32 %v1385_v40, %v1525_v25 }
  0x9b   :  { %v1395_v44 = vpop.f32.mrf.mxu1  ;;  %v797_v36 = vmax.f32 %v429_v26, 0.0 }
  0x9c   :  { %v798_v40 = vmax.f32 %v638_v27, 0.0 }
  0x9d   :  { %1013 = vmatmul.msk.f32.gmra.mxu0 %vm117_vm1, %v59_v42  ;;  %1045 = vmatmul.msk.f32.gmra.mxu2 %vm117_vm1, %v91_v43 }
  0x9e   :  { %1078 = vmatmul.msk.f32.gmra.mxu1 %vm117_vm1, %v59_v42  ;;  %1110 = vmatmul.msk.f32.gmra.mxu3 %vm117_vm1, %v91_v43 }
  0xa0   :  { %v1401_v45 = vpop.f32.mrf.mxu2 }
  0xa1   :  { %v1403_v46 = vpop.f32.mrf.mxu3 }
  0xa2   :  { %v1405_v47 = vpop.f32.mrf.mxu0 }
  0xa3   :  { %v1413_v50 = vpop.f32.mrf.mxu1 }
  0xa5   :  { %1014 = vmatmul.msk.f32.gmra.mxu0 %vm117_vm1, %v60_v48  ;;  %1046 = vmatmul.msk.f32.gmra.mxu2 %vm117_vm1, %v92_v49 }
  0xa6   :  { %1079 = vmatmul.msk.f32.gmra.mxu1 %vm117_vm1, %v60_v48  ;;  %1111 = vmatmul.msk.f32.gmra.mxu3 %vm117_vm1, %v92_v49  ;;  %v432_v49 = vadd.f32 %v1401_v45, %v1521_v23 }
  0xa8   :  { %v1419_v51 = vpop.f32.mrf.mxu2  ;;  %v799_v45 = vmax.f32 %v432_v49, 0.0 }
  0xa9   :  { %v1421_v52 = vpop.f32.mrf.mxu3  ;;  %v435_v26 = vadd.f32 %v1419_v51, %v1521_v23 }
  0xaa   :  { %v1423_v53 = vpop.f32.mrf.mxu0  ;;  %v644_v27 = vadd.f32 %v1421_v52, %v1525_v25 }
  0xab   :  { %v1431_v56 = vpop.f32.mrf.mxu1  ;;  %v801_v51 = vmax.f32 %v435_v26, 0.0 }
  0xac   :  { %v802_v52 = vmax.f32 %v644_v27, 0.0 }
  0xad   :  { %1015 = vmatmul.msk.f32.gmra.mxu0 %vm117_vm1, %v61_v54  ;;  %1047 = vmatmul.msk.f32.gmra.mxu2 %vm117_vm1, %v93_v55 }
  0xae   :  { %1080 = vmatmul.msk.f32.gmra.mxu1 %vm117_vm1, %v61_v54  ;;  %1112 = vmatmul.msk.f32.gmra.mxu3 %vm117_vm1, %v93_v55  ;;  %v641_v54 = vadd.f32 %v1403_v46, %v1525_v25 }
  0xb0   :  { %v1437_v57 = vpop.f32.mrf.mxu2  ;;  %v800_v46 = vmax.f32 %v641_v54, 0.0 }
  0xb1   :  { %v1439_v58 = vpop.f32.mrf.mxu3 }
  0xb2   :  { %v1441_v59 = vpop.f32.mrf.mxu0 }
  0xb3   :  { %v1449_v62 = vpop.f32.mrf.mxu1 }
  0xb5   :  { %1016 = vmatmul.msk.f32.gmra.mxu0 %vm117_vm1, %v62_v60  ;;  %1048 = vmatmul.msk.f32.gmra.mxu2 %vm117_vm1, %v94_v61 }
  0xb6   :  { %1081 = vmatmul.msk.f32.gmra.mxu1 %vm117_vm1, %v62_v60  ;;  %1113 = vmatmul.msk.f32.gmra.mxu3 %vm117_vm1, %v94_v61 }
  0xb8   :  { %v1455_v63 = vpop.f32.mrf.mxu2 }
  0xb9   :  { %v1457_v0 = vpop.f32.mrf.mxu3 }
  0xba   :  { %v1459_v1 = vpop.f32.mrf.mxu0 }
  0xbb   :  { %v1467_v4 = vpop.f32.mrf.mxu1 }
  0xbd   :  { %1017 = vmatmul.msk.f32.gmra.mxu0 %vm117_vm1, %v63_v2  ;;  %1049 = vmatmul.msk.f32.gmra.mxu2 %vm117_vm1, %v95_v3 }
  0xbe   :  { %1082 = vmatmul.msk.f32.gmra.mxu1 %vm117_vm1, %v63_v2  ;;  %1114 = vmatmul.msk.f32.gmra.mxu3 %vm117_vm1, %v95_v3 }
  0xc0   :  { %v1473_v5 = vpop.f32.mrf.mxu2 }
  0xc1   :  { %v1475_v6 = vpop.f32.mrf.mxu3 }
  0xc2   :  { %v1477_v7 = vpop.f32.mrf.mxu0 }
  0xc3   :  { %v1485_v10 = vpop.f32.mrf.mxu1 }
  0xc5   :  { %1018 = vmatmul.msk.f32.gmra.mxu0 %vm117_vm1, %v64_v8  ;;  %1050 = vmatmul.msk.f32.gmra.mxu2 %vm117_vm1, %v96_v9 }
  0xc6   :  { %1083 = vmatmul.msk.f32.gmra.mxu1 %vm117_vm1, %v64_v8  ;;  %1115 = vmatmul.msk.f32.gmra.mxu3 %vm117_vm1, %v96_v9  ;;  %v68_v8 = vld [vmem:[%s2057_s0 + $0xd0] sm:$0xff] }
  0xc7   :  { %v100_v9 = vld [vmem:[%s2057_s0 + $0x1d0] sm:$0xff] }
  0xc8   :  { %v1491_v11 = vpop.f32.mrf.mxu2 }
  0xc9   :  { %v1493_v12 = vpop.f32.mrf.mxu3 }
  0xca   :  { %v1495_v13 = vpop.f32.mrf.mxu0 }
  0xcb   :  { %v1503_v16 = vpop.f32.mrf.mxu1 }
  0xcd   :  { %1019 = vmatmul.msk.f32.gmra.mxu0 %vm117_vm1, %v65_v14  ;;  %1051 = vmatmul.msk.f32.gmra.mxu2 %vm117_vm1, %v97_v15 }
  0xce   :  { %1084 = vmatmul.msk.f32.gmra.mxu1 %vm117_vm1, %v65_v14  ;;  %1116 = vmatmul.msk.f32.gmra.mxu3 %vm117_vm1, %v97_v15 }
  0xd0   :  { %v1509_v18 = vpop.f32.mrf.mxu2 }
  0xd1   :  { %v1511_v19 = vpop.f32.mrf.mxu3 }
  0xd2   :  { %v1513_v20 = vpop.f32.mrf.mxu0 }
  0xd3   :  { %v1523_v24 = vpop.f32.mrf.mxu1 }
  0xd5   :  { %1020 = vmatmul.msk.f32.gmra.mxu0 %vm117_vm1, %v66_v21  ;;  %1052 = vmatmul.msk.f32.gmra.mxu2 %vm117_vm1, %v98_v22 }
  0xd6   :  { %1085 = vmatmul.msk.f32.gmra.mxu1 %vm117_vm1, %v66_v21  ;;  %1117 = vmatmul.msk.f32.gmra.mxu3 %vm117_vm1, %v98_v22 }
  0xd8   :  { %v452_v28 = vpop.f32.mrf.mxu2 }
  0xd9   :  { %v453_v29 = vadd.f32 %v452_v28, %v1521_v23  ;;  %v661_v30 = vpop.f32.mrf.mxu3 }
  0xda   :  { %v662_v31 = vadd.f32 %v661_v30, %v1525_v25  ;;  %v1537_v32 = vpop.f32.mrf.mxu0 }
  0xdb   :  { %v813_v37 = vmax.f32 %v453_v29, 0.0  ;;  %v1545_v39 = vpop.f32.mrf.mxu1 }
  0xdc   :  { %v814_v42 = vmax.f32 %v662_v31, 0.0 }
  0xdd   :  { %v1547_v43 = vmax.f32 %v797_v36, %v813_v37  ;;  %1021 = vmatmul.msk.f32.gmra.mxu0 %vm117_vm1, %v67_v33  ;;  %1053 = vmatmul.msk.f32.gmra.mxu2 %vm117_vm1, %v99_v34  ;;  %v101_v36 = vld [vmem:[%s2057_s0 + $0x1d8] sm:$0xff] }
  0xde   :  { %v1551_v48 = vmax.f32 %v798_v40, %v814_v42  ;;  %1086 = vmatmul.msk.f32.gmra.mxu1 %vm117_vm1, %v67_v33  ;;  %1118 = vmatmul.msk.f32.gmra.mxu3 %vm117_vm1, %v99_v34  ;;  %v69_v34 = vld [vmem:[%s2057_s0 + $0xd8] sm:$0xff] }
  0xe0   :  { %v455_v55 = vpop.f32.mrf.mxu2 }
  0xe1   :  { %v456_v60 = vadd.f32 %v455_v55, %v1521_v23  ;;  %v664_v61 = vpop.f32.mrf.mxu3  ;;  %v438_v55 = vadd.f32 %v1437_v57, %v1521_v23 }
  0xe2   :  { %v665_v2 = vadd.f32 %v664_v61, %v1525_v25  ;;  %v1561_v3 = vpop.f32.mrf.mxu0 }
  0xe3   :  { %v815_v14 = vmax.f32 %v456_v60, 0.0  ;;  %v1569_v15 = vpop.f32.mrf.mxu1  ;;  %v647_v60 = vadd.f32 %v1439_v58, %v1525_v25  ;;  %v803_v57 = vmax.f32 %v438_v55, 0.0  ;;  %v103_v55 = vld [vmem:[%s2057_s0 + $0x1e8] sm:$0xff] }
  0xe4   :  { %v816_v17 = vmax.f32 %v665_v2, 0.0 }
  0xe5   :  { %v1571_v21 = vmax.f32 %v799_v45, %v815_v14  ;;  %1022 = vmatmul.msk.f32.gmra.mxu0 %vm117_vm1, %v68_v8  ;;  %1054 = vmatmul.msk.f32.gmra.mxu2 %vm117_vm1, %v100_v9  ;;  %v70_v14 = vld [vmem:[%s2057_s0 + $0xe0] sm:$0xff]  ;;  %v804_v58 = vmax.f32 %v647_v60, 0.0 }
  0xe6   :  { %v1575_v22 = vmax.f32 %v800_v46, %v816_v17  ;;  %1087 = vmatmul.msk.f32.gmra.mxu1 %vm117_vm1, %v68_v8  ;;  %1119 = vmatmul.msk.f32.gmra.mxu3 %vm117_vm1, %v100_v9  ;;  %v102_v46 = vld [vmem:[%s2057_s0 + $0x1e0] sm:$0xff] }
  0xe8   :  { %v458_v28 = vpop.f32.mrf.mxu2 }
  0xe9   :  { %v459_v29 = vadd.f32 %v458_v28, %v1521_v23  ;;  %v667_v30 = vpop.f32.mrf.mxu3 }
  0xea   :  { %v668_v31 = vadd.f32 %v667_v30, %v1525_v25  ;;  %v1585_v33 = vpop.f32.mrf.mxu0  ;;  %v441_v30 = vadd.f32 %v1455_v63, %v1521_v23 }
  0xeb   :  { %v817_v37 = vmax.f32 %v459_v29, 0.0  ;;  %v1593_v40 = vpop.f32.mrf.mxu1 }
  0xec   :  { %v818_v42 = vmax.f32 %v668_v31, 0.0  ;;  %v650_v31 = vadd.f32 %v1457_v0, %v1525_v25  ;;  %v805_v63 = vmax.f32 %v441_v30, 0.0 }
  0xed   :  { %v1595_v49 = vmax.f32 %v801_v51, %v817_v37  ;;  %1023 = vmatmul.msk.f32.gmra.mxu0 %vm117_vm1, %v69_v34  ;;  %1055 = vmatmul.msk.f32.gmra.mxu2 %vm117_vm1, %v101_v36 }
  0xee   :  { %v1599_v54 = vmax.f32 %v802_v52, %v818_v42  ;;  %1088 = vmatmul.msk.f32.gmra.mxu1 %vm117_vm1, %v69_v34  ;;  %1120 = vmatmul.msk.f32.gmra.mxu3 %vm117_vm1, %v101_v36  ;;  %v71_v42 = vld [vmem:[%s2057_s0 + $0xe8] sm:$0xff]  ;;  %v806_v0 = vmax.f32 %v650_v31, 0.0  ;;  %v72_v31 = vld [vmem:[%s2057_s0 + $0xf0] sm:$0xff] }
  0xf0   :  { %v461_v61 = vpop.f32.mrf.mxu2 }
  0xf1   :  { %v462_v2 = vadd.f32 %v461_v61, %v1521_v23  ;;  %v670_v8 = vpop.f32.mrf.mxu3 }
  0xf2   :  { %v671_v9 = vadd.f32 %v670_v8, %v1525_v25  ;;  %v1609_v45 = vpop.f32.mrf.mxu0 }
  0xf3   :  { %v819_v17 = vmax.f32 %v462_v2, 0.0  ;;  %v1617_v26 = vpop.f32.mrf.mxu1 }
  0xf4   :  { %v820_v27 = vmax.f32 %v671_v9, 0.0 }
  0xf5   :  { %v1619_v28 = vmax.f32 %v803_v57, %v819_v17  ;;  %1024 = vmatmul.msk.f32.gmra.mxu0 %vm117_vm1, %v70_v14  ;;  %1056 = vmatmul.msk.f32.gmra.mxu2 %vm117_vm1, %v102_v46 }
  0xf6   :  { %v1623_v29 = vmax.f32 %v804_v58, %v820_v27  ;;  %1089 = vmatmul.msk.f32.gmra.mxu1 %vm117_vm1, %v70_v14  ;;  %1121 = vmatmul.msk.f32.gmra.mxu3 %vm117_vm1, %v102_v46  ;;  %v444_v14 = vadd.f32 %v1473_v5, %v1521_v23  ;;  %v653_v46 = vadd.f32 %v1475_v6, %v1525_v25 }
  0xf7   :  { %2062 = vst [vmem:[#allocation8_spill] sm:$0xff] %v1619_v28 }
  0xf8   :  { %2063 = vst [vmem:[#allocation9_spill] sm:$0xff] %v1623_v29  ;;  %v464_v34 = vpop.f32.mrf.mxu2  ;;  %v807_v5 = vmax.f32 %v444_v14, 0.0  ;;  %v808_v6 = vmax.f32 %v653_v46, 0.0 }
  0xf9   :  { %v465_v36 = vadd.f32 %v464_v34, %v1521_v23  ;;  %v673_v51 = vpop.f32.mrf.mxu3  ;;  %v104_v34 = vld [vmem:[%s2057_s0 + $0x1f0] sm:$0xff] }
  0xfa   :  { %v674_v37 = vadd.f32 %v673_v51, %v1525_v25  ;;  %v1633_v52 = vpop.f32.mrf.mxu0 }
  0xfb   :  { %2064 = vst [vmem:[#allocation10_spill] sm:$0xff] %v1633_v52  ;;  %v821_v60 = vmax.f32 %v465_v36, 0.0  ;;  %v1641_v61 = vpop.f32.mrf.mxu1 }
  0xfc   :  { %2065 = vst [vmem:[#allocation11_spill] sm:$0xff] %v1641_v61  ;;  %v822_v2 = vmax.f32 %v674_v37, 0.0 }
  0xfd   :  { %v1643_v8 = vmax.f32 %v805_v63, %v821_v60  ;;  %1025 = vmatmul.msk.f32.gmra.mxu0 %vm117_vm1, %v71_v42  ;;  %1057 = vmatmul.msk.f32.gmra.mxu2 %vm117_vm1, %v103_v55  ;;  %v447_v63 = vadd.f32 %v1491_v11, %v1521_v23  ;;  %v656_v60 = vadd.f32 %v1493_v12, %v1525_v25 }
  0xfe   :  { %v1647_v9 = vmax.f32 %v806_v0, %v822_v2  ;;  %1090 = vmatmul.msk.f32.gmra.mxu1 %vm117_vm1, %v71_v42  ;;  %1122 = vmatmul.msk.f32.gmra.mxu3 %vm117_vm1, %v103_v55 }
  0xff   :  { %2066 = vst [vmem:[#allocation12_spill] sm:$0xff] %v1643_v8  ;;  %v809_v11 = vmax.f32 %v447_v63, 0.0  ;;  %v810_v12 = vmax.f32 %v656_v60, 0.0 }
 0x100   :  { %2067 = vst [vmem:[#allocation13_spill] sm:$0xff] %v1647_v9  ;;  %v467_v57 = vpop.f32.mrf.mxu2 }
 0x101   :  { %v468_v17 = vadd.f32 %v467_v57, %v1521_v23  ;;  %v676_v58 = vpop.f32.mrf.mxu3 }
 0x102   :  { %v677_v27 = vadd.f32 %v676_v58, %v1525_v25  ;;  %v1657_v30 = vpop.f32.mrf.mxu0  ;;  %v105_v58 = vld [vmem:[%s2057_s0 + $0x1f8] sm:$0xff] }
 0x103   :  { %2068 = vst [vmem:[#allocation14_spill] sm:$0xff] %v1657_v30  ;;  %v823_v36 = vmax.f32 %v468_v17, 0.0  ;;  %v1665_v51 = vpop.f32.mrf.mxu1  ;;  %v73_v17 = vld [vmem:[%s2057_s0 + $0xf8] sm:$0xff] }
 0x104   :  { %2069 = vst [vmem:[#allocation15_spill] sm:$0xff] %v1665_v51  ;;  %v824_v37 = vmax.f32 %v677_v27, 0.0 }
 0x105   :  { %v1667_v42 = vmax.f32 %v807_v5, %v823_v36  ;;  %1026 = vmatmul.msk.f32.gmra.mxu0 %vm117_vm1, %v72_v31  ;;  %1058 = vmatmul.msk.f32.gmra.mxu2 %vm117_vm1, %v104_v34 }
 0x106   :  { %v1671_v55 = vmax.f32 %v808_v6, %v824_v37  ;;  %1091 = vmatmul.msk.f32.gmra.mxu1 %vm117_vm1, %v72_v31  ;;  %1123 = vmatmul.msk.f32.gmra.mxu3 %vm117_vm1, %v104_v34  ;;  %v450_v6 = vadd.f32 %v1509_v18, %v1521_v23  ;;  %v659_v37 = vadd.f32 %v1511_v19, %v1525_v25 }
 0x107   :  { %2070 = vst [vmem:[#allocation16_spill] sm:$0xff] %v1667_v42 }
 0x108   :  { %2071 = vst [vmem:[#allocation17_spill] sm:$0xff] %v1671_v55  ;;  %v470_v0 = vpop.f32.mrf.mxu2 }
 0x109   :  { %v471_v2 = vadd.f32 %v470_v0, %v1521_v23  ;;  %v679_v14 = vpop.f32.mrf.mxu3 }
 0x10a   :  { %v680_v46 = vadd.f32 %v679_v14, %v1525_v25  ;;  %v1681_v57 = vpop.f32.mrf.mxu0 }
 0x10b   :  { %2072 = vst [vmem:[#allocation18_spill] sm:$0xff] %v1681_v57  ;;  %v825_v27 = vmax.f32 %v471_v2, 0.0  ;;  %v1689_v31 = vpop.f32.mrf.mxu1 }
 0x10c   :  { %2073 = vst [vmem:[#allocation19_spill] sm:$0xff] %v1689_v31  ;;  %v826_v34 = vmax.f32 %v680_v46, 0.0  ;;  %v811_v46 = vmax.f32 %v450_v6, 0.0 }
 0x10d   :  { %v1691_v5 = vmax.f32 %v809_v11, %v825_v27  ;;  %1027 = vmatmul.msk.f32.gmra.mxu0 %vm117_vm1, %v73_v17  ;;  %1059 = vmatmul.msk.f32.gmra.mxu2 %vm117_vm1, %v105_v58 }
 0x10e   :  { %v1695_v36 = vmax.f32 %v810_v12, %v826_v34  ;;  %1092 = vmatmul.msk.f32.gmra.mxu1 %vm117_vm1, %v73_v17  ;;  %1124 = vmatmul.msk.f32.gmra.mxu3 %vm117_vm1, %v105_v58  ;;  %v812_v12 = vmax.f32 %v659_v37, 0.0 }
 0x10f   :  { %2074 = vst [vmem:[#allocation20_spill] sm:$0xff] %v1691_v5 }
 0x110   :  { %2075 = vst [vmem:[#allocation21_spill] sm:$0xff] %v1695_v36  ;;  %v473_v63 = vpop.f32.mrf.mxu2 }
 0x111   :  { %v474_v60 = vadd.f32 %v473_v63, %v1521_v23  ;;  %v682_v0 = vpop.f32.mrf.mxu3 }
 0x112   :  { %v683_v2 = vadd.f32 %v682_v0, %v1525_v25  ;;  %v380_v14 = vpop.f32.mrf.mxu0 }
 0x113   :  { %v827_v11 = vmax.f32 %v474_v60, 0.0  ;;  %v589_v27 = vpop.f32.mrf.mxu1 }
 0x114   :  { %v828_v17 = vmax.f32 %v683_v2, 0.0 }
 0x115   :  { %v1705_v34 = vmax.f32 %v811_v46, %v827_v11 }
 0x116   :  { %v1707_v58 = vmax.f32 %v812_v12, %v828_v17 }
 0x117   :  { %2076 = vst [vmem:[#allocation22_spill] sm:$0xff] %v1705_v34 }
 0x118   :  { %2077 = vst [vmem:[#allocation23_spill] sm:$0xff] %v1707_v58  ;;  %v1709_v18 = vpop.f32.mrf.mxu2 }
 0x119   :  { %v1711_v36 = vpop.f32.mrf.mxu3 }
 0x11a   :  { %v1713_v19 = vpop.f32.mrf.mxu0 }
 0x11b   :  { %v1715_v63 = vpop.f32.mrf.mxu1 }
 0x120   :  { %v1717_v5 = vpop.f32.mrf.mxu2 }
 0x121   :  { %v1719_v0 = vpop.f32.mrf.mxu3 }
 0x122   :  { %v1721_v6 = vpop.f32.mrf.mxu0 }
 0x123   :  { %v1723_v37 = vpop.f32.mrf.mxu1 }
 0x128   :  { %v1725_v60 = vpop.f32.mrf.mxu2 }
 0x129   :  { %v1727_v2 = vpop.f32.mrf.mxu3 }
 0x12a   :  { %v1729_v46 = vpop.f32.mrf.mxu0 }
 0x12b   :  { %v1731_v11 = vpop.f32.mrf.mxu1 }
 0x130   :  { %v1733_v12 = vpop.f32.mrf.mxu2 }
 0x131   :  { %v1735_v17 = vpop.f32.mrf.mxu3 }
 0x132   :  { %v1737_v58 = vpop.f32.mrf.mxu0 }
 0x133   :  { %2078 = vst [vmem:[#allocation24_spill] sm:$0xff] %v1737_v58  ;;  %v1739_v34 = vpop.f32.mrf.mxu1 }
 0x134   :  { %2079 = vst [vmem:[#allocation25_spill] sm:$0xff] %v1739_v34 }
 0x138   :  { %v1741_v55 = vpop.f32.mrf.mxu2 }
 0x139   :  { %2080 = vst [vmem:[#allocation26_spill] sm:$0xff] %v1741_v55  ;;  %v1743_v42 = vpop.f32.mrf.mxu3  ;;  %v333_v55 = vadd.f32 %v1369_v35, %v1521_v23 }
 0x13a   :  { %2081 = vst [vmem:[#allocation27_spill] sm:$0xff] %v1743_v42  ;;  %v1745_v31 = vpop.f32.mrf.mxu0 }
 0x13b   :  { %2082 = vst [vmem:[#allocation28_spill] sm:$0xff] %v1745_v31  ;;  %v1747_v57 = vpop.f32.mrf.mxu1  ;;  %v542_v31 = vadd.f32 %v1377_v38, %v1525_v25  ;;  %v733_v35 = vmax.f32 %v333_v55, 0.0  ;;  %v1783_v38 = vadd.f32 %v1413_v50, %v1525_v25  ;;  %v357_v55 = vadd.f32 %v1513_v20, %v1521_v23 }
 0x13c   :  { %2083 = vst [vmem:[#allocation29_spill] sm:$0xff] %v1747_v57  ;;  %v1816_v20 = vadd.f32 %v1467_v4, %v1525_v25  ;;  %v1820_v50 = vadd.f32 %v1477_v7, %v1521_v23 }
 0x13d   :  { %v749_v57 = vmax.f32 %v357_v55, 0.0  ;;  %v360_v55 = vadd.f32 %v1537_v32, %v1521_v23 }
 0x140   :  { %v1749_v9 = vpop.f32.mrf.mxu2 }
 0x141   :  { %2084 = vst [vmem:[#allocation30_spill] sm:$0xff] %v1749_v9  ;;  %v1751_v8 = vpop.f32.mrf.mxu3  ;;  %v1769_v9 = vadd.f32 %v1387_v41, %v1521_v23  ;;  %v1787_v41 = vadd.f32 %v1423_v53, %v1521_v23  ;;  %v1807_v53 = vadd.f32 %v1459_v1, %v1521_v23  ;;  %v569_v1 = vadd.f32 %v1545_v39, %v1525_v25 }
 0x142   :  { %2085 = vst [vmem:[#allocation31_spill] sm:$0xff] %v1751_v8  ;;  %v1753_v51 = vpop.f32.mrf.mxu0  ;;  %v384_v39 = vadd.f32 %v1713_v19, %v1521_v23 }
 0x143   :  { %2086 = vst [vmem:[#allocation32_spill] sm:$0xff] %v1753_v51  ;;  %v1755_v30 = vpop.f32.mrf.mxu1 }
 0x144   :  { %2087 = vst [vmem:[#allocation33_spill] sm:$0xff] %v1755_v30  ;;  %v1775_v30 = vadd.f32 %v1395_v44, %v1525_v25  ;;  %v1792_v44 = vadd.f32 %v1431_v56, %v1525_v25  ;;  %v566_v56 = vadd.f32 %v1523_v24, %v1525_v25 }
 0x146   :  { %v750_v24 = vmax.f32 %v566_v56, 0.0 }
 0x148   :  { %v1757_v29 = vpop.f32.mrf.mxu2 }
 0x149   :  { %2088 = vst [vmem:[#allocation34_spill] sm:$0xff] %v1757_v29  ;;  %v1759_v28 = vpop.f32.mrf.mxu3  ;;  %v734_v29 = vmax.f32 %v542_v31, 0.0  ;;  %v1803_v31 = vadd.f32 %v1449_v62, %v1525_v25  ;;  %v381_v62 = vadd.f32 %v380_v14, %v1521_v23 }
 0x14a   :  { %2089 = vst [vmem:[#allocation35_spill] sm:$0xff] %v1759_v28  ;;  %v1765_v42 = vpop.f32.mrf.mxu0  ;;  %v1779_v28 = vadd.f32 %v1405_v47, %v1521_v23  ;;  %v1796_v47 = vadd.f32 %v1441_v59, %v1521_v23  ;;  %v590_v59 = vadd.f32 %v589_v27, %v1525_v25  ;;  %v1849_v27 = vadd.f32 %v1495_v13, %v1521_v23 }
 0x14b   :  { %2090 = vst [vmem:[#allocation36_spill] sm:$0xff] %v1765_v42  ;;  %v1771_v8 = vpop.f32.mrf.mxu1  ;;  %v765_v34 = vmax.f32 %v381_v62, 0.0  ;;  %v862_v62 = vmax.f32 %v734_v29, %v750_v24  ;;  %v593_v13 = vadd.f32 %v1715_v63, %v1525_v25 }
 0x14c   :  { %2091 = vst [vmem:[#allocation37_spill] sm:$0xff] %v1771_v8 }
 0x14d   :  { %2092 = vst [vmem:[#allocation38_spill] sm:$0xff] %v1796_v47  ;;  %v861_v47 = vmax.f32 %v733_v35, %v749_v57 }
 0x150   :  { %v1811_v8 = vpop.f32.mrf.mxu2 }
 0x151   :  { %2093 = vst [vmem:[#allocation39_spill] sm:$0xff] %v1811_v8  ;;  %v1823_v42 = vpop.f32.mrf.mxu3  ;;  %v1829_v8 = vadd.f32 %v1485_v10, %v1525_v25 }
 0x152   :  { %2094 = vst [vmem:[#allocation40_spill] sm:$0xff] %v1823_v42  ;;  %v404_v4 = vpop.f32.mrf.mxu0  ;;  %v742_v42 = vmax.f32 %v1803_v31, 0.0 }
 0x153   :  { %v405_v14 = vadd.f32 %v404_v4, %v1521_v23  ;;  %v613_v61 = vpop.f32.mrf.mxu1  ;;  %v766_v4 = vmax.f32 %v590_v59, 0.0  ;;  %v752_v59 = vmax.f32 %v569_v1, 0.0  ;;  %v768_v1 = vmax.f32 %v593_v13, 0.0 }
 0x154   :  { %v614_v52 = vadd.f32 %v613_v61, %v1525_v25  ;;  %v477_v61 = vadd.f32 %v1709_v18, %v1521_v23  ;;  %v751_v18 = vmax.f32 %v360_v55, 0.0  ;;  %v363_v55 = vadd.f32 %v1561_v3, %v1521_v23 }
 0x155   :  { %v781_v58 = vmax.f32 %v405_v14, 0.0  ;;  %v686_v14 = vadd.f32 %v1711_v36, %v1525_v25 }
 0x156   :  { %v782_v7 = vmax.f32 %v614_v52, 0.0  ;;  %v1855_v52 = vadd.f32 %v1503_v16, %v1525_v25  ;;  %v829_v24 = vmax.f32 %v477_v61, 0.0 }
 0x157   :  { %v877_v56 = vmax.f32 %v765_v34, %v781_v58  ;;  %v830_v10 = vmax.f32 %v686_v14, 0.0 }
 0x158   :  { %v878_v51 = vmax.f32 %v766_v4, %v782_v7  ;;  %v500_v32 = vpop.f32.mrf.mxu2 }
 0x159   :  { %v893_v57 = vmax.f32 %v861_v47, %v877_v56  ;;  %v501_v34 = vadd.f32 %v500_v32, %v1521_v23  ;;  %v709_v58 = vpop.f32.mrf.mxu3  ;;  %v767_v32 = vmax.f32 %v384_v39, 0.0 }
 0x15a   :  { %v894_v29 = vmax.f32 %v862_v62, %v878_v51  ;;  %v710_v36 = vadd.f32 %v709_v58, %v1525_v25  ;;  %v407_v35 = vpop.f32.mrf.mxu0  ;;  %v2095_v62 = vmax.f32 %v1769_v9, 0.0 }
 0x15b   :  { %v845_v7 = vmax.f32 %v501_v34, 0.0  ;;  %v408_v16 = vadd.f32 %v407_v35, %v1521_v23  ;;  %v616_v4 = vpop.f32.mrf.mxu1  ;;  %v480_v34 = vadd.f32 %v1717_v5, %v1521_v23  ;;  %v753_v35 = vmax.f32 %v363_v55, 0.0 }
 0x15c   :  { %v909_v19 = vpack.c.bf16 %v894_v29, %v893_v57  ;;  %v846_v47 = vmax.f32 %v710_v36, 0.0  ;;  %v617_v56 = vadd.f32 %v616_v4, %v1525_v25  ;;  %v863_v58 = vmax.f32 %v2095_v62, %v751_v18 }
 0x15d   :  { %v941_v63 = vmax.f32 %v829_v24, %v845_v7  ;;  %v783_v51 = vmax.f32 %v408_v16, 0.0  ;;  %v572_v57 = vadd.f32 %v1569_v15, %v1525_v25  ;;  %v2096_v29 = vmax.f32 %v1775_v30, 0.0 }
 0x15e   :  { %917 = vst [vmem:[%s2060_s3] sm:$0xff] %v909_v19  ;;  %v942_v61 = vmax.f32 %v830_v10, %v846_v47  ;;  %v784_v14 = vmax.f32 %v617_v56, 0.0  ;;  %v689_v18 = vadd.f32 %v1719_v0, %v1525_v25  ;;  %v387_v15 = vadd.f32 %v1721_v6, %v1521_v23 }
 0x15f   :  { %v957_v3 = vmax.f32 %v1547_v43, %v941_v63  ;;  %v879_v39 = vmax.f32 %v767_v32, %v783_v51  ;;  %v864_v9 = vmax.f32 %v2096_v29, %v752_v59  ;;  %v596_v43 = vadd.f32 %v1723_v37, %v1525_v25 }
 0x160   :  { %v958_v13 = vmax.f32 %v1551_v48, %v942_v61  ;;  %v880_v36 = vmax.f32 %v768_v1, %v784_v14  ;;  %v503_v10 = vpop.f32.mrf.mxu2  ;;  %v754_v4 = vmax.f32 %v572_v57, 0.0  ;;  %v831_v48 = vmax.f32 %v480_v34, 0.0 }
 0x161   :  { %v895_v24 = vmax.f32 %v863_v58, %v879_v39  ;;  %v504_v5 = vadd.f32 %v503_v10, %v1521_v23  ;;  %v712_v7 = vpop.f32.mrf.mxu3  ;;  %v832_v55 = vmax.f32 %v689_v18, 0.0  ;;  %v366_v63 = vadd.f32 %v1585_v33, %v1521_v23 }
 0x162   :  { %v973_v30 = vpack.c.bf16 %v958_v13, %v957_v3  ;;  %v896_v59 = vmax.f32 %v864_v9, %v880_v36  ;;  %v713_v16 = vadd.f32 %v712_v7, %v1525_v25  ;;  %v410_v0 = vpop.f32.mrf.mxu0  ;;  %v769_v51 = vmax.f32 %v387_v15, 0.0 }
 0x163   :  { %v847_v19 = vmax.f32 %v504_v5, 0.0  ;;  %v411_v47 = vadd.f32 %v410_v0, %v1521_v23  ;;  %v619_v56 = vpop.f32.mrf.mxu1  ;;  %v2097_v1 = vmax.f32 %v1779_v28, 0.0  ;;  %v770_v14 = vmax.f32 %v596_v43, 0.0 }
 0x164   :  { %981 = vst [vmem:[%s2060_s3 + $0x40] sm:$0xff] %v973_v30  ;;  %v910_v6 = vpack.c.bf16 %v896_v59, %v895_v24  ;;  %v848_v32 = vmax.f32 %v713_v16, 0.0  ;;  %v620_v37 = vadd.f32 %v619_v56, %v1525_v25  ;;  %v575_v3 = vadd.f32 %v1593_v40, %v1525_v25 }
 0x165   :  { %v943_v62 = vmax.f32 %v831_v48, %v847_v19  ;;  %v785_v58 = vmax.f32 %v411_v47, 0.0  ;;  %v865_v61 = vmax.f32 %v2097_v1, %v753_v35  ;;  %v483_v39 = vadd.f32 %v1725_v60, %v1521_v23 }
 0x166   :  { %918 = vst [vmem:[%s2060_s3 + $0x8] sm:$0xff] %v910_v6  ;;  %v944_v57 = vmax.f32 %v832_v55, %v848_v32  ;;  %v786_v34 = vmax.f32 %v620_v37, 0.0  ;;  %v2098_v9 = vmax.f32 %v1783_v38, 0.0  ;;  %v692_v18 = vadd.f32 %v1727_v2, %v1525_v25 }
 0x167   :  { %v959_v33 = vmax.f32 %v1571_v21, %v943_v62  ;;  %v881_v29 = vmax.f32 %v769_v51, %v785_v58  ;;  %v755_v35 = vmax.f32 %v366_v63, 0.0  ;;  %v390_v40 = vadd.f32 %v1729_v46, %v1521_v23 }
 0x168   :  { %v866_v28 = vmax.f32 %v2098_v9, %v754_v4  ;;  %v960_v13 = vmax.f32 %v1575_v22, %v944_v57  ;;  %v882_v36 = vmax.f32 %v770_v14, %v786_v34  ;;  %v506_v10 = vpop.f32.mrf.mxu2  ;;  %v599_v21 = vadd.f32 %v1731_v11, %v1525_v25 }
 0x169   :  { %v897_v15 = vmax.f32 %v865_v61, %v881_v29  ;;  %v507_v60 = vadd.f32 %v506_v10, %v1521_v23  ;;  %v715_v24 = vpop.f32.mrf.mxu3  ;;  %v756_v43 = vmax.f32 %v575_v3, 0.0  ;;  %v833_v22 = vmax.f32 %v483_v39, 0.0  ;;  %v2101_v39 = vld [vmem:[#allocation24_spill] sm:$0xff] }
 0x16a   :  { %v974_v38 = vpack.c.bf16 %v960_v13, %v959_v33  ;;  %v898_v5 = vmax.f32 %v866_v28, %v882_v36  ;;  %v716_v7 = vadd.f32 %v715_v24, %v1525_v25  ;;  %v413_v2 = vpop.f32.mrf.mxu0  ;;  %v834_v0 = vmax.f32 %v692_v18, 0.0 }
 0x16b   :  { %v849_v30 = vmax.f32 %v507_v60, 0.0  ;;  %v414_v59 = vadd.f32 %v413_v2, %v1521_v23  ;;  %v622_v16 = vpop.f32.mrf.mxu1  ;;  %v369_v48 = vadd.f32 %v1609_v45, %v1521_v23  ;;  %v771_v19 = vmax.f32 %v390_v40, 0.0 }
 0x16c   :  { %982 = vst [vmem:[%s2060_s3 + $0x48] sm:$0xff] %v974_v38  ;;  %v911_v46 = vpack.c.bf16 %v898_v5, %v897_v15  ;;  %v850_v4 = vmax.f32 %v716_v7, 0.0  ;;  %v623_v11 = vadd.f32 %v622_v16, %v1525_v25  ;;  %v2099_v55 = vmax.f32 %v1787_v41, 0.0 }
 0x16d   :  { %v945_v47 = vmax.f32 %v833_v22, %v849_v30  ;;  %v787_v56 = vmax.f32 %v414_v59, 0.0  ;;  %v772_v32 = vmax.f32 %v599_v21, 0.0  ;;  %v578_v51 = vadd.f32 %v1617_v26, %v1525_v25  ;;  %v2103_v21 = vld [vmem:[#allocation10_spill] sm:$0xff] }
 0x16e   :  { %v867_v6 = vmax.f32 %v2099_v55, %v755_v35  ;;  %919 = vst [vmem:[%s2060_s3 + $0x10] sm:$0xff] %v911_v46  ;;  %v946_v37 = vmax.f32 %v834_v0, %v850_v4  ;;  %v788_v63 = vmax.f32 %v623_v11, 0.0  ;;  %v486_v62 = vadd.f32 %v1733_v12, %v1521_v23  ;;  %v2106_v46 = vld [vmem:[#allocation11_spill] sm:$0xff]  ;;  %v2107_v11 = vld [vmem:[#allocation26_spill] sm:$0xff] }
 0x16f   :  { %v961_v45 = vmax.f32 %v1595_v49, %v945_v47  ;;  %v883_v58 = vmax.f32 %v771_v19, %v787_v56  ;;  %v2100_v1 = vmax.f32 %v1792_v44, 0.0  ;;  %v695_v61 = vadd.f32 %v1735_v17, %v1525_v25  ;;  %v2102_v49 = vld [vmem:[#allocation25_spill] sm:$0xff]  ;;  %v2108_v19 = vld [vmem:[#allocation8_spill] sm:$0xff] }
 0x170   :  { %v962_v14 = vmax.f32 %v1599_v54, %v946_v37  ;;  %v884_v57 = vmax.f32 %v772_v32, %v788_v63  ;;  %v509_v34 = vpop.f32.mrf.mxu2  ;;  %v757_v3 = vmax.f32 %v369_v48, 0.0  ;;  %v393_v26 = vadd.f32 %v2101_v39, %v1521_v23  ;;  %v2110_v37 = vld [vmem:[#allocation9_spill] sm:$0xff] }
 0x171   :  { %v868_v41 = vmax.f32 %v2100_v1, %v756_v43  ;;  %v899_v33 = vmax.f32 %v867_v6, %v883_v58  ;;  %v510_v12 = vadd.f32 %v509_v34, %v1521_v23  ;;  %v718_v29 = vpop.f32.mrf.mxu3  ;;  %v602_v9 = vadd.f32 %v2102_v49, %v1525_v25  ;;  %v2104_v43 = vld [vmem:[#allocation38_spill] sm:$0xff]  ;;  %v2109_v6 = vld [vmem:[#allocation27_spill] sm:$0xff]  ;;  %v2111_v58 = vld [vmem:[#allocation28_spill] sm:$0xff] }
 0x172   :  { %v975_v44 = vpack.c.bf16 %v962_v14, %v961_v45  ;;  %v719_v18 = vadd.f32 %v718_v29, %v1525_v25  ;;  %v416_v17 = vpop.f32.mrf.mxu0  ;;  %v758_v13 = vmax.f32 %v578_v51, 0.0  ;;  %v835_v54 = vmax.f32 %v486_v62, 0.0 }
 0x173   :  { %v900_v28 = vmax.f32 %v868_v41, %v884_v57  ;;  %v851_v36 = vmax.f32 %v510_v12, 0.0  ;;  %v417_v10 = vadd.f32 %v416_v17, %v1521_v23  ;;  %v625_v35 = vpop.f32.mrf.mxu1  ;;  %v836_v40 = vmax.f32 %v695_v61, 0.0  ;;  %v2112_v57 = vld [vmem:[#allocation29_spill] sm:$0xff]  ;;  %v2113_v17 = vld [vmem:[#allocation14_spill] sm:$0xff] }
 0x174   :  { %983 = vst [vmem:[%s2060_s3 + $0x50] sm:$0xff] %v975_v44  ;;  %v852_v60 = vmax.f32 %v719_v18, 0.0  ;;  %v626_v24 = vadd.f32 %v625_v35, %v1525_v25  ;;  %v372_v38 = vadd.f32 %v2103_v21, %v1521_v23  ;;  %v773_v5 = vmax.f32 %v393_v26, 0.0  ;;  %v2115_v21 = vld [vmem:[#allocation15_spill] sm:$0xff] }
 0x175   :  { %v912_v15 = vpack.c.bf16 %v900_v28, %v899_v33  ;;  %v947_v7 = vmax.f32 %v835_v54, %v851_v36  ;;  %v789_v2 = vmax.f32 %v417_v10, 0.0  ;;  %v2105_v22 = vmax.f32 %v2104_v43, 0.0 }
 0x176   :  { %v774_v59 = vmax.f32 %v602_v9, 0.0  ;;  %v948_v16 = vmax.f32 %v836_v40, %v852_v60  ;;  %v790_v0 = vmax.f32 %v626_v24, 0.0  ;;  %v581_v4 = vadd.f32 %v2106_v46, %v1525_v25 }
 0x177   :  { %v869_v30 = vmax.f32 %v2105_v22, %v757_v3  ;;  %920 = vst [vmem:[%s2060_s3 + $0x18] sm:$0xff] %v912_v15  ;;  %v489_v48 = vadd.f32 %v2107_v11, %v1521_v23  ;;  %v963_v47 = vmax.f32 %v2108_v19, %v947_v7  ;;  %v885_v56 = vmax.f32 %v773_v5, %v789_v2  ;;  %v2116_v5 = vld [vmem:[#allocation30_spill] sm:$0xff]  ;;  %v2117_v2 = vld [vmem:[#allocation12_spill] sm:$0xff] }
 0x178   :  { %v870_v55 = vmax.f32 %v742_v42, %v758_v13  ;;  %v698_v32 = vadd.f32 %v2109_v6, %v1525_v25  ;;  %v964_v63 = vmax.f32 %v2110_v37, %v948_v16  ;;  %v886_v51 = vmax.f32 %v774_v59, %v790_v0  ;;  %v512_v62 = vpop.f32.mrf.mxu2  ;;  %v2119_v59 = vld [vmem:[#allocation31_spill] sm:$0xff]  ;;  %v2120_v0 = vld [vmem:[#allocation13_spill] sm:$0xff]  ;;  %v2121_v19 = vld [vmem:[#allocation32_spill] sm:$0xff] }
 0x179   :  { %v759_v45 = vmax.f32 %v372_v38, 0.0  ;;  %v396_v1 = vadd.f32 %v2111_v58, %v1521_v23  ;;  %v901_v41 = vmax.f32 %v869_v30, %v885_v56  ;;  %v513_v61 = vadd.f32 %v512_v62, %v1521_v23  ;;  %v721_v14 = vpop.f32.mrf.mxu3 }
 0x17a   :  { %v605_v34 = vadd.f32 %v2112_v57, %v1525_v25  ;;  %v976_v31 = vpack.c.bf16 %v964_v63, %v963_v47  ;;  %v902_v42 = vmax.f32 %v870_v55, %v886_v51  ;;  %v722_v3 = vadd.f32 %v721_v14, %v1525_v25  ;;  %v419_v39 = vpop.f32.mrf.mxu0 }
 0x17b   :  { %v760_v26 = vmax.f32 %v581_v4, 0.0  ;;  %v837_v33 = vmax.f32 %v489_v48, 0.0  ;;  %v853_v12 = vmax.f32 %v513_v61, 0.0  ;;  %v420_v29 = vadd.f32 %v419_v39, %v1521_v23  ;;  %v628_v49 = vpop.f32.mrf.mxu1 }
 0x17c   :  { %v838_v9 = vmax.f32 %v698_v32, 0.0  ;;  %984 = vst [vmem:[%s2060_s3 + $0x58] sm:$0xff] %v976_v31  ;;  %v913_v44 = vpack.c.bf16 %v902_v42, %v901_v41  ;;  %v854_v28 = vmax.f32 %v722_v3, 0.0  ;;  %v629_v18 = vadd.f32 %v628_v49, %v1525_v25  ;;  %v2122_v32 = vld [vmem:[#allocation33_spill] sm:$0xff]  ;;  %v2123_v42 = vld [vmem:[#allocation18_spill] sm:$0xff] }
 0x17d   :  { %v375_v13 = vadd.f32 %v2113_v17, %v1521_v23  ;;  %v775_v54 = vmax.f32 %v396_v1, 0.0  ;;  %v949_v36 = vmax.f32 %v837_v33, %v853_v12  ;;  %v791_v10 = vmax.f32 %v420_v29, 0.0  ;;  %v2126_v17 = vld [vmem:[#allocation34_spill] sm:$0xff] }
 0x17e   :  { %v2114_v35 = vmax.f32 %v1807_v53, 0.0  ;;  %v776_v15 = vmax.f32 %v605_v34, 0.0  ;;  %921 = vst [vmem:[%s2060_s3 + $0x20] sm:$0xff] %v913_v44  ;;  %v950_v60 = vmax.f32 %v838_v9, %v854_v28  ;;  %v792_v24 = vmax.f32 %v629_v18, 0.0  ;;  %v2125_v28 = vld [vmem:[#allocation19_spill] sm:$0xff] }
 0x17f   :  { %v584_v38 = vadd.f32 %v2115_v21, %v1525_v25  ;;  %v492_v7 = vadd.f32 %v2116_v5, %v1521_v23  ;;  %v965_v43 = vmax.f32 %v2117_v2, %v949_v36  ;;  %v887_v22 = vmax.f32 %v775_v54, %v791_v10  ;;  %v2127_v54 = vld [vmem:[#allocation16_spill] sm:$0xff] }
 0x180   :  { %v871_v40 = vmax.f32 %v2114_v35, %v759_v45  ;;  %v2118_v30 = vmax.f32 %v1816_v20, 0.0  ;;  %v701_v16 = vadd.f32 %v2119_v59, %v1525_v25  ;;  %v966_v46 = vmax.f32 %v2120_v0, %v950_v60  ;;  %v515_v11 = vpop.f32.mrf.mxu2  ;;  %v2130_v60 = vld [vmem:[#allocation17_spill] sm:$0xff] }
 0x181   :  { %v888_v4 = vmax.f32 %v776_v15, %v792_v24  ;;  %v761_v48 = vmax.f32 %v375_v13, 0.0  ;;  %v399_v47 = vadd.f32 %v2121_v19, %v1521_v23  ;;  %v516_v55 = vadd.f32 %v515_v11, %v1521_v23  ;;  %v724_v6 = vpop.f32.mrf.mxu3 }
 0x182   :  { %v872_v53 = vmax.f32 %v2118_v30, %v760_v26  ;;  %v903_v56 = vmax.f32 %v871_v40, %v887_v22  ;;  %v608_v37 = vadd.f32 %v2122_v32, %v1525_v25  ;;  %v977_v20 = vpack.c.bf16 %v966_v46, %v965_v43  ;;  %v422_v62 = vpop.f32.mrf.mxu0  ;;  %v2129_v40 = vld [vmem:[#allocation35_spill] sm:$0xff] }
 0x183   :  { %v725_v51 = vadd.f32 %v724_v6, %v1525_v25  ;;  %v762_v45 = vmax.f32 %v584_v38, 0.0  ;;  %v839_v58 = vmax.f32 %v492_v7, 0.0  ;;  %v855_v1 = vmax.f32 %v516_v55, 0.0  ;;  %v631_v61 = vpop.f32.mrf.mxu1  ;;  %v2131_v7 = vld [vmem:[#allocation36_spill] sm:$0xff] }
 0x184   :  { %v904_v63 = vmax.f32 %v872_v53, %v888_v4  ;;  %v423_v41 = vadd.f32 %v422_v62, %v1521_v23  ;;  %v840_v14 = vmax.f32 %v701_v16, 0.0  ;;  %985 = vst [vmem:[%s2060_s3 + $0x60] sm:$0xff] %v977_v20  ;;  %v632_v31 = vadd.f32 %v631_v61, %v1525_v25  ;;  %v2132_v53 = vld [vmem:[#allocation37_spill] sm:$0xff]  ;;  %v2133_v61 = vld [vmem:[#allocation39_spill] sm:$0xff] }
 0x185   :  { %v856_v34 = vmax.f32 %v725_v51, 0.0  ;;  %v378_v3 = vadd.f32 %v2123_v42, %v1521_v23  ;;  %v777_v39 = vmax.f32 %v399_v47, 0.0  ;;  %v951_v26 = vmax.f32 %v839_v58, %v855_v1  ;;  %v2135_v42 = vld [vmem:[#allocation40_spill] sm:$0xff] }
 0x186   :  { %v914_v57 = vpack.c.bf16 %v904_v63, %v903_v56  ;;  %v793_v33 = vmax.f32 %v423_v41, 0.0  ;;  %v2124_v12 = vmax.f32 %v1820_v50, 0.0  ;;  %v778_v49 = vmax.f32 %v608_v37, 0.0 }
 0x187   :  { %v952_v9 = vmax.f32 %v840_v14, %v856_v34  ;;  %v794_v44 = vmax.f32 %v632_v31, 0.0  ;;  %v587_v18 = vadd.f32 %v2125_v28, %v1525_v25  ;;  %v495_v13 = vadd.f32 %v2126_v17, %v1521_v23 }
 0x188   :  { %v873_v29 = vmax.f32 %v2124_v12, %v761_v48  ;;  %922 = vst [vmem:[%s2060_s3 + $0x28] sm:$0xff] %v914_v57  ;;  %v967_v36 = vmax.f32 %v2127_v54, %v951_v26  ;;  %v889_v10 = vmax.f32 %v777_v39, %v793_v33  ;;  %v2128_v35 = vmax.f32 %v1829_v8, 0.0  ;;  %v518_v38 = vpop.f32.mrf.mxu2  ;;  %v2134_v57 = vld [vmem:[#allocation20_spill] sm:$0xff]  ;;  %v2136_v39 = vld [vmem:[#allocation21_spill] sm:$0xff] }
 0x189   :  { %v704_v15 = vadd.f32 %v2129_v40, %v1525_v25  ;;  %v968_v24 = vmax.f32 %v2130_v60, %v952_v9  ;;  %v890_v21 = vmax.f32 %v778_v49, %v794_v44  ;;  %v763_v5 = vmax.f32 %v378_v3, 0.0  ;;  %v727_v30 = vpop.f32.mrf.mxu3  ;;  %v2138_v40 = vld [vmem:[#allocation23_spill] sm:$0xff] }
 0x18a   :  { %v874_v50 = vmax.f32 %v2128_v35, %v762_v45  ;;  %v402_v2 = vadd.f32 %v2131_v7, %v1521_v23  ;;  %v905_v43 = vmax.f32 %v873_v29, %v889_v10  ;;  %v519_v22 = vadd.f32 %v518_v38, %v1521_v23  ;;  %v425_v46 = vpop.f32.mrf.mxu0  ;;  %v2137_v35 = vld [vmem:[#allocation22_spill] sm:$0xff] }
 0x18b   :  { %v611_v59 = vadd.f32 %v2132_v53, %v1525_v25  ;;  %v978_v8 = vpack.c.bf16 %v968_v24, %v967_v36  ;;  %v728_v0 = vadd.f32 %v727_v30, %v1525_v25  ;;  %v764_v4 = vmax.f32 %v587_v18, 0.0  ;;  %v634_v47 = vpop.f32.mrf.mxu1 }
 0x18c   :  { %v906_v16 = vmax.f32 %v874_v50, %v890_v21  ;;  %v841_v11 = vmax.f32 %v495_v13, 0.0  ;;  %v857_v48 = vmax.f32 %v519_v22, 0.0  ;;  %v426_v19 = vadd.f32 %v425_v46, %v1521_v23 }
 0x18d   :  { %v842_v56 = vmax.f32 %v704_v15, 0.0  ;;  %986 = vst [vmem:[%s2060_s3 + $0x68] sm:$0xff] %v978_v8  ;;  %v858_v6 = vmax.f32 %v728_v0, 0.0  ;;  %v635_v32 = vadd.f32 %v634_v47, %v1525_v25  ;;  %v747_v37 = vmax.f32 %v1849_v27, 0.0 }
 0x18e   :  { %v915_v55 = vpack.c.bf16 %v906_v16, %v905_v43  ;;  %v779_v20 = vmax.f32 %v402_v2, 0.0  ;;  %v953_v63 = vmax.f32 %v841_v11, %v857_v48  ;;  %v795_v51 = vmax.f32 %v426_v19, 0.0 }
 0x18f   :  { %v748_v62 = vmax.f32 %v1855_v52, 0.0  ;;  %v780_v45 = vmax.f32 %v611_v59, 0.0  ;;  %v954_v58 = vmax.f32 %v842_v56, %v858_v6  ;;  %v796_v1 = vmax.f32 %v635_v32, 0.0 }
 0x190   :  { %923 = vst [vmem:[%s2060_s3 + $0x30] sm:$0xff] %v915_v55  ;;  %v875_v41 = vmax.f32 %v747_v37, %v763_v5  ;;  %v498_v14 = vadd.f32 %v2133_v61, %v1521_v23  ;;  %v969_v34 = vmax.f32 %v2134_v57, %v953_v63  ;;  %v891_v31 = vmax.f32 %v779_v20, %v795_v51  ;;  %v521_v33 = vpop.f32.mrf.mxu2 }
 0x191   :  { %v876_v27 = vmax.f32 %v748_v62, %v764_v4  ;;  %v707_v3 = vadd.f32 %v2135_v42, %v1525_v25  ;;  %v970_v52 = vmax.f32 %v2136_v39, %v954_v58  ;;  %v892_v26 = vmax.f32 %v780_v45, %v796_v1  ;;  %v730_v49 = vpop.f32.mrf.mxu3 }
 0x192   :  { %v907_v12 = vmax.f32 %v875_v41, %v891_v31  ;;  %v522_v29 = vadd.f32 %v521_v33, %v1521_v23  ;;  %v731_v28 = vadd.f32 %v730_v49, %v1525_v25  ;;  %v843_v18 = vmax.f32 %v498_v14, 0.0 }
 0x193   :  { %v979_v9 = vpack.c.bf16 %v970_v52, %v969_v34  ;;  %v908_v44 = vmax.f32 %v876_v27, %v892_v26  ;;  %v844_v13 = vmax.f32 %v707_v3, 0.0 }
 0x194   :  { %v859_v17 = vmax.f32 %v522_v29, 0.0  ;;  %v860_v36 = vmax.f32 %v731_v28, 0.0 }
 0x195   :  { %987 = vst [vmem:[%s2060_s3 + $0x70] sm:$0xff] %v979_v9  ;;  %v916_v54 = vpack.c.bf16 %v908_v44, %v907_v12 }
 0x196   :  { %v955_v10 = vmax.f32 %v843_v18, %v859_v17  ;;  %v956_v23 = vmax.f32 %v844_v13, %v860_v36 }
 0x197   :  { %924 = vst [vmem:[%s2060_s3 + $0x38] sm:$0xff] %v916_v54 }
 0x198   :  { %v971_v50 = vmax.f32 %v2137_v35, %v955_v10  ;;  %v972_v15 = vmax.f32 %v2138_v40, %v956_v23 }
 0x19a   :  { %v980_v25 = vpack.c.bf16 %v972_v15, %v971_v50 }
 0x19c   :  { %988 = vst [vmem:[%s2060_s3 + $0x78] sm:$0xff] %v980_v25 }
 0x19d   :  { %993 = vsyncpa [#allocation3], 1 }
 0x19e   :  { %994 = vsyncpa [#allocation5], 1 }

// kernel: cnn_forward.3
= control target key start
LH: loop header
LB: loop body
LE: loop exit
PB: predicated region body
PF: predicated region fallthrough
CT: control target
= control target key end

     0   :  { %s9279_s0 = inlined_call_operand.vmem [shape: bf16[2,16384], index: 0, kind: input, shape index: {}]   ;;  %s9280_s1 = inlined_call_operand.hbm [shape: bf16[16384,256], index: 1, kind: input, shape index: {}]   ;;  %s9281_s2 = inlined_call_operand.hbm [shape: f32[1,256], index: 2, kind: input, shape index: {}]   ;;  %s9282_s3 = inlined_call_operand.hbm [shape: f32[256,128], index: 3, kind: input, shape index: {}]   ;;  %s9283_s4 = inlined_call_operand.vmem [shape: f32[2,2,128], index: 4, kind: output, shape index: {}]  }
   0x1   :  { %9291 = sst [smem:[#allocation18_spill]] %s9279_s0 }
   0x2   :  { %9292 = sst [smem:[#allocation19_spill]] %s9281_s2 }
   0x3   :  { %9293 = sst [smem:[#allocation20_spill]] %s9283_s4 }
   0x4   :  { %9 = vsyncpa [#allocation4], 0 }
   0x5   :  { %11 = vsyncpa [#allocation4 + $0x1], 0 }
   0x6   :  { %12 = vsyncpa [#allocation6], 0 }
   0x7   :  { %14 = vsyncpa [#allocation6 + $0x1], 0  ;;  %s8499_s15 = smov 0   ;;  %s8501_s16 = smov 0  }
   0x8   :  { %s8503_s17 = smov 0   ;;  %s8505_s18 = smov 0  }
   0x9   :  { %s8507_s19 = smov 0   ;;  %s8509_s20 = smov 0  }
   0xa   :  { %s8511_s21 = smov 0   ;;  %s8513_s22 = smov 0  }
   0xb   :  { %s8515_s23 = smov 0   ;;  %s8517_s24 = smov 0  }
   0xc   :  { %s8519_s25 = smov 0  }
   0xd LB: > { %9294 = sst [smem:[#allocation10_spill]] %s8435_s17  ;;  %s9284_s26 = sadd.s32 4294967295, %s8467_s25   ;;  %s8467_s25 = sphi %s8519_s25, %s20_s25   ;;  %s8463_s24 = sphi %s8517_s24, %s9328_s24   ;;  %s8459_s23 = sphi %s8515_s23, %s9320_s23   ;;  %s8455_s22 = sphi %s8513_s22, %s9327_s22   ;;  %s8451_s21 = sphi %s8511_s21, %s9326_s21   ;;  %s8447_s20 = sphi %s8509_s20, %s9318_s20   ;;  %s8443_s19 = sphi %s8507_s19, %s9325_s19   ;;  %s8439_s18 = sphi %s8505_s18, %s9324_s18   ;;  %s8435_s17 = sphi %s8503_s17, %s9316_s17   ;;  %s8431_s16 = sphi %s8501_s16, %s9323_s16   ;;  %s8427_s15 = sphi %s8499_s15, %s9322_s15  }
   0xe   : > { %9295 = sst [smem:[#allocation11_spill]] %s8447_s20  ;;  %s29_s27 = sadd.s32 1, %s8459_s23 }
   0xf   : > { %9296 = sst [smem:[#allocation12_spill]] %s8455_s22  ;;  %p30_p0 = scmp.ge.s32.totalorder %s29_s27, 2 }
  0x10   : > { %9297 = sst [smem:[#allocation13_spill]] %s8459_s23  ;;  %s32_s28 = sadd.s32 1, %s8463_s24 }
  0x11   : > { %s67_s29 = sadd.s32 1, %s8447_s20  ;;  %p74_p1 = scmp.ne.s32.totalorder %s8447_s20, %s8443_s19 }
  0x12   : > { %s9330_s27 = smov (%p30_p0, %s29_s27), 0  ;;  %s9332_s28 = smov (!%p30_p0, %s32_s28), %s8463_s24 }
  0x13   : > { %9298 = sst [smem:[#allocation14_spill]] %s9330_s27  ;;  %s62_s30 = ssub.s32 %s8459_s23, %s9330_s27 }
  0x14   : > { %p75_p2 = scmp.eq.s32.totalorder %s8467_s25, 0  ;;  %p34_p3 = scmp.ge.s32.totalorder %s9332_s28, 2 }
  0x15   : > { %p80_p4 = scmp.ne.s32.totalorder %s8443_s19, %s8439_s18  ;;  %p8573_p6 = scmp.eq.s32.totalorder %s9284_s26, 0 }
  0x16   : > { %p8567_p5 = por %p75_p2, %p74_p1  ;;  %s9334_s28 = smov (%p34_p3, %s9332_s28), 0 }
  0x17   : > { %9301 = sst [smem:[#allocation15_spill]] %s9334_s28  ;;  %p8581_p7 = por %p8573_p6, %p80_p4 }
  0x18   : > { %s93_s8 = sadd.s32 1, %s8435_s17  ;;  %s63_s9 = ssub.s32 %s8463_s24, %s9334_s28 }
  0x19   : > { %p100_p8 = scmp.ne.s32.totalorder %s8435_s17, %s8431_s16  ;;  %s64_s10 = sor.u32 %s63_s9, %s62_s30 }
  0x1a   : > { %p91_p9 = scmp.eq.s32.totalorder %s63_s9, 0  ;;  %p65_p10 = scmp.eq.s32.totalorder %s64_s10, 0 }
  0x1b   : > { %p8592_p11 = por %p100_p8, %p75_p2  ;;  %p106_p12 = scmp.ne.s32.totalorder %s8431_s16, %s8427_s15 }
  0x1c   : > { %s8597_s12 = scalar_select %p91_p9, %s8435_s17, %s93_s8  }
  0x1d   : > { %s8600_s13 = scalar_select %p65_p10, %s8447_s20, %s67_s29  }
  0x1e   : > { %9304 = sst [smem:[#allocation16_spill]] %s8597_s12  ;;  %p8188_p13 = scmp.lt.s32.totalorder %s8467_s25, 4 }
  0x1f   : > { %9305 = sst [smem:[#allocation17_spill]] %s8600_s13  ;;  %s214_s14 = sand.u32 1, %s8467_s25  }
  0x20   : > { %p8608_p0 = por %p106_p12, %p8573_p6  ;;  %p8614_p1 = pnand %p8188_p13, %p8567_p5 }
  0x21   : > { %s216_s9 = sand.u32 1, %s8435_s17   ;;  %s9308_s2 = sld [smem:[#allocation19_spill]] }
  0x22   : > { %s217_s6 = scalar_lea.vmem [#allocation5], %s216_s9  ;;  %p8625_p2 = pnand %p8188_p13, %p8592_p11 }
  0x23   : > { %s224_s26 = sshll.u32 %s217_s6, 4  ;;  %s5598_s28 = sshll.u32 %s216_s9, 7  ;;  %s225_s26 = int_to_ptr.vmem [resolvable:$true] %s224_s26 }
  0x24   : > { %p5601_p3 = scmp.ge.s32.totalorder %s8467_s25, 1  ;;  %s8630_s27 = scalar_lea.sflag [#allocation6], %s214_s14 }
  0x25   : > { %s235_s8 = scalar_lea.vmem [#allocation7], %s5598_s28  ;;  %p251_p4 = scmp.lt.s32.totalorder %s8467_s25, 5 }
  0x26   : > { %s8635_s10 = sshll.u32 %s235_s8, 4  ;;  %s7658_s9 = sshll.u32 %s8459_s23, 11  ;;  %s244_s10 = int_to_ptr.vmem [resolvable:$true] %s8635_s10 }
  0x27   : > { %s220_s29 = scalar_lea.hbm %s9308_s2, %s8463_s24  ;;  %p8639_p5 = pnand %p5601_p3, %p251_p4 }
  0x28   : > { %s222_s15 = sshll.u32 %s220_s29, 4  ;;  %s190_s29 = sand.u32 1, %s8447_s20   ;;  %s223_s15 = int_to_ptr.hbm [resolvable:$true] %s222_s15 }
  0x29   : > { %8184 = dma.hbm_to_vmem [thread:$0]  (!%p8625_p2), %s223_s15, 16, %s225_s26, %s8630_s27  }
  0x2a   : > { %s5594_s6 = sshll.u32 %s190_s29, 12  ;;  %s199_s14 = sadd.s32 %s8463_s24, %s7658_s9 }
  0x2b   : > { %s5597_s2 = sshll.u32 %s199_s14, 2  ;;  %s194_s13 = scalar_lea.vmem [#allocation3], %s5594_s6 }
  0x2c   : > { %s204_s26 = sshll.u32 %s194_s13, 4  ;;  %s201_s8 = scalar_lea.hbm %s9280_s1, %s5597_s2  ;;  %s205_s26 = int_to_ptr.vmem [resolvable:$true] %s204_s26 }
  0x2d   : > { %s202_s12 = sshll.u32 %s201_s8, 4  ;;  %s7659_s17 = sshll.u32 %s8463_s24, 7  ;;  %s203_s12 = int_to_ptr.hbm [resolvable:$true] %s202_s12 }
  0x2e   : > { %s191_s4 = scalar_lea.sflag [#allocation4], %s190_s29  ;;  %s8469_s0 = smov 128  }
  0x2f   : > { %s8470_s20 = smov 64   ;;  %s8471_s22 = smov 4  }
  0x30   : > { %8181 = dma.hbm_to_vmem [thread:$0]  (!%p8614_p1), %s203_s12, 65536, %s205_s26, %s191_s4, %s8469_s0, %s8470_s20, %s8471_s22  }
  0x31   : > { %s240_s6 = scalar_lea.hbm %s9282_s3, %s7659_s17  ;;  %s8472_s13 = smov 8  }
  0x32   : > { %s241_s23 = sshll.u32 %s240_s6, 4  ;;  %255 = sbr.rel (%p8639_p5) target bundleno = 887 (0x377), region = 36  ;;  %s242_s23 = int_to_ptr.hbm [resolvable:$true] %s241_s23 }
  0x33   : > { %8187 = dma.hbm_to_vmem [thread:$0]  (!%p8625_p2), %s242_s23, 2048, %s244_s10, %s8630_s27, %s8469_s0, %s8469_s0, %s8472_s13  }
  0x34   : > { %s257_s2 = sand.u32 (!%p8639_p5), 1, %s8443_s19  }
  0x35   : > { %s5602_s29 = sshll.u32 (!%p8639_p5), %s257_s2, 12  ;;  %s258_s28 = scalar_lea.sflag (!%p8639_p5), [#allocation4], %s257_s2 }
  0x36   : > { %s8661_s15 = scalar_lea.vmem (!%p8639_p5), [#allocation3], %s5602_s29 }
  0x37   : > { %8418 = dma.done.wait (%p8581_p7), %s258_s28, 65536  }
  0x38   : > { %8420 = vsyncadd (%p8581_p7), %s258_s28, 4294901760  ;;  %s9311_s4 = sadd.s32 4294967295, %s8467_s25   ;;  %s269_s17 = sand.u32 1, %s8431_s16  }
  0x39   : > { %s267_s0 = sand.u32 1, %s9311_s4   ;;  %s8670_s22 = scalar_lea.vmem [#allocation5], %s269_s17 }
  0x3a   : > { %s268_s20 = scalar_lea.sflag [#allocation6], %s267_s0 }
  0x3b   : > { %8422 = dma.done.wait (%p8608_p0), %s268_s20, 2064  }
  0x3c   : > { %8424 = vsyncadd (%p8608_p0), %s268_s20, 4294965232  ;;  %s9312_s23 = sld [smem:[#allocation12_spill]]  ;;  %s5603_s27 = sshll.u32 %s269_s17, 7 }
  0x3d   : > { %s5604_s7 = sshll.u32 %s8451_s21, 6  ;;  %s9313_s5 = sld [smem:[#allocation18_spill]] }
  0x3e   : > { %p319_p6 = scmp.lt.s32.totalorder %s5604_s7, 127  ;;  %s9314_s9 = sld [smem:[#allocation20_spill]] }
  0x3f   : > { %s8689_s14 = scalar_lea.vmem [#allocation7], %s5603_s27  ;;  %p5606_p8 = scmp.ne.s32.totalorder %s8451_s21, 0 }
  0x40   : > { %s9336_s7 = smov (!%p319_p6, %s5604_s7), 127 }
  0x42   : > { %p325_p7 = scmp.lt.s32.totalorder %s9312_s23, 1  ;;  %332 = sbr.rel (%p5606_p8) target bundleno = 73 (0x49), region = 52 }
  0x43   : > { %s8682_s10 = scalar_lea.vmem %s9313_s5, %s9336_s7 }
  0x44   : > { %s9338_s23 = smov (!%p325_p7, %s9312_s23), 1 }
  0x45   : > { %s5605_s11 = sshll.u32 %s9338_s23, 1 }
  0x46   : > { %s8687_s18 = scalar_lea.vmem %s9314_s9, %s5605_s11 }
  0x47   : > { %v8473_v0 = vmov 0.0  }
  0x48   : > { %333 = vst [vmem:[#allocation2] sm:$0x3] %v8473_v0 }
  0x49 PF: > { %v7667_v1 = vld [vmem:[%s8661_s15 + $0x38] sm:$0xff]  ;;  %v7666_v5 = vld [vmem:[%s8661_s15 + $0x30] sm:$0xff]  ;;  %v7665_v9 = vld [vmem:[%s8661_s15 + $0x28] sm:$0xff]  ;;  %p7655_p9 = scmp.ne.s32.totalorder %s8451_s21, 1 }
  0x4a   : > { %v7675_v2 = vld [vmem:[%s8661_s15 + $0x78] sm:$0xff]  ;;  %4583 = vmatpush.bf16.msra.mxu0 %v7667_v1  ;;  %v7674_v6 = vld [vmem:[%s8661_s15 + $0x70] sm:$0xff]  ;;  %v7673_v10 = vld [vmem:[%s8661_s15 + $0x68] sm:$0xff] }
  0x4b   : > { %v7683_v3 = vld [vmem:[%s8661_s15 + $0xb8] sm:$0xff]  ;;  %4596 = vmatpush.bf16.msra.mxu1 %v7675_v2  ;;  %v7682_v7 = vld [vmem:[%s8661_s15 + $0xb0] sm:$0xff]  ;;  %v7681_v11 = vld [vmem:[%s8661_s15 + $0xa8] sm:$0xff] }
  0x4c   : > { %v7691_v4 = vld [vmem:[%s8661_s15 + $0xf8] sm:$0xff]  ;;  %4609 = vmatpush.bf16.msra.mxu2 %v7683_v3  ;;  %v7690_v8 = vld [vmem:[%s8661_s15 + $0xf0] sm:$0xff]  ;;  %v7689_v12 = vld [vmem:[%s8661_s15 + $0xe8] sm:$0xff] }
  0x4d   : > { %4622 = vmatpush.bf16.msra.mxu3 %v7691_v4  ;;  %v7664_v13 = vld [vmem:[%s8661_s15 + $0x20] sm:$0xff]  ;;  %v7663_v17 = vld [vmem:[%s8661_s15 + $0x18] sm:$0xff]  ;;  %v7662_v22 = vld [vmem:[%s8661_s15 + $0x10] sm:$0xff] }
  0x4e   : > { %4584 = vmatpush.bf16.msra.mxu0 %v7666_v5  ;;  %v7672_v14 = vld [vmem:[%s8661_s15 + $0x60] sm:$0xff]  ;;  %v7671_v18 = vld [vmem:[%s8661_s15 + $0x58] sm:$0xff]  ;;  %v7670_v23 = vld [vmem:[%s8661_s15 + $0x50] sm:$0xff] }
  0x4f   : > { %4597 = vmatpush.bf16.msra.mxu1 %v7674_v6  ;;  %v7680_v15 = vld [vmem:[%s8661_s15 + $0xa0] sm:$0xff]  ;;  %v7679_v19 = vld [vmem:[%s8661_s15 + $0x98] sm:$0xff]  ;;  %v7678_v24 = vld [vmem:[%s8661_s15 + $0x90] sm:$0xff] }
  0x50   : > { %4610 = vmatpush.bf16.msra.mxu2 %v7682_v7  ;;  %v7688_v16 = vld [vmem:[%s8661_s15 + $0xe0] sm:$0xff]  ;;  %v7687_v20 = vld [vmem:[%s8661_s15 + $0xd8] sm:$0xff]  ;;  %v7686_v25 = vld [vmem:[%s8661_s15 + $0xd0] sm:$0xff] }
  0x51   : > { %4623 = vmatpush.bf16.msra.mxu3 %v7690_v8  ;;  %v335_v21 = vld [vmem:[%s8682_s10] sm:$0xff]  ;;  %v7661_v26 = vld [vmem:[%s8661_s15 + $0x8] sm:$0xff]  ;;  %v7660_v30 = vld [vmem:[%s8661_s15] sm:$0xff] }
  0x52   : > { %4585 = vmatpush.bf16.msra.mxu0 %v7665_v9  ;;  %1368 = vst [vmem:[#allocation1] ss:$9 sm:$0xff] %v335_v21  ;;  %v7669_v27 = vld [vmem:[%s8661_s15 + $0x48] sm:$0xff]  ;;  %v7668_v31 = vld [vmem:[%s8661_s15 + $0x40] sm:$0xff]  ;;  %v7699_v34 = vld [vmem:[%s8661_s15 + $0x138] sm:$0xff] }
  0x53   : > { %4598 = vmatpush.bf16.msra.mxu1 %v7673_v10  ;;  %v7677_v28 = vld [vmem:[%s8661_s15 + $0x88] sm:$0xff]  ;;  %v7676_v32 = vld [vmem:[%s8661_s15 + $0x80] sm:$0xff]  ;;  %v7707_v35 = vld [vmem:[%s8661_s15 + $0x178] sm:$0xff] }
  0x54   : > { %4611 = vmatpush.bf16.msra.mxu2 %v7681_v11  ;;  %v7685_v29 = vld [vmem:[%s8661_s15 + $0xc8] sm:$0xff]  ;;  %v7684_v33 = vld [vmem:[%s8661_s15 + $0xc0] sm:$0xff]  ;;  %v7715_v36 = vld [vmem:[%s8661_s15 + $0x1b8] sm:$0xff] }
  0x55   : > { %4624 = vmatpush.bf16.msra.mxu3 %v7689_v12  ;;  %v7723_v37 = vld [vmem:[%s8661_s15 + $0x1f8] sm:$0xff]  ;;  %v7698_v38 = vld [vmem:[%s8661_s15 + $0x130] sm:$0xff]  ;;  %v7697_v46 = vld [vmem:[%s8661_s15 + $0x128] sm:$0xff] }
  0x56   : > { %4586 = vmatpush.bf16.msra.mxu0 %v7664_v13  ;;  %v7706_v41 = vld [vmem:[%s8661_s15 + $0x170] sm:$0xff]  ;;  %v7705_v47 = vld [vmem:[%s8661_s15 + $0x168] sm:$0xff]  ;;  %v336_v53 = vld [vmem:[%s8682_s10 + $0x8] sm:$0xff] }
  0x57   : > { %4599 = vmatpush.bf16.msra.mxu1 %v7672_v14  ;;  %v7714_v44 = vld [vmem:[%s8661_s15 + $0x1b0] sm:$0xff]  ;;  %v7713_v48 = vld [vmem:[%s8661_s15 + $0x1a8] sm:$0xff]  ;;  %v7696_v55 = vld [vmem:[%s8661_s15 + $0x120] sm:$0xff] }
  0x58   : > { %4612 = vmatpush.bf16.msra.mxu2 %v7680_v15  ;;  %v7722_v45 = vld [vmem:[%s8661_s15 + $0x1f0] sm:$0xff]  ;;  %v7721_v49 = vld [vmem:[%s8661_s15 + $0x1e8] sm:$0xff]  ;;  %v7704_v56 = vld [vmem:[%s8661_s15 + $0x160] sm:$0xff] }
  0x59   : > { %4625 = vmatpush.bf16.msra.mxu3 %v7688_v16  ;;  %v1371_v39 = vld [vmem:[#allocation1 + $0x12] sm:$0xff]  ;;  %v1369_v40 = vld [vmem:[#allocation1] sm:$0xff]  ;;  %v1370_v43 = vld [vmem:[#allocation1 + $0x9] sm:$0xff] }
  0x5a   : > { %4587 = vmatpush.bf16.msra.mxu0 %v7663_v17  ;;  %v1372_v42 = vld [vmem:[#allocation1 + $0x1b] sm:$0xff]  ;;  %v1373_v51 = vld [vmem:[#allocation1 + $0x24] sm:$0xff]  ;;  %v1374_v54 = vld [vmem:[#allocation1 + $0x2d] sm:$0xff] }
  0x5b   : > { %4600 = vmatpush.bf16.msra.mxu1 %v7671_v18  ;;  %v1375_v50 = vld [vmem:[#allocation1 + $0x36] sm:$0xff]  ;;  %v1376_v52 = vld [vmem:[#allocation1 + $0x3f] sm:$0xff]  ;;  %v7712_v57 = vld [vmem:[%s8661_s15 + $0x1a0] sm:$0xff] }
  0x5c   : > { %4613 = vmatpush.bf16.msra.mxu2 %v7679_v19  ;;  %1378 = vst [vmem:[#allocation1] ss:$9 sm:$0xff] %v336_v53  ;;  %v7720_v58 = vld [vmem:[%s8661_s15 + $0x1e0] sm:$0xff]  ;;  %v7695_v59 = vld [vmem:[%s8661_s15 + $0x118] sm:$0xff]  ;;  %v7694_v63 = vld [vmem:[%s8661_s15 + $0x110] sm:$0xff] }
  0x5d   : > { %4626 = vmatpush.bf16.msra.mxu3 %v7687_v20  ;;  %v7703_v60 = vld [vmem:[%s8661_s15 + $0x158] sm:$0xff]  ;;  %v7702_v0 = vld [vmem:[%s8661_s15 + $0x150] sm:$0xff]  ;;  %v7693_v3 = vld [vmem:[%s8661_s15 + $0x108] sm:$0xff] }
  0x5e   : > { %4588 = vmatpush.bf16.msra.mxu0 %v7662_v22  ;;  %v7711_v61 = vld [vmem:[%s8661_s15 + $0x198] sm:$0xff]  ;;  %v7710_v1 = vld [vmem:[%s8661_s15 + $0x190] sm:$0xff]  ;;  %v7701_v4 = vld [vmem:[%s8661_s15 + $0x148] sm:$0xff] }
  0x5f   : > { %4601 = vmatpush.bf16.msra.mxu1 %v7670_v23  ;;  %v7719_v62 = vld [vmem:[%s8661_s15 + $0x1d8] sm:$0xff]  ;;  %v7718_v2 = vld [vmem:[%s8661_s15 + $0x1d0] sm:$0xff]  ;;  %v7709_v5 = vld [vmem:[%s8661_s15 + $0x188] sm:$0xff] }
  0x60   : > { %4614 = vmatpush.bf16.msra.mxu2 %v7678_v24  ;;  %v7717_v6 = vld [vmem:[%s8661_s15 + $0x1c8] sm:$0xff]  ;;  %v7692_v7 = vld [vmem:[%s8661_s15 + $0x100] sm:$0xff]  ;;  %v7731_v11 = vld [vmem:[%s8661_s15 + $0x238] sm:$0xff] }
  0x61   : > { %4627 = vmatpush.bf16.msra.mxu3 %v7686_v25  ;;  %v7700_v8 = vld [vmem:[%s8661_s15 + $0x140] sm:$0xff]  ;;  %v7739_v12 = vld [vmem:[%s8661_s15 + $0x278] sm:$0xff]  ;;  %v7730_v15 = vld [vmem:[%s8661_s15 + $0x230] sm:$0xff] }
  0x62   : > { %4589 = vmatpush.bf16.msra.mxu0 %v7661_v26  ;;  %v7708_v9 = vld [vmem:[%s8661_s15 + $0x180] sm:$0xff]  ;;  %v7747_v13 = vld [vmem:[%s8661_s15 + $0x2b8] sm:$0xff]  ;;  %v7738_v16 = vld [vmem:[%s8661_s15 + $0x270] sm:$0xff] }
  0x63   : > { %4602 = vmatpush.bf16.msra.mxu1 %v7669_v27  ;;  %v7716_v10 = vld [vmem:[%s8661_s15 + $0x1c0] sm:$0xff]  ;;  %v7755_v14 = vld [vmem:[%s8661_s15 + $0x2f8] sm:$0xff]  ;;  %v7746_v17 = vld [vmem:[%s8661_s15 + $0x2b0] sm:$0xff] }
  0x64   : > { %4615 = vmatpush.bf16.msra.mxu2 %v7677_v28  ;;  %v7754_v18 = vld [vmem:[%s8661_s15 + $0x2f0] sm:$0xff]  ;;  %v7729_v19 = vld [vmem:[%s8661_s15 + $0x228] sm:$0xff]  ;;  %v7728_v23 = vld [vmem:[%s8661_s15 + $0x220] sm:$0xff] }
  0x65   : > { %4628 = vmatpush.bf16.msra.mxu3 %v7685_v29  ;;  %v7737_v20 = vld [vmem:[%s8661_s15 + $0x268] sm:$0xff]  ;;  %v7736_v24 = vld [vmem:[%s8661_s15 + $0x260] sm:$0xff]  ;;  %v7727_v27 = vld [vmem:[%s8661_s15 + $0x218] sm:$0xff] }
  0x66   : > { %4590 = vmatpush.bf16.msra.mxu0 %v7660_v30  ;;  %v7745_v21 = vld [vmem:[%s8661_s15 + $0x2a8] sm:$0xff]  ;;  %v7744_v25 = vld [vmem:[%s8661_s15 + $0x2a0] sm:$0xff]  ;;  %v7735_v28 = vld [vmem:[%s8661_s15 + $0x258] sm:$0xff] }
  0x67   : > { %4603 = vmatpush.bf16.msra.mxu1 %v7668_v31  ;;  %v7753_v22 = vld [vmem:[%s8661_s15 + $0x2e8] sm:$0xff]  ;;  %v7752_v26 = vld [vmem:[%s8661_s15 + $0x2e0] sm:$0xff]  ;;  %v7743_v29 = vld [vmem:[%s8661_s15 + $0x298] sm:$0xff] }
  0x68   : > { %4616 = vmatpush.bf16.msra.mxu2 %v7676_v32  ;;  %v7751_v30 = vld [vmem:[%s8661_s15 + $0x2d8] sm:$0xff]  ;;  %v7726_v31 = vld [vmem:[%s8661_s15 + $0x210] sm:$0xff] }
  0x69   : > { %4629 = vmatpush.bf16.msra.mxu3 %v7684_v33  ;;  %4591 = vmatmul.bf16.vlgmr.msra.gmra.mxu0 %v1369_v40  ;;  %v7734_v32 = vld [vmem:[%s8661_s15 + $0x250] sm:$0xff]  ;;  %v7732_v40 = vld [vmem:[%s8661_s15 + $0x240] sm:$0xff] }
  0x6a   : > { %4635 = vmatpush.bf16.msrb.mxu0 %v7699_v34  ;;  %4604 = vmatmul.bf16.vlgmr.msra.gmra.mxu1 %v1370_v43  ;;  %v7742_v33 = vld [vmem:[%s8661_s15 + $0x290] sm:$0xff]  ;;  %v7763_v43 = vld [vmem:[%s8661_s15 + $0x338] sm:$0xff] }
  0x6b   : > { %4648 = vmatpush.bf16.msrb.mxu1 %v7707_v35  ;;  %4617 = vmatmul.bf16.vlgmr.msra.gmra.mxu2 %v1371_v39  ;;  %v7750_v34 = vld [vmem:[%s8661_s15 + $0x2d0] sm:$0xff]  ;;  %v7725_v35 = vld [vmem:[%s8661_s15 + $0x208] sm:$0xff]  ;;  %v7724_v39 = vld [vmem:[%s8661_s15 + $0x200] sm:$0xff] }
  0x6c   : > { %4661 = vmatpush.bf16.msrb.mxu2 %v7715_v36  ;;  %4630 = vmatmul.bf16.vlgmr.msra.gmra.mxu3 %v1372_v42  ;;  %v7733_v36 = vld [vmem:[%s8661_s15 + $0x248] sm:$0xff]  ;;  %v7748_v42 = vld [vmem:[%s8661_s15 + $0x2c0] sm:$0xff]  ;;  %v7778_v53 = vld [vmem:[%s8661_s15 + $0x3b0] sm:$0xff] }
  0x6d   : > { %4674 = vmatpush.bf16.msrb.mxu3 %v7723_v37  ;;  %v7741_v37 = vld [vmem:[%s8661_s15 + $0x288] sm:$0xff] }
  0x6e   : > { %4636 = vmatpush.bf16.msrb.mxu0 %v7698_v38  ;;  %v7749_v38 = vld [vmem:[%s8661_s15 + $0x2c8] sm:$0xff] }
  0x6f   : > { %4649 = vmatpush.bf16.msrb.mxu1 %v7706_v41  ;;  %v7740_v41 = vld [vmem:[%s8661_s15 + $0x280] sm:$0xff] }
  0x70   : > { %4662 = vmatpush.bf16.msrb.mxu2 %v7714_v44  ;;  %v7771_v44 = vld [vmem:[%s8661_s15 + $0x378] sm:$0xff] }
  0x71   : > { %4675 = vmatpush.bf16.msrb.mxu3 %v7722_v45  ;;  %v7779_v45 = vld [vmem:[%s8661_s15 + $0x3b8] sm:$0xff] }
  0x72   : > { %4637 = vmatpush.bf16.msrb.mxu0 %v7697_v46  ;;  %v7787_v46 = vld [vmem:[%s8661_s15 + $0x3f8] sm:$0xff] }
  0x73   : > { %4650 = vmatpush.bf16.msrb.mxu1 %v7705_v47  ;;  %v1379_v47 = vld [vmem:[#allocation1] sm:$0xff] }
  0x74   : > { %4663 = vmatpush.bf16.msrb.mxu2 %v7713_v48  ;;  %v1381_v48 = vld [vmem:[#allocation1 + $0x12] sm:$0xff] }
  0x75   : > { %4676 = vmatpush.bf16.msrb.mxu3 %v7721_v49  ;;  %v1380_v49 = vld [vmem:[#allocation1 + $0x9] sm:$0xff] }
  0x76   : > { %4638 = vmatpush.bf16.msrb.mxu0 %v7696_v55  ;;  %v7761_v55 = vld [vmem:[%s8661_s15 + $0x328] sm:$0xff] }
  0x77   : > { %4651 = vmatpush.bf16.msrb.mxu1 %v7704_v56  ;;  %v7769_v56 = vld [vmem:[%s8661_s15 + $0x368] sm:$0xff] }
  0x78   : > { %4664 = vmatpush.bf16.msrb.mxu2 %v7712_v57  ;;  %v7777_v57 = vld [vmem:[%s8661_s15 + $0x3a8] sm:$0xff] }
  0x79   : > { %4677 = vmatpush.bf16.msrb.mxu3 %v7720_v58  ;;  %v7785_v58 = vld [vmem:[%s8661_s15 + $0x3e8] sm:$0xff] }
  0x7a   : > { %4639 = vmatpush.bf16.msrb.mxu0 %v7695_v59  ;;  %v7760_v59 = vld [vmem:[%s8661_s15 + $0x320] sm:$0xff] }
  0x7b   : > { %4652 = vmatpush.bf16.msrb.mxu1 %v7703_v60  ;;  %v7768_v60 = vld [vmem:[%s8661_s15 + $0x360] sm:$0xff] }
  0x7c   : > { %4665 = vmatpush.bf16.msrb.mxu2 %v7711_v61  ;;  %v7776_v61 = vld [vmem:[%s8661_s15 + $0x3a0] sm:$0xff] }
  0x7d   : > { %4678 = vmatpush.bf16.msrb.mxu3 %v7719_v62  ;;  %v7784_v62 = vld [vmem:[%s8661_s15 + $0x3e0] sm:$0xff] }
  0x7e   : > { %4640 = vmatpush.bf16.msrb.mxu0 %v7694_v63  ;;  %v7759_v63 = vld [vmem:[%s8661_s15 + $0x318] sm:$0xff] }
  0x7f   : > { %4653 = vmatpush.bf16.msrb.mxu1 %v7702_v0  ;;  %v7767_v0 = vld [vmem:[%s8661_s15 + $0x358] sm:$0xff] }
  0x80   : > { %4666 = vmatpush.bf16.msrb.mxu2 %v7710_v1  ;;  %v7775_v1 = vld [vmem:[%s8661_s15 + $0x398] sm:$0xff] }
  0x81   : > { %4679 = vmatpush.bf16.msrb.mxu3 %v7718_v2  ;;  %v7783_v2 = vld [vmem:[%s8661_s15 + $0x3d8] sm:$0xff] }
  0x82   : > { %4641 = vmatpush.bf16.msrb.mxu0 %v7693_v3  ;;  %v7758_v3 = vld [vmem:[%s8661_s15 + $0x310] sm:$0xff] }
  0x83   : > { %4654 = vmatpush.bf16.msrb.mxu1 %v7701_v4  ;;  %v7766_v4 = vld [vmem:[%s8661_s15 + $0x350] sm:$0xff] }
  0x84   : > { %4667 = vmatpush.bf16.msrb.mxu2 %v7709_v5  ;;  %v7774_v5 = vld [vmem:[%s8661_s15 + $0x390] sm:$0xff] }
  0x85   : > { %4680 = vmatpush.bf16.msrb.mxu3 %v7717_v6  ;;  %v7782_v6 = vld [vmem:[%s8661_s15 + $0x3d0] sm:$0xff] }
  0x86   : > { %4642 = vmatpush.bf16.msrb.mxu0 %v7692_v7  ;;  %v7757_v7 = vld [vmem:[%s8661_s15 + $0x308] sm:$0xff] }
  0x87   : > { %4655 = vmatpush.bf16.msrb.mxu1 %v7700_v8  ;;  %v7765_v8 = vld [vmem:[%s8661_s15 + $0x348] sm:$0xff] }
  0x88   : > { %4668 = vmatpush.bf16.msrb.mxu2 %v7708_v9  ;;  %v7773_v9 = vld [vmem:[%s8661_s15 + $0x388] sm:$0xff] }
  0x89   : > { %4681 = vmatpush.bf16.msrb.mxu3 %v7716_v10  ;;  %4643 = vmatmul.bf16.vlgmr.msrb.gmra.mxu0 %v1373_v51  ;;  %v7762_v51 = vld [vmem:[%s8661_s15 + $0x330] sm:$0xff]  ;;  %v7781_v10 = vld [vmem:[%s8661_s15 + $0x3c8] sm:$0xff] }
  0x8a   : > { %4687 = vmatpush.bf16.msra.mxu0 %v7731_v11  ;;  %4656 = vmatmul.bf16.vlgmr.msrb.gmra.mxu1 %v1374_v54  ;;  %v7786_v54 = vld [vmem:[%s8661_s15 + $0x3f0] sm:$0xff]  ;;  %v1383_v11 = vld [vmem:[#allocation1 + $0x24] sm:$0xff] }
  0x8b   : > { %4700 = vmatpush.bf16.msra.mxu1 %v7739_v12  ;;  %4669 = vmatmul.bf16.vlgmr.msrb.gmra.mxu2 %v1375_v50  ;;  %v1382_v50 = vld [vmem:[#allocation1 + $0x1b] sm:$0xff] }
  0x8c   : > { %4713 = vmatpush.bf16.msra.mxu2 %v7747_v13  ;;  %4682 = vmatmul.bf16.vlgmr.msrb.gmra.mxu3 %v1376_v52  ;;  %v7770_v52 = vld [vmem:[%s8661_s15 + $0x370] sm:$0xff]  ;;  %v1384_v13 = vld [vmem:[#allocation1 + $0x2d] sm:$0xff] }
  0x8d   : > { %4726 = vmatpush.bf16.msra.mxu3 %v7755_v14  ;;  %v1385_v12 = vld [vmem:[#allocation1 + $0x36] sm:$0xff]  ;;  %v1386_v14 = vld [vmem:[#allocation1 + $0x3f] sm:$0xff] }
  0x8e   : > { %4688 = vmatpush.bf16.msra.mxu0 %v7730_v15  ;;  %v337_v15 = vld [vmem:[%s8682_s10 + $0x10] sm:$0xff] }
  0x8f   : > { %4701 = vmatpush.bf16.msra.mxu1 %v7738_v16  ;;  %1388 = vst [vmem:[#allocation1] ss:$9 sm:$0xff] %v337_v15  ;;  %v7756_v16 = vld [vmem:[%s8661_s15 + $0x300] sm:$0xff] }
  0x90   : > { %4714 = vmatpush.bf16.msra.mxu2 %v7746_v17  ;;  %v7764_v17 = vld [vmem:[%s8661_s15 + $0x340] sm:$0xff] }
  0x91   : > { %4727 = vmatpush.bf16.msra.mxu3 %v7754_v18  ;;  %v7772_v18 = vld [vmem:[%s8661_s15 + $0x380] sm:$0xff] }
  0x92   : > { %4689 = vmatpush.bf16.msra.mxu0 %v7729_v19  ;;  %v7780_v19 = vld [vmem:[%s8661_s15 + $0x3c0] sm:$0xff] }
  0x93   : > { %4702 = vmatpush.bf16.msra.mxu1 %v7737_v20  ;;  %v7795_v20 = vld [vmem:[%s8661_s15 + $0x438] sm:$0xff] }
  0x94   : > { %4715 = vmatpush.bf16.msra.mxu2 %v7745_v21  ;;  %v7803_v21 = vld [vmem:[%s8661_s15 + $0x478] sm:$0xff] }
  0x95   : > { %4728 = vmatpush.bf16.msra.mxu3 %v7753_v22  ;;  %v7811_v22 = vld [vmem:[%s8661_s15 + $0x4b8] sm:$0xff] }
  0x96   : > { %4690 = vmatpush.bf16.msra.mxu0 %v7728_v23  ;;  %v7819_v23 = vld [vmem:[%s8661_s15 + $0x4f8] sm:$0xff] }
  0x97   : > { %4703 = vmatpush.bf16.msra.mxu1 %v7736_v24  ;;  %v7794_v24 = vld [vmem:[%s8661_s15 + $0x430] sm:$0xff] }
  0x98   : > { %4716 = vmatpush.bf16.msra.mxu2 %v7744_v25  ;;  %v7802_v25 = vld [vmem:[%s8661_s15 + $0x470] sm:$0xff] }
  0x99   : > { %4729 = vmatpush.bf16.msra.mxu3 %v7752_v26  ;;  %v7810_v26 = vld [vmem:[%s8661_s15 + $0x4b0] sm:$0xff] }
  0x9a   : > { %4691 = vmatpush.bf16.msra.mxu0 %v7727_v27  ;;  %v7818_v27 = vld [vmem:[%s8661_s15 + $0x4f0] sm:$0xff] }
  0x9b   : > { %4704 = vmatpush.bf16.msra.mxu1 %v7735_v28  ;;  %v7793_v28 = vld [vmem:[%s8661_s15 + $0x428] sm:$0xff] }
  0x9c   : > { %4717 = vmatpush.bf16.msra.mxu2 %v7743_v29  ;;  %v7801_v29 = vld [vmem:[%s8661_s15 + $0x468] sm:$0xff] }
  0x9d   : > { %4730 = vmatpush.bf16.msra.mxu3 %v7751_v30  ;;  %v7809_v30 = vld [vmem:[%s8661_s15 + $0x4a8] sm:$0xff] }
  0x9e   : > { %4692 = vmatpush.bf16.msra.mxu0 %v7726_v31  ;;  %v7817_v31 = vld [vmem:[%s8661_s15 + $0x4e8] sm:$0xff] }
  0x9f   : > { %4705 = vmatpush.bf16.msra.mxu1 %v7734_v32  ;;  %v7792_v32 = vld [vmem:[%s8661_s15 + $0x420] sm:$0xff] }
  0xa0   : > { %4718 = vmatpush.bf16.msra.mxu2 %v7742_v33  ;;  %v7800_v33 = vld [vmem:[%s8661_s15 + $0x460] sm:$0xff] }
  0xa1   : > { %4731 = vmatpush.bf16.msra.mxu3 %v7750_v34  ;;  %v7808_v34 = vld [vmem:[%s8661_s15 + $0x4a0] sm:$0xff] }
  0xa2   : > { %4693 = vmatpush.bf16.msra.mxu0 %v7725_v35  ;;  %v7816_v35 = vld [vmem:[%s8661_s15 + $0x4e0] sm:$0xff] }
  0xa3   : > { %4706 = vmatpush.bf16.msra.mxu1 %v7733_v36  ;;  %v7791_v36 = vld [vmem:[%s8661_s15 + $0x418] sm:$0xff] }
  0xa4   : > { %4719 = vmatpush.bf16.msra.mxu2 %v7741_v37  ;;  %v7799_v37 = vld [vmem:[%s8661_s15 + $0x458] sm:$0xff] }
  0xa5   : > { %4732 = vmatpush.bf16.msra.mxu3 %v7749_v38  ;;  %v7807_v38 = vld [vmem:[%s8661_s15 + $0x498] sm:$0xff] }
  0xa6   : > { %4694 = vmatpush.bf16.msra.mxu0 %v7724_v39  ;;  %v7815_v39 = vld [vmem:[%s8661_s15 + $0x4d8] sm:$0xff] }
  0xa7   : > { %4707 = vmatpush.bf16.msra.mxu1 %v7732_v40  ;;  %v7790_v40 = vld [vmem:[%s8661_s15 + $0x410] sm:$0xff] }
  0xa8   : > { %4720 = vmatpush.bf16.msra.mxu2 %v7740_v41  ;;  %v7798_v41 = vld [vmem:[%s8661_s15 + $0x450] sm:$0xff] }
  0xa9   : > { %4733 = vmatpush.bf16.msra.mxu3 %v7748_v42  ;;  %4695 = vmatmul.bf16.vlgmr.msra.gmra.mxu0 %v1379_v47  ;;  %v7806_v42 = vld [vmem:[%s8661_s15 + $0x490] sm:$0xff]  ;;  %v7813_v47 = vld [vmem:[%s8661_s15 + $0x4c8] sm:$0xff] }
  0xaa   : > { %4739 = vmatpush.bf16.msrb.mxu0 %v7763_v43  ;;  %4708 = vmatmul.bf16.vlgmr.msra.gmra.mxu1 %v1380_v49  ;;  %v7814_v43 = vld [vmem:[%s8661_s15 + $0x4d0] sm:$0xff]  ;;  %v7796_v49 = vld [vmem:[%s8661_s15 + $0x440] sm:$0xff] }
  0xab   : > { %4752 = vmatpush.bf16.msrb.mxu1 %v7771_v44  ;;  %4721 = vmatmul.bf16.vlgmr.msra.gmra.mxu2 %v1381_v48  ;;  %v7789_v44 = vld [vmem:[%s8661_s15 + $0x408] sm:$0xff]  ;;  %v7788_v48 = vld [vmem:[%s8661_s15 + $0x400] sm:$0xff] }
  0xac   : > { %4765 = vmatpush.bf16.msrb.mxu2 %v7779_v45  ;;  %4734 = vmatmul.bf16.vlgmr.msra.gmra.mxu3 %v1382_v50  ;;  %v7797_v45 = vld [vmem:[%s8661_s15 + $0x448] sm:$0xff]  ;;  %v7804_v50 = vld [vmem:[%s8661_s15 + $0x480] sm:$0xff] }
  0xad   : > { %4778 = vmatpush.bf16.msrb.mxu3 %v7787_v46  ;;  %v7805_v46 = vld [vmem:[%s8661_s15 + $0x488] sm:$0xff] }
  0xae   : > { %4740 = vmatpush.bf16.msrb.mxu0 %v7762_v51  ;;  %v7812_v51 = vld [vmem:[%s8661_s15 + $0x4c0] sm:$0xff] }
  0xaf   : > { %4753 = vmatpush.bf16.msrb.mxu1 %v7770_v52  ;;  %v7827_v52 = vld [vmem:[%s8661_s15 + $0x538] sm:$0xff] }
  0xb0   : > { %4766 = vmatpush.bf16.msrb.mxu2 %v7778_v53  ;;  %v7835_v53 = vld [vmem:[%s8661_s15 + $0x578] sm:$0xff] }
  0xb1   : > { %4779 = vmatpush.bf16.msrb.mxu3 %v7786_v54  ;;  %v7843_v54 = vld [vmem:[%s8661_s15 + $0x5b8] sm:$0xff] }
  0xb2   : > { %4741 = vmatpush.bf16.msrb.mxu0 %v7761_v55  ;;  %v7851_v55 = vld [vmem:[%s8661_s15 + $0x5f8] sm:$0xff] }
  0xb3   : > { %4754 = vmatpush.bf16.msrb.mxu1 %v7769_v56  ;;  %v1389_v56 = vld [vmem:[#allocation1] sm:$0xff] }
  0xb4   : > { %4767 = vmatpush.bf16.msrb.mxu2 %v7777_v57  ;;  %v1391_v57 = vld [vmem:[#allocation1 + $0x12] sm:$0xff] }
  0xb5   : > { %4780 = vmatpush.bf16.msrb.mxu3 %v7785_v58  ;;  %v1390_v58 = vld [vmem:[#allocation1 + $0x9] sm:$0xff] }
  0xb6   : > { %4742 = vmatpush.bf16.msrb.mxu0 %v7760_v59  ;;  %v1392_v59 = vld [vmem:[#allocation1 + $0x1b] sm:$0xff] }
  0xb7   : > { %4755 = vmatpush.bf16.msrb.mxu1 %v7768_v60  ;;  %v7826_v60 = vld [vmem:[%s8661_s15 + $0x530] sm:$0xff] }
  0xb8   : > { %4768 = vmatpush.bf16.msrb.mxu2 %v7776_v61  ;;  %v7834_v61 = vld [vmem:[%s8661_s15 + $0x570] sm:$0xff] }
  0xb9   : > { %4781 = vmatpush.bf16.msrb.mxu3 %v7784_v62  ;;  %v7842_v62 = vld [vmem:[%s8661_s15 + $0x5b0] sm:$0xff] }
  0xba   : > { %4743 = vmatpush.bf16.msrb.mxu0 %v7759_v63  ;;  %v7850_v63 = vld [vmem:[%s8661_s15 + $0x5f0] sm:$0xff] }
  0xbb   : > { %4756 = vmatpush.bf16.msrb.mxu1 %v7767_v0  ;;  %v7825_v0 = vld [vmem:[%s8661_s15 + $0x528] sm:$0xff] }
  0xbc   : > { %4769 = vmatpush.bf16.msrb.mxu2 %v7775_v1  ;;  %v7833_v1 = vld [vmem:[%s8661_s15 + $0x568] sm:$0xff] }
  0xbd   : > { %4782 = vmatpush.bf16.msrb.mxu3 %v7783_v2  ;;  %v7841_v2 = vld [vmem:[%s8661_s15 + $0x5a8] sm:$0xff] }
  0xbe   : > { %4744 = vmatpush.bf16.msrb.mxu0 %v7758_v3  ;;  %v7849_v3 = vld [vmem:[%s8661_s15 + $0x5e8] sm:$0xff] }
  0xbf   : > { %4757 = vmatpush.bf16.msrb.mxu1 %v7766_v4 }
  0xc0   : > { %4770 = vmatpush.bf16.msrb.mxu2 %v7774_v5  ;;  %v7824_v5 = vld [vmem:[%s8661_s15 + $0x520] sm:$0xff] }
  0xc1   : > { %4783 = vmatpush.bf16.msrb.mxu3 %v7782_v6  ;;  %v7832_v6 = vld [vmem:[%s8661_s15 + $0x560] sm:$0xff] }
  0xc2   : > { %4745 = vmatpush.bf16.msrb.mxu0 %v7757_v7 }
  0xc3   : > { %4758 = vmatpush.bf16.msrb.mxu1 %v7765_v8  ;;  %v7840_v8 = vld [vmem:[%s8661_s15 + $0x5a0] sm:$0xff] }
  0xc4   : > { %4771 = vmatpush.bf16.msrb.mxu2 %v7773_v9  ;;  %v7848_v9 = vld [vmem:[%s8661_s15 + $0x5e0] sm:$0xff] }
  0xc5   : > { %4784 = vmatpush.bf16.msrb.mxu3 %v7781_v10 }
  0xc6   : > { %4746 = vmatpush.bf16.msrb.mxu0 %v7756_v16 }
  0xc7   : > { %4759 = vmatpush.bf16.msrb.mxu1 %v7764_v17 }
  0xc8   : > { %4772 = vmatpush.bf16.msrb.mxu2 %v7772_v18 }
  0xc9   : > { %4785 = vmatpush.bf16.msrb.mxu3 %v7780_v19  ;;  %4747 = vmatmul.bf16.vlgmr.msrb.gmra.mxu0 %v1383_v11  ;;  %v7823_v11 = vld [vmem:[%s8661_s15 + $0x518] sm:$0xff]  ;;  %v7822_v19 = vld [vmem:[%s8661_s15 + $0x510] sm:$0xff] }
  0xca   : > { %4791 = vmatpush.bf16.msra.mxu0 %v7795_v20  ;;  %4760 = vmatmul.bf16.vlgmr.msrb.gmra.mxu1 %v1384_v13  ;;  %v7839_v13 = vld [vmem:[%s8661_s15 + $0x598] sm:$0xff]  ;;  %v7830_v20 = vld [vmem:[%s8661_s15 + $0x550] sm:$0xff] }
  0xcb   : > { %4804 = vmatpush.bf16.msra.mxu1 %v7803_v21  ;;  %4773 = vmatmul.bf16.vlgmr.msrb.gmra.mxu2 %v1385_v12  ;;  %v7831_v12 = vld [vmem:[%s8661_s15 + $0x558] sm:$0xff] }
  0xcc   : > { %4817 = vmatpush.bf16.msra.mxu2 %v7811_v22  ;;  %4786 = vmatmul.bf16.vlgmr.msrb.gmra.mxu3 %v1386_v14  ;;  %v7847_v14 = vld [vmem:[%s8661_s15 + $0x5d8] sm:$0xff] }
  0xcd   : > { %4830 = vmatpush.bf16.msra.mxu3 %v7819_v23  ;;  %v7838_v23 = vld [vmem:[%s8661_s15 + $0x590] sm:$0xff] }
  0xce   : > { %4792 = vmatpush.bf16.msra.mxu0 %v7794_v24  ;;  %v7846_v24 = vld [vmem:[%s8661_s15 + $0x5d0] sm:$0xff] }
  0xcf   : > { %4805 = vmatpush.bf16.msra.mxu1 %v7802_v25  ;;  %v7821_v25 = vld [vmem:[%s8661_s15 + $0x508] sm:$0xff] }
  0xd0   : > { %4818 = vmatpush.bf16.msra.mxu2 %v7810_v26  ;;  %v7829_v26 = vld [vmem:[%s8661_s15 + $0x548] sm:$0xff] }
  0xd1   : > { %4831 = vmatpush.bf16.msra.mxu3 %v7818_v27  ;;  %v7837_v27 = vld [vmem:[%s8661_s15 + $0x588] sm:$0xff] }
  0xd2   : > { %4793 = vmatpush.bf16.msra.mxu0 %v7793_v28  ;;  %v7845_v28 = vld [vmem:[%s8661_s15 + $0x5c8] sm:$0xff] }
  0xd3   : > { %4806 = vmatpush.bf16.msra.mxu1 %v7801_v29  ;;  %v1393_v29 = vld [vmem:[#allocation1 + $0x24] sm:$0xff] }
  0xd4   : > { %4819 = vmatpush.bf16.msra.mxu2 %v7809_v30  ;;  %v1395_v30 = vld [vmem:[#allocation1 + $0x36] sm:$0xff] }
  0xd5   : > { %4832 = vmatpush.bf16.msra.mxu3 %v7817_v31 }
  0xd6   : > { %4794 = vmatpush.bf16.msra.mxu0 %v7792_v32  ;;  %v1394_v32 = vld [vmem:[#allocation1 + $0x2d] sm:$0xff] }
  0xd7   : > { %4807 = vmatpush.bf16.msra.mxu1 %v7800_v33  ;;  %v1396_v33 = vld [vmem:[#allocation1 + $0x3f] sm:$0xff] }
  0xd8   : > { %4820 = vmatpush.bf16.msra.mxu2 %v7808_v34 }
  0xd9   : > { %4833 = vmatpush.bf16.msra.mxu3 %v7816_v35  ;;  %v338_v35 = vld [vmem:[%s8682_s10 + $0x18] sm:$0xff] }
  0xda   : > { %4795 = vmatpush.bf16.msra.mxu0 %v7791_v36  ;;  %1398 = vst [vmem:[#allocation1] ss:$9 sm:$0xff] %v338_v35  ;;  %v7820_v36 = vld [vmem:[%s8661_s15 + $0x500] sm:$0xff]  ;;  %v7913_v35 = vld [vmem:[%s8661_s15 + $0x7e8] sm:$0xff] }
  0xdb   : > { %4808 = vmatpush.bf16.msra.mxu1 %v7799_v37  ;;  %v7828_v37 = vld [vmem:[%s8661_s15 + $0x540] sm:$0xff] }
  0xdc   : > { %4821 = vmatpush.bf16.msra.mxu2 %v7807_v38  ;;  %v7836_v38 = vld [vmem:[%s8661_s15 + $0x580] sm:$0xff] }
  0xdd   : > { %4834 = vmatpush.bf16.msra.mxu3 %v7815_v39  ;;  %v7844_v39 = vld [vmem:[%s8661_s15 + $0x5c0] sm:$0xff] }
  0xde   : > { %4796 = vmatpush.bf16.msra.mxu0 %v7790_v40  ;;  %v7859_v40 = vld [vmem:[%s8661_s15 + $0x638] sm:$0xff] }
  0xdf   : > { %4809 = vmatpush.bf16.msra.mxu1 %v7798_v41  ;;  %v7867_v41 = vld [vmem:[%s8661_s15 + $0x678] sm:$0xff] }
  0xe0   : > { %4822 = vmatpush.bf16.msra.mxu2 %v7806_v42  ;;  %v7875_v42 = vld [vmem:[%s8661_s15 + $0x6b8] sm:$0xff] }
  0xe1   : > { %4835 = vmatpush.bf16.msra.mxu3 %v7814_v43  ;;  %v7883_v43 = vld [vmem:[%s8661_s15 + $0x6f8] sm:$0xff] }
  0xe2   : > { %4797 = vmatpush.bf16.msra.mxu0 %v7789_v44  ;;  %v7858_v44 = vld [vmem:[%s8661_s15 + $0x630] sm:$0xff] }
  0xe3   : > { %4810 = vmatpush.bf16.msra.mxu1 %v7797_v45  ;;  %v7866_v45 = vld [vmem:[%s8661_s15 + $0x670] sm:$0xff] }
  0xe4   : > { %4823 = vmatpush.bf16.msra.mxu2 %v7805_v46  ;;  %v7874_v46 = vld [vmem:[%s8661_s15 + $0x6b0] sm:$0xff] }
  0xe5   : > { %4836 = vmatpush.bf16.msra.mxu3 %v7813_v47  ;;  %v7882_v47 = vld [vmem:[%s8661_s15 + $0x6f0] sm:$0xff] }
  0xe6   : > { %4798 = vmatpush.bf16.msra.mxu0 %v7788_v48  ;;  %v4592_v4 = vpop.f32.mrf.mxu0  ;;  %v7857_v48 = vld [vmem:[%s8661_s15 + $0x628] sm:$0xff] }
  0xe7   : > { %4811 = vmatpush.bf16.msra.mxu1 %v7796_v49  ;;  %v4605_v7 = vpop.f32.mrf.mxu1  ;;  %v7865_v49 = vld [vmem:[%s8661_s15 + $0x668] sm:$0xff] }
  0xe8   : > { %4824 = vmatpush.bf16.msra.mxu2 %v7804_v50  ;;  %v4606_v10 = vadd.f32 %v4605_v7, %v4592_v4  ;;  %v7873_v50 = vld [vmem:[%s8661_s15 + $0x6a8] sm:$0xff]  ;;  %v7854_v4 = vld [vmem:[%s8661_s15 + $0x610] sm:$0xff] }
  0xe9   : > { %4837 = vmatpush.bf16.msra.mxu3 %v7812_v51  ;;  %4799 = vmatmul.bf16.vlgmr.msra.gmra.mxu0 %v1389_v56  ;;  %v7881_v51 = vld [vmem:[%s8661_s15 + $0x6e8] sm:$0xff] }
  0xea   : > { %4843 = vmatpush.bf16.msrb.mxu0 %v7827_v52  ;;  %4812 = vmatmul.bf16.vlgmr.msra.gmra.mxu1 %v1390_v58  ;;  %v7880_v58 = vld [vmem:[%s8661_s15 + $0x6e0] sm:$0xff] }
  0xeb   : > { %4856 = vmatpush.bf16.msrb.mxu1 %v7835_v53  ;;  %4825 = vmatmul.bf16.vlgmr.msra.gmra.mxu2 %v1391_v57  ;;  %v7856_v53 = vld [vmem:[%s8661_s15 + $0x620] sm:$0xff] }
  0xec   : > { %4869 = vmatpush.bf16.msrb.mxu2 %v7843_v54  ;;  %4838 = vmatmul.bf16.vlgmr.msra.gmra.mxu3 %v1392_v59  ;;  %v7864_v54 = vld [vmem:[%s8661_s15 + $0x660] sm:$0xff] }
  0xed   : > { %4882 = vmatpush.bf16.msrb.mxu3 %v7851_v55  ;;  %v7872_v57 = vld [vmem:[%s8661_s15 + $0x6a0] sm:$0xff] }
  0xee   : > { %4844 = vmatpush.bf16.msrb.mxu0 %v7826_v60  ;;  %v4618_v15 = vpop.f32.mrf.mxu2  ;;  %v4594_v18 = vpop.f32.mrf.mxu0  ;;  %v7855_v60 = vld [vmem:[%s8661_s15 + $0x618] sm:$0xff] }
  0xef   : > { %4857 = vmatpush.bf16.msrb.mxu1 %v7834_v61  ;;  %v4619_v16 = vadd.f32 %v4618_v15, %v4606_v10  ;;  %v4631_v17 = vpop.f32.mrf.mxu3  ;;  %v4607_v22 = vpop.f32.mrf.mxu1  ;;  %v7863_v61 = vld [vmem:[%s8661_s15 + $0x658] sm:$0xff]  ;;  %v7853_v10 = vld [vmem:[%s8661_s15 + $0x608] sm:$0xff]  ;;  %v7868_v18 = vld [vmem:[%s8661_s15 + $0x680] sm:$0xff] }
  0xf0   : > { %4870 = vmatpush.bf16.msrb.mxu2 %v7842_v62  ;;  %v7871_v62 = vld [vmem:[%s8661_s15 + $0x698] sm:$0xff] }
  0xf1   : > { %4883 = vmatpush.bf16.msrb.mxu3 %v7850_v63  ;;  %v8877_v21 = vadd.f32 %v4631_v17, %v4619_v16  ;;  %v7879_v63 = vld [vmem:[%s8661_s15 + $0x6d8] sm:$0xff]  ;;  %v7852_v16 = vld [vmem:[%s8661_s15 + $0x600] sm:$0xff] }
  0xf2   : > { %4845 = vmatpush.bf16.msrb.mxu0 %v7825_v0  ;;  %v7860_v17 = vld [vmem:[%s8661_s15 + $0x640] sm:$0xff]  ;;  %v7907_v22 = vld [vmem:[%s8661_s15 + $0x7b8] sm:$0xff] }
  0xf3   : > { %4858 = vmatpush.bf16.msrb.mxu1 %v7833_v1 }
  0xf4   : > { %4871 = vmatpush.bf16.msrb.mxu2 %v7841_v2 }
  0xf5   : > { %4884 = vmatpush.bf16.msrb.mxu3 %v7849_v3 }
  0xf6   : > { %4846 = vmatpush.bf16.msrb.mxu0 %v7824_v5  ;;  %v4620_v31 = vpop.f32.mrf.mxu2  ;;  %v7862_v5 = vld [vmem:[%s8661_s15 + $0x650] sm:$0xff] }
  0xf7   : > { %4859 = vmatpush.bf16.msrb.mxu1 %v7832_v6  ;;  %v4633_v34 = vpop.f32.mrf.mxu3  ;;  %v7914_v31 = vld [vmem:[%s8661_s15 + $0x7f0] sm:$0xff] }
  0xf8   : > { %4872 = vmatpush.bf16.msrb.mxu2 %v7840_v8  ;;  %v7870_v8 = vld [vmem:[%s8661_s15 + $0x690] sm:$0xff]  ;;  %v7905_v34 = vld [vmem:[%s8661_s15 + $0x7a8] sm:$0xff] }
  0xf9   : > { %4885 = vmatpush.bf16.msrb.mxu3 %v7848_v9  ;;  %v7878_v9 = vld [vmem:[%s8661_s15 + $0x6d0] sm:$0xff] }
  0xfa   : > { %4847 = vmatpush.bf16.msrb.mxu0 %v7823_v11  ;;  %v7861_v11 = vld [vmem:[%s8661_s15 + $0x648] sm:$0xff] }
  0xfb   : > { %4860 = vmatpush.bf16.msrb.mxu1 %v7831_v12  ;;  %v7869_v12 = vld [vmem:[%s8661_s15 + $0x688] sm:$0xff] }
  0xfc   : > { %4873 = vmatpush.bf16.msrb.mxu2 %v7839_v13  ;;  %v7877_v13 = vld [vmem:[%s8661_s15 + $0x6c8] sm:$0xff] }
  0xfd   : > { %4886 = vmatpush.bf16.msrb.mxu3 %v7847_v14 }
  0xfe   : > { %4848 = vmatpush.bf16.msrb.mxu0 %v7822_v19  ;;  %v7876_v19 = vld [vmem:[%s8661_s15 + $0x6c0] sm:$0xff] }
  0xff   : > { %4861 = vmatpush.bf16.msrb.mxu1 %v7830_v20  ;;  %v7891_v20 = vld [vmem:[%s8661_s15 + $0x738] sm:$0xff] }
 0x100   : > { %4874 = vmatpush.bf16.msrb.mxu2 %v7838_v23  ;;  %v7915_v23 = vld [vmem:[%s8661_s15 + $0x7f8] sm:$0xff] }
 0x101   : > { %4887 = vmatpush.bf16.msrb.mxu3 %v7846_v24  ;;  %v1399_v24 = vld [vmem:[#allocation1] sm:$0xff] }
 0x102   : > { %4849 = vmatpush.bf16.msrb.mxu0 %v7821_v25  ;;  %v1401_v25 = vld [vmem:[#allocation1 + $0x12] sm:$0xff] }
 0x103   : > { %4862 = vmatpush.bf16.msrb.mxu1 %v7829_v26  ;;  %v1400_v26 = vld [vmem:[#allocation1 + $0x9] sm:$0xff] }
 0x104   : > { %4875 = vmatpush.bf16.msrb.mxu2 %v7837_v27  ;;  %v1402_v27 = vld [vmem:[#allocation1 + $0x1b] sm:$0xff] }
 0x105   : > { %4888 = vmatpush.bf16.msrb.mxu3 %v7845_v28  ;;  %v7890_v28 = vld [vmem:[%s8661_s15 + $0x730] sm:$0xff] }
 0x106   : > { %4850 = vmatpush.bf16.msrb.mxu0 %v7820_v36  ;;  %v4644_v52 = vpop.f32.mrf.mxu0 }
 0x107   : > { %4863 = vmatpush.bf16.msrb.mxu1 %v7828_v37  ;;  %v4645_v55 = vadd.f32 %v4644_v52, %v8877_v21  ;;  %v4657_v56 = vpop.f32.mrf.mxu1  ;;  %v7899_v21 = vld [vmem:[%s8661_s15 + $0x778] sm:$0xff] }
 0x108   : > { %4876 = vmatpush.bf16.msrb.mxu2 %v7836_v38  ;;  %v7888_v38 = vld [vmem:[%s8661_s15 + $0x720] sm:$0xff] }
 0x109   : > { %4889 = vmatpush.bf16.msrb.mxu3 %v7844_v39  ;;  %4851 = vmatmul.bf16.vlgmr.msrb.gmra.mxu0 %v1393_v29  ;;  %v4658_v59 = vadd.f32 %v4657_v56, %v4645_v55  ;;  %v7898_v29 = vld [vmem:[%s8661_s15 + $0x770] sm:$0xff]  ;;  %v7896_v39 = vld [vmem:[%s8661_s15 + $0x760] sm:$0xff] }
 0x10a   : > { %4895 = vmatpush.bf16.msra.mxu0 %v7859_v40  ;;  %4864 = vmatmul.bf16.vlgmr.msrb.gmra.mxu1 %v1394_v32  ;;  %v7889_v32 = vld [vmem:[%s8661_s15 + $0x728] sm:$0xff]  ;;  %v7902_v56 = vld [vmem:[%s8661_s15 + $0x790] sm:$0xff] }
 0x10b   : > { %4908 = vmatpush.bf16.msra.mxu1 %v7867_v41  ;;  %4877 = vmatmul.bf16.vlgmr.msrb.gmra.mxu2 %v1395_v30  ;;  %v7906_v30 = vld [vmem:[%s8661_s15 + $0x7b0] sm:$0xff]  ;;  %v7904_v41 = vld [vmem:[%s8661_s15 + $0x7a0] sm:$0xff] }
 0x10c   : > { %4921 = vmatpush.bf16.msra.mxu2 %v7875_v42  ;;  %4890 = vmatmul.bf16.vlgmr.msrb.gmra.mxu3 %v1396_v33  ;;  %v7897_v33 = vld [vmem:[%s8661_s15 + $0x768] sm:$0xff]  ;;  %v7912_v42 = vld [vmem:[%s8661_s15 + $0x7e0] sm:$0xff] }
 0x10d   : > { %4934 = vmatpush.bf16.msra.mxu3 %v7883_v43 }
 0x10e   : > { %4896 = vmatpush.bf16.msra.mxu0 %v7858_v44  ;;  %v4670_v0 = vpop.f32.mrf.mxu2  ;;  %v4646_v3 = vpop.f32.mrf.mxu0  ;;  %v7887_v44 = vld [vmem:[%s8661_s15 + $0x718] sm:$0xff] }
 0x10f   : > { %4909 = vmatpush.bf16.msra.mxu1 %v7866_v45  ;;  %v4671_v1 = vadd.f32 %v4670_v0, %v4658_v59  ;;  %v4683_v2 = vpop.f32.mrf.mxu3  ;;  %v4659_v7 = vpop.f32.mrf.mxu1  ;;  %v7895_v45 = vld [vmem:[%s8661_s15 + $0x758] sm:$0xff]  ;;  %v7893_v59 = vld [vmem:[%s8661_s15 + $0x748] sm:$0xff] }
 0x110   : > { %4922 = vmatpush.bf16.msra.mxu2 %v7874_v46  ;;  %v7903_v46 = vld [vmem:[%s8661_s15 + $0x798] sm:$0xff]  ;;  %v7900_v7 = vld [vmem:[%s8661_s15 + $0x780] sm:$0xff] }
 0x111   : > { %4935 = vmatpush.bf16.msra.mxu3 %v7882_v47  ;;  %v4684_v6 = vadd.f32 %v4683_v2, %v4671_v1  ;;  %v7911_v47 = vld [vmem:[%s8661_s15 + $0x7d8] sm:$0xff]  ;;  %v1404_v1 = vld [vmem:[#allocation1 + $0x2d] sm:$0xff] }
 0x112   : > { %4897 = vmatpush.bf16.msra.mxu0 %v7857_v48  ;;  %v1406_v2 = vld [vmem:[#allocation1 + $0x3f] sm:$0xff] }
 0x113   : > { %4910 = vmatpush.bf16.msra.mxu1 %v7865_v49 }
 0x114   : > { %4923 = vmatpush.bf16.msra.mxu2 %v7873_v50 }
 0x115   : > { %4936 = vmatpush.bf16.msra.mxu3 %v7881_v51 }
 0x116   : > { %4898 = vmatpush.bf16.msra.mxu0 %v7856_v53  ;;  %v4672_v14 = vpop.f32.mrf.mxu2  ;;  %v7886_v53 = vld [vmem:[%s8661_s15 + $0x710] sm:$0xff] }
 0x117   : > { %4911 = vmatpush.bf16.msra.mxu1 %v7864_v54  ;;  %v4685_v15 = vpop.f32.mrf.mxu3  ;;  %v7894_v54 = vld [vmem:[%s8661_s15 + $0x750] sm:$0xff] }
 0x118   : > { %4924 = vmatpush.bf16.msra.mxu2 %v7872_v57  ;;  %v7910_v57 = vld [vmem:[%s8661_s15 + $0x7d0] sm:$0xff] }
 0x119   : > { %4937 = vmatpush.bf16.msra.mxu3 %v7880_v58  ;;  %v7885_v58 = vld [vmem:[%s8661_s15 + $0x708] sm:$0xff]  ;;  %v7930_v14 = vld [vmem:[%s8661_s15 + $0x870] sm:$0xff] }
 0x11a   : > { %4899 = vmatpush.bf16.msra.mxu0 %v7855_v60  ;;  %v7901_v60 = vld [vmem:[%s8661_s15 + $0x788] sm:$0xff]  ;;  %v7938_v15 = vld [vmem:[%s8661_s15 + $0x8b0] sm:$0xff] }
 0x11b   : > { %4912 = vmatpush.bf16.msra.mxu1 %v7863_v61  ;;  %v7909_v61 = vld [vmem:[%s8661_s15 + $0x7c8] sm:$0xff] }
 0x11c   : > { %4925 = vmatpush.bf16.msra.mxu2 %v7871_v62  ;;  %v1403_v62 = vld [vmem:[#allocation1 + $0x24] sm:$0xff] }
 0x11d   : > { %4938 = vmatpush.bf16.msra.mxu3 %v7879_v63  ;;  %v1405_v63 = vld [vmem:[#allocation1 + $0x36] sm:$0xff] }
 0x11e   : > { %4900 = vmatpush.bf16.msra.mxu0 %v7854_v4  ;;  %v339_v4 = vld [vmem:[%s8682_s10 + $0x20] sm:$0xff] }
 0x11f   : > { %4913 = vmatpush.bf16.msra.mxu1 %v7862_v5  ;;  %1408 = vst [vmem:[#allocation1] ss:$9 sm:$0xff] %v339_v4  ;;  %v7884_v5 = vld [vmem:[%s8661_s15 + $0x700] sm:$0xff]  ;;  %v7977_v4 = vld [vmem:[%s8661_s15 + $0x9e8] sm:$0xff] }
 0x120   : > { %4926 = vmatpush.bf16.msra.mxu2 %v7870_v8  ;;  %v7908_v8 = vld [vmem:[%s8661_s15 + $0x7c0] sm:$0xff] }
 0x121   : > { %4939 = vmatpush.bf16.msra.mxu3 %v7878_v9  ;;  %v7923_v9 = vld [vmem:[%s8661_s15 + $0x838] sm:$0xff] }
 0x122   : > { %4901 = vmatpush.bf16.msra.mxu0 %v7853_v10  ;;  %v7931_v10 = vld [vmem:[%s8661_s15 + $0x878] sm:$0xff] }
 0x123   : > { %4914 = vmatpush.bf16.msra.mxu1 %v7861_v11  ;;  %v7939_v11 = vld [vmem:[%s8661_s15 + $0x8b8] sm:$0xff] }
 0x124   : > { %4927 = vmatpush.bf16.msra.mxu2 %v7869_v12  ;;  %v7947_v12 = vld [vmem:[%s8661_s15 + $0x8f8] sm:$0xff] }
 0x125   : > { %4940 = vmatpush.bf16.msra.mxu3 %v7877_v13  ;;  %v7922_v13 = vld [vmem:[%s8661_s15 + $0x830] sm:$0xff] }
 0x126   : > { %4902 = vmatpush.bf16.msra.mxu0 %v7852_v16  ;;  %v4696_v36 = vpop.f32.mrf.mxu0  ;;  %v7946_v16 = vld [vmem:[%s8661_s15 + $0x8f0] sm:$0xff] }
 0x127   : > { %4915 = vmatpush.bf16.msra.mxu1 %v7860_v17  ;;  %v4697_v37 = vadd.f32 %v4696_v36, %v4684_v6  ;;  %v4709_v40 = vpop.f32.mrf.mxu1  ;;  %v7892_v6 = vld [vmem:[%s8661_s15 + $0x740] sm:$0xff]  ;;  %v7921_v17 = vld [vmem:[%s8661_s15 + $0x828] sm:$0xff] }
 0x128   : > { %4928 = vmatpush.bf16.msra.mxu2 %v7868_v18  ;;  %v7929_v18 = vld [vmem:[%s8661_s15 + $0x868] sm:$0xff] }
 0x129   : > { %4941 = vmatpush.bf16.msra.mxu3 %v7876_v19  ;;  %4903 = vmatmul.bf16.vlgmr.msra.gmra.mxu0 %v1399_v24  ;;  %v4710_v43 = vadd.f32 %v4709_v40, %v4697_v37  ;;  %v7937_v19 = vld [vmem:[%s8661_s15 + $0x8a8] sm:$0xff]  ;;  %v7928_v24 = vld [vmem:[%s8661_s15 + $0x860] sm:$0xff] }
 0x12a   : > { %4947 = vmatpush.bf16.msrb.mxu0 %v7891_v20  ;;  %4916 = vmatmul.bf16.vlgmr.msra.gmra.mxu1 %v1400_v26  ;;  %v7945_v20 = vld [vmem:[%s8661_s15 + $0x8e8] sm:$0xff]  ;;  %v7936_v26 = vld [vmem:[%s8661_s15 + $0x8a0] sm:$0xff] }
 0x12b   : > { %4960 = vmatpush.bf16.msrb.mxu1 %v7899_v21  ;;  %4929 = vmatmul.bf16.vlgmr.msra.gmra.mxu2 %v1401_v25 }
 0x12c   : > { %4973 = vmatpush.bf16.msrb.mxu2 %v7907_v22  ;;  %4942 = vmatmul.bf16.vlgmr.msra.gmra.mxu3 %v1402_v27  ;;  %v7944_v27 = vld [vmem:[%s8661_s15 + $0x8e0] sm:$0xff] }
 0x12d   : > { %4986 = vmatpush.bf16.msrb.mxu3 %v7915_v23  ;;  %v7920_v23 = vld [vmem:[%s8661_s15 + $0x820] sm:$0xff] }
 0x12e   : > { %4948 = vmatpush.bf16.msrb.mxu0 %v7890_v28  ;;  %v4722_v48 = vpop.f32.mrf.mxu2  ;;  %v4698_v51 = vpop.f32.mrf.mxu0 }
 0x12f   : > { %4961 = vmatpush.bf16.msrb.mxu1 %v7898_v29  ;;  %v4723_v49 = vadd.f32 %v4722_v48, %v4710_v43  ;;  %v4735_v50 = vpop.f32.mrf.mxu3  ;;  %v4711_v55 = vpop.f32.mrf.mxu1  ;;  %v7919_v29 = vld [vmem:[%s8661_s15 + $0x818] sm:$0xff]  ;;  %v7917_v43 = vld [vmem:[%s8661_s15 + $0x808] sm:$0xff]  ;;  %v7932_v51 = vld [vmem:[%s8661_s15 + $0x880] sm:$0xff] }
 0x130   : > { %4974 = vmatpush.bf16.msrb.mxu2 %v7906_v30  ;;  %v7927_v30 = vld [vmem:[%s8661_s15 + $0x858] sm:$0xff] }
 0x131   : > { %4987 = vmatpush.bf16.msrb.mxu3 %v7914_v31  ;;  %v8943_v52 = vadd.f32 %v4735_v50, %v4723_v49  ;;  %v7935_v31 = vld [vmem:[%s8661_s15 + $0x898] sm:$0xff]  ;;  %v7916_v49 = vld [vmem:[%s8661_s15 + $0x800] sm:$0xff] }
 0x132   : > { %4949 = vmatpush.bf16.msrb.mxu0 %v7889_v32  ;;  %v7943_v32 = vld [vmem:[%s8661_s15 + $0x8d8] sm:$0xff]  ;;  %v7924_v50 = vld [vmem:[%s8661_s15 + $0x840] sm:$0xff] }
 0x133   : > { %4962 = vmatpush.bf16.msrb.mxu1 %v7897_v33  ;;  %v7971_v55 = vld [vmem:[%s8661_s15 + $0x9b8] sm:$0xff] }
 0x134   : > { %4975 = vmatpush.bf16.msrb.mxu2 %v7905_v34 }
 0x135   : > { %4988 = vmatpush.bf16.msrb.mxu3 %v7913_v35 }
 0x136   : > { %4950 = vmatpush.bf16.msrb.mxu0 %v7888_v38  ;;  %v4724_v0 = vpop.f32.mrf.mxu2  ;;  %v7918_v38 = vld [vmem:[%s8661_s15 + $0x810] sm:$0xff] }
 0x137   : > { %4963 = vmatpush.bf16.msrb.mxu1 %v7896_v39  ;;  %v4737_v3 = vpop.f32.mrf.mxu3  ;;  %v7926_v39 = vld [vmem:[%s8661_s15 + $0x850] sm:$0xff] }
 0x138   : > { %4976 = vmatpush.bf16.msrb.mxu2 %v7904_v41  ;;  %v7934_v41 = vld [vmem:[%s8661_s15 + $0x890] sm:$0xff]  ;;  %v7969_v3 = vld [vmem:[%s8661_s15 + $0x9a8] sm:$0xff] }
 0x139   : > { %4989 = vmatpush.bf16.msrb.mxu3 %v7912_v42  ;;  %v7942_v42 = vld [vmem:[%s8661_s15 + $0x8d0] sm:$0xff] }
 0x13a   : > { %4951 = vmatpush.bf16.msrb.mxu0 %v7887_v44  ;;  %v7925_v44 = vld [vmem:[%s8661_s15 + $0x848] sm:$0xff]  ;;  %v7978_v0 = vld [vmem:[%s8661_s15 + $0x9f0] sm:$0xff] }
 0x13b   : > { %4964 = vmatpush.bf16.msrb.mxu1 %v7895_v45  ;;  %v7933_v45 = vld [vmem:[%s8661_s15 + $0x888] sm:$0xff] }
 0x13c   : > { %4977 = vmatpush.bf16.msrb.mxu2 %v7903_v46  ;;  %v7941_v46 = vld [vmem:[%s8661_s15 + $0x8c8] sm:$0xff] }
 0x13d   : > { %4990 = vmatpush.bf16.msrb.mxu3 %v7911_v47 }
 0x13e   : > { %4952 = vmatpush.bf16.msrb.mxu0 %v7886_v53  ;;  %v7955_v53 = vld [vmem:[%s8661_s15 + $0x938] sm:$0xff] }
 0x13f   : > { %4965 = vmatpush.bf16.msrb.mxu1 %v7894_v54  ;;  %v7963_v54 = vld [vmem:[%s8661_s15 + $0x978] sm:$0xff] }
 0x140   : > { %4978 = vmatpush.bf16.msrb.mxu2 %v7902_v56  ;;  %v7979_v56 = vld [vmem:[%s8661_s15 + $0x9f8] sm:$0xff] }
 0x141   : > { %4991 = vmatpush.bf16.msrb.mxu3 %v7910_v57  ;;  %v1409_v57 = vld [vmem:[#allocation1] sm:$0xff] }
 0x142   : > { %4953 = vmatpush.bf16.msrb.mxu0 %v7885_v58  ;;  %v1411_v58 = vld [vmem:[#allocation1 + $0x12] sm:$0xff] }
 0x143   : > { %4966 = vmatpush.bf16.msrb.mxu1 %v7893_v59  ;;  %v1410_v59 = vld [vmem:[#allocation1 + $0x9] sm:$0xff] }
 0x144   : > { %4979 = vmatpush.bf16.msrb.mxu2 %v7901_v60  ;;  %v1412_v60 = vld [vmem:[#allocation1 + $0x1b] sm:$0xff] }
 0x145   : > { %4992 = vmatpush.bf16.msrb.mxu3 %v7909_v61  ;;  %v7954_v61 = vld [vmem:[%s8661_s15 + $0x930] sm:$0xff] }
 0x146   : > { %4954 = vmatpush.bf16.msrb.mxu0 %v7884_v5  ;;  %v4748_v21 = vpop.f32.mrf.mxu0 }
 0x147   : > { %4967 = vmatpush.bf16.msrb.mxu1 %v7892_v6  ;;  %v4749_v22 = vadd.f32 %v4748_v21, %v8943_v52  ;;  %v4761_v25 = vpop.f32.mrf.mxu1  ;;  %v7940_v52 = vld [vmem:[%s8661_s15 + $0x8c0] sm:$0xff] }
 0x148   : > { %4980 = vmatpush.bf16.msrb.mxu2 %v7900_v7  ;;  %v7952_v7 = vld [vmem:[%s8661_s15 + $0x920] sm:$0xff] }
 0x149   : > { %4993 = vmatpush.bf16.msrb.mxu3 %v7908_v8  ;;  %4955 = vmatmul.bf16.vlgmr.msrb.gmra.mxu0 %v1403_v62  ;;  %v4762_v28 = vadd.f32 %v4761_v25, %v4749_v22  ;;  %v7962_v62 = vld [vmem:[%s8661_s15 + $0x970] sm:$0xff]  ;;  %v7960_v8 = vld [vmem:[%s8661_s15 + $0x960] sm:$0xff] }
 0x14a   : > { %4999 = vmatpush.bf16.msra.mxu0 %v7923_v9  ;;  %4968 = vmatmul.bf16.vlgmr.msrb.gmra.mxu1 %v1404_v1  ;;  %v7953_v1 = vld [vmem:[%s8661_s15 + $0x928] sm:$0xff]  ;;  %v7950_v22 = vld [vmem:[%s8661_s15 + $0x910] sm:$0xff] }
 0x14b   : > { %5012 = vmatpush.bf16.msra.mxu1 %v7931_v10  ;;  %4981 = vmatmul.bf16.vlgmr.msrb.gmra.mxu2 %v1405_v63  ;;  %v7970_v63 = vld [vmem:[%s8661_s15 + $0x9b0] sm:$0xff]  ;;  %v7968_v10 = vld [vmem:[%s8661_s15 + $0x9a0] sm:$0xff] }
 0x14c   : > { %5025 = vmatpush.bf16.msra.mxu2 %v7939_v11  ;;  %4994 = vmatmul.bf16.vlgmr.msrb.gmra.mxu3 %v1406_v2  ;;  %v7961_v2 = vld [vmem:[%s8661_s15 + $0x968] sm:$0xff]  ;;  %v7976_v11 = vld [vmem:[%s8661_s15 + $0x9e0] sm:$0xff]  ;;  %v7966_v25 = vld [vmem:[%s8661_s15 + $0x990] sm:$0xff] }
 0x14d   : > { %5038 = vmatpush.bf16.msra.mxu3 %v7947_v12 }
 0x14e   : > { %5000 = vmatpush.bf16.msra.mxu0 %v7922_v13  ;;  %v4774_v33 = vpop.f32.mrf.mxu2  ;;  %v4750_v36 = vpop.f32.mrf.mxu0  ;;  %v7951_v13 = vld [vmem:[%s8661_s15 + $0x918] sm:$0xff] }
 0x14f   : > { %5013 = vmatpush.bf16.msra.mxu1 %v7930_v14  ;;  %v4775_v34 = vadd.f32 %v4774_v33, %v4762_v28  ;;  %v4787_v35 = vpop.f32.mrf.mxu3  ;;  %v4763_v40 = vpop.f32.mrf.mxu1  ;;  %v7959_v14 = vld [vmem:[%s8661_s15 + $0x958] sm:$0xff]  ;;  %v7957_v28 = vld [vmem:[%s8661_s15 + $0x948] sm:$0xff] }
 0x150   : > { %5026 = vmatpush.bf16.msra.mxu2 %v7938_v15  ;;  %v7967_v15 = vld [vmem:[%s8661_s15 + $0x998] sm:$0xff]  ;;  %v7964_v40 = vld [vmem:[%s8661_s15 + $0x980] sm:$0xff] }
 0x151   : > { %5039 = vmatpush.bf16.msra.mxu3 %v7946_v16  ;;  %v4788_v37 = vadd.f32 %v4787_v35, %v4775_v34  ;;  %v7975_v16 = vld [vmem:[%s8661_s15 + $0x9d8] sm:$0xff]  ;;  %v1414_v34 = vld [vmem:[#allocation1 + $0x2d] sm:$0xff] }
 0x152   : > { %5001 = vmatpush.bf16.msra.mxu0 %v7921_v17  ;;  %v1416_v35 = vld [vmem:[#allocation1 + $0x3f] sm:$0xff] }
 0x153   : > { %5014 = vmatpush.bf16.msra.mxu1 %v7929_v18 }
 0x154   : > { %5027 = vmatpush.bf16.msra.mxu2 %v7937_v19 }
 0x155   : > { %5040 = vmatpush.bf16.msra.mxu3 %v7945_v20 }
 0x156   : > { %5002 = vmatpush.bf16.msra.mxu0 %v7920_v23  ;;  %v4776_v47 = vpop.f32.mrf.mxu2  ;;  %v7958_v23 = vld [vmem:[%s8661_s15 + $0x950] sm:$0xff] }
 0x157   : > { %5015 = vmatpush.bf16.msra.mxu1 %v7928_v24  ;;  %v4789_v48 = vpop.f32.mrf.mxu3  ;;  %v7994_v47 = vld [vmem:[%s8661_s15 + $0xa70] sm:$0xff] }
 0x158   : > { %5028 = vmatpush.bf16.msra.mxu2 %v7936_v26  ;;  %v7974_v26 = vld [vmem:[%s8661_s15 + $0x9d0] sm:$0xff] }
 0x159   : > { %5041 = vmatpush.bf16.msra.mxu3 %v7944_v27  ;;  %v7949_v27 = vld [vmem:[%s8661_s15 + $0x908] sm:$0xff]  ;;  %v8002_v48 = vld [vmem:[%s8661_s15 + $0xab0] sm:$0xff] }
 0x15a   : > { %5003 = vmatpush.bf16.msra.mxu0 %v7919_v29  ;;  %v7965_v29 = vld [vmem:[%s8661_s15 + $0x988] sm:$0xff] }
 0x15b   : > { %5016 = vmatpush.bf16.msra.mxu1 %v7927_v30  ;;  %v7973_v30 = vld [vmem:[%s8661_s15 + $0x9c8] sm:$0xff] }
 0x15c   : > { %5029 = vmatpush.bf16.msra.mxu2 %v7935_v31  ;;  %v1413_v31 = vld [vmem:[#allocation1 + $0x24] sm:$0xff] }
 0x15d   : > { %5042 = vmatpush.bf16.msra.mxu3 %v7943_v32  ;;  %v1415_v32 = vld [vmem:[#allocation1 + $0x36] sm:$0xff] }
 0x15e   : > { %5004 = vmatpush.bf16.msra.mxu0 %v7918_v38  ;;  %v7948_v38 = vld [vmem:[%s8661_s15 + $0x900] sm:$0xff] }
 0x15f   : > { %5017 = vmatpush.bf16.msra.mxu1 %v7926_v39  ;;  %v7956_v39 = vld [vmem:[%s8661_s15 + $0x940] sm:$0xff] }
 0x160   : > { %5030 = vmatpush.bf16.msra.mxu2 %v7934_v41  ;;  %v7972_v41 = vld [vmem:[%s8661_s15 + $0x9c0] sm:$0xff] }
 0x161   : > { %5043 = vmatpush.bf16.msra.mxu3 %v7942_v42  ;;  %v7987_v42 = vld [vmem:[%s8661_s15 + $0xa38] sm:$0xff] }
 0x162   : > { %5005 = vmatpush.bf16.msra.mxu0 %v7917_v43  ;;  %v7995_v43 = vld [vmem:[%s8661_s15 + $0xa78] sm:$0xff] }
 0x163   : > { %5018 = vmatpush.bf16.msra.mxu1 %v7925_v44  ;;  %v8003_v44 = vld [vmem:[%s8661_s15 + $0xab8] sm:$0xff] }
 0x164   : > { %5031 = vmatpush.bf16.msra.mxu2 %v7933_v45  ;;  %v8011_v45 = vld [vmem:[%s8661_s15 + $0xaf8] sm:$0xff] }
 0x165   : > { %5044 = vmatpush.bf16.msra.mxu3 %v7941_v46  ;;  %v7986_v46 = vld [vmem:[%s8661_s15 + $0xa30] sm:$0xff] }
 0x166   : > { %5006 = vmatpush.bf16.msra.mxu0 %v7916_v49  ;;  %v4800_v5 = vpop.f32.mrf.mxu0  ;;  %v8010_v49 = vld [vmem:[%s8661_s15 + $0xaf0] sm:$0xff] }
 0x167   : > { %5019 = vmatpush.bf16.msra.mxu1 %v7924_v50  ;;  %v4801_v6 = vadd.f32 %v4800_v5, %v4788_v37  ;;  %v4813_v9 = vpop.f32.mrf.mxu1  ;;  %v340_v37 = vld [vmem:[%s8682_s10 + $0x28] sm:$0xff]  ;;  %v7985_v50 = vld [vmem:[%s8661_s15 + $0xa28] sm:$0xff] }
 0x168   : > { %5032 = vmatpush.bf16.msra.mxu2 %v7932_v51  ;;  %1418 = vst [vmem:[#allocation1] ss:$9 sm:$0xff] %v340_v37  ;;  %v7993_v51 = vld [vmem:[%s8661_s15 + $0xa68] sm:$0xff] }
 0x169   : > { %5045 = vmatpush.bf16.msra.mxu3 %v7940_v52  ;;  %5007 = vmatmul.bf16.vlgmr.msra.gmra.mxu0 %v1409_v57  ;;  %v4814_v12 = vadd.f32 %v4813_v9, %v4801_v6  ;;  %v8001_v52 = vld [vmem:[%s8661_s15 + $0xaa8] sm:$0xff]  ;;  %v7992_v57 = vld [vmem:[%s8661_s15 + $0xa60] sm:$0xff] }
 0x16a   : > { %5051 = vmatpush.bf16.msrb.mxu0 %v7955_v53  ;;  %5020 = vmatmul.bf16.vlgmr.msra.gmra.mxu1 %v1410_v59  ;;  %v8009_v53 = vld [vmem:[%s8661_s15 + $0xae8] sm:$0xff]  ;;  %v8000_v59 = vld [vmem:[%s8661_s15 + $0xaa0] sm:$0xff] }
 0x16b   : > { %5064 = vmatpush.bf16.msrb.mxu1 %v7963_v54  ;;  %5033 = vmatmul.bf16.vlgmr.msra.gmra.mxu2 %v1411_v58  ;;  %v8041_v37 = vld [vmem:[%s8661_s15 + $0xbe8] sm:$0xff] }
 0x16c   : > { %5077 = vmatpush.bf16.msrb.mxu2 %v7971_v55  ;;  %5046 = vmatmul.bf16.vlgmr.msra.gmra.mxu3 %v1412_v60  ;;  %v8008_v60 = vld [vmem:[%s8661_s15 + $0xae0] sm:$0xff] }
 0x16d   : > { %5090 = vmatpush.bf16.msrb.mxu3 %v7979_v56  ;;  %v7984_v56 = vld [vmem:[%s8661_s15 + $0xa20] sm:$0xff] }
 0x16e   : > { %5052 = vmatpush.bf16.msrb.mxu0 %v7954_v61  ;;  %v4826_v17 = vpop.f32.mrf.mxu2  ;;  %v4802_v20 = vpop.f32.mrf.mxu0 }
 0x16f   : > { %5065 = vmatpush.bf16.msrb.mxu1 %v7962_v62  ;;  %v4827_v18 = vadd.f32 %v4826_v17, %v4814_v12  ;;  %v4839_v19 = vpop.f32.mrf.mxu3  ;;  %v4815_v24 = vpop.f32.mrf.mxu1  ;;  %v7983_v62 = vld [vmem:[%s8661_s15 + $0xa18] sm:$0xff]  ;;  %v7981_v12 = vld [vmem:[%s8661_s15 + $0xa08] sm:$0xff]  ;;  %v7996_v20 = vld [vmem:[%s8661_s15 + $0xa80] sm:$0xff] }
 0x170   : > { %5078 = vmatpush.bf16.msrb.mxu2 %v7970_v63  ;;  %v7991_v63 = vld [vmem:[%s8661_s15 + $0xa58] sm:$0xff] }
 0x171   : > { %5091 = vmatpush.bf16.msrb.mxu3 %v7978_v0  ;;  %v9011_v21 = vadd.f32 %v4839_v19, %v4827_v18  ;;  %v7999_v0 = vld [vmem:[%s8661_s15 + $0xa98] sm:$0xff]  ;;  %v7980_v18 = vld [vmem:[%s8661_s15 + $0xa00] sm:$0xff] }
 0x172   : > { %5053 = vmatpush.bf16.msrb.mxu0 %v7953_v1  ;;  %v8007_v1 = vld [vmem:[%s8661_s15 + $0xad8] sm:$0xff]  ;;  %v7988_v19 = vld [vmem:[%s8661_s15 + $0xa40] sm:$0xff] }
 0x173   : > { %5066 = vmatpush.bf16.msrb.mxu1 %v7961_v2  ;;  %v8035_v24 = vld [vmem:[%s8661_s15 + $0xbb8] sm:$0xff] }
 0x174   : > { %5079 = vmatpush.bf16.msrb.mxu2 %v7969_v3 }
 0x175   : > { %5092 = vmatpush.bf16.msrb.mxu3 %v7977_v4 }
 0x176   : > { %5054 = vmatpush.bf16.msrb.mxu0 %v7952_v7  ;;  %v4828_v33 = vpop.f32.mrf.mxu2  ;;  %v7982_v7 = vld [vmem:[%s8661_s15 + $0xa10] sm:$0xff] }
 0x177   : > { %5067 = vmatpush.bf16.msrb.mxu1 %v7960_v8  ;;  %v4841_v36 = vpop.f32.mrf.mxu3  ;;  %v7990_v8 = vld [vmem:[%s8661_s15 + $0xa50] sm:$0xff] }
 0x178   : > { %5080 = vmatpush.bf16.msrb.mxu2 %v7968_v10  ;;  %v7998_v10 = vld [vmem:[%s8661_s15 + $0xa90] sm:$0xff]  ;;  %v8033_v36 = vld [vmem:[%s8661_s15 + $0xba8] sm:$0xff] }
 0x179   : > { %5093 = vmatpush.bf16.msrb.mxu3 %v7976_v11  ;;  %v8006_v11 = vld [vmem:[%s8661_s15 + $0xad0] sm:$0xff] }
 0x17a   : > { %5055 = vmatpush.bf16.msrb.mxu0 %v7951_v13  ;;  %v7989_v13 = vld [vmem:[%s8661_s15 + $0xa48] sm:$0xff]  ;;  %v8042_v33 = vld [vmem:[%s8661_s15 + $0xbf0] sm:$0xff] }
 0x17b   : > { %5068 = vmatpush.bf16.msrb.mxu1 %v7959_v14  ;;  %v7997_v14 = vld [vmem:[%s8661_s15 + $0xa88] sm:$0xff] }
 0x17c   : > { %5081 = vmatpush.bf16.msrb.mxu2 %v7967_v15  ;;  %v8005_v15 = vld [vmem:[%s8661_s15 + $0xac8] sm:$0xff] }
 0x17d   : > { %5094 = vmatpush.bf16.msrb.mxu3 %v7975_v16 }
 0x17e   : > { %5056 = vmatpush.bf16.msrb.mxu0 %v7950_v22  ;;  %v8019_v22 = vld [vmem:[%s8661_s15 + $0xb38] sm:$0xff] }
 0x17f   : > { %5069 = vmatpush.bf16.msrb.mxu1 %v7958_v23  ;;  %v8027_v23 = vld [vmem:[%s8661_s15 + $0xb78] sm:$0xff] }
 0x180   : > { %5082 = vmatpush.bf16.msrb.mxu2 %v7966_v25  ;;  %v8043_v25 = vld [vmem:[%s8661_s15 + $0xbf8] sm:$0xff] }
 0x181   : > { %5095 = vmatpush.bf16.msrb.mxu3 %v7974_v26  ;;  %v1419_v26 = vld [vmem:[#allocation1] sm:$0xff] }
 0x182   : > { %5057 = vmatpush.bf16.msrb.mxu0 %v7949_v27  ;;  %v1421_v27 = vld [vmem:[#allocation1 + $0x12] sm:$0xff] }
 0x183   : > { %5070 = vmatpush.bf16.msrb.mxu1 %v7957_v28  ;;  %v1420_v28 = vld [vmem:[#allocation1 + $0x9] sm:$0xff] }
 0x184   : > { %5083 = vmatpush.bf16.msrb.mxu2 %v7965_v29  ;;  %v1422_v29 = vld [vmem:[#allocation1 + $0x1b] sm:$0xff] }
 0x185   : > { %5096 = vmatpush.bf16.msrb.mxu3 %v7973_v30  ;;  %v8018_v30 = vld [vmem:[%s8661_s15 + $0xb30] sm:$0xff] }
 0x186   : > { %5058 = vmatpush.bf16.msrb.mxu0 %v7948_v38  ;;  %v4852_v54 = vpop.f32.mrf.mxu0 }
 0x187   : > { %5071 = vmatpush.bf16.msrb.mxu1 %v7956_v39  ;;  %v4853_v55 = vadd.f32 %v4852_v54, %v9011_v21  ;;  %v4865_v58 = vpop.f32.mrf.mxu1  ;;  %v8004_v21 = vld [vmem:[%s8661_s15 + $0xac0] sm:$0xff] }
 0x188   : > { %5084 = vmatpush.bf16.msrb.mxu2 %v7964_v40  ;;  %v8016_v40 = vld [vmem:[%s8661_s15 + $0xb20] sm:$0xff] }
 0x189   : > { %5097 = vmatpush.bf16.msrb.mxu3 %v7972_v41  ;;  %5059 = vmatmul.bf16.vlgmr.msrb.gmra.mxu0 %v1413_v31  ;;  %v4866_v61 = vadd.f32 %v4865_v58, %v4853_v55  ;;  %v8026_v31 = vld [vmem:[%s8661_s15 + $0xb70] sm:$0xff]  ;;  %v8024_v41 = vld [vmem:[%s8661_s15 + $0xb60] sm:$0xff] }
 0x18a   : > { %5103 = vmatpush.bf16.msra.mxu0 %v7987_v42  ;;  %5072 = vmatmul.bf16.vlgmr.msrb.gmra.mxu1 %v1414_v34  ;;  %v8017_v34 = vld [vmem:[%s8661_s15 + $0xb28] sm:$0xff]  ;;  %v8014_v55 = vld [vmem:[%s8661_s15 + $0xb10] sm:$0xff] }
 0x18b   : > { %5116 = vmatpush.bf16.msra.mxu1 %v7995_v43  ;;  %5085 = vmatmul.bf16.vlgmr.msrb.gmra.mxu2 %v1415_v32  ;;  %v8034_v32 = vld [vmem:[%s8661_s15 + $0xbb0] sm:$0xff]  ;;  %v8032_v43 = vld [vmem:[%s8661_s15 + $0xba0] sm:$0xff] }
 0x18c   : > { %5129 = vmatpush.bf16.msra.mxu2 %v8003_v44  ;;  %5098 = vmatmul.bf16.vlgmr.msrb.gmra.mxu3 %v1416_v35  ;;  %v8025_v35 = vld [vmem:[%s8661_s15 + $0xb68] sm:$0xff]  ;;  %v8040_v44 = vld [vmem:[%s8661_s15 + $0xbe0] sm:$0xff]  ;;  %v8030_v58 = vld [vmem:[%s8661_s15 + $0xb90] sm:$0xff] }
 0x18d   : > { %5142 = vmatpush.bf16.msra.mxu3 %v8011_v45 }
 0x18e   : > { %5104 = vmatpush.bf16.msra.mxu0 %v7986_v46  ;;  %v4878_v2 = vpop.f32.mrf.mxu2  ;;  %v4854_v5 = vpop.f32.mrf.mxu0  ;;  %v8015_v46 = vld [vmem:[%s8661_s15 + $0xb18] sm:$0xff] }
 0x18f   : > { %5117 = vmatpush.bf16.msra.mxu1 %v7994_v47  ;;  %v4879_v3 = vadd.f32 %v4878_v2, %v4866_v61  ;;  %v4891_v4 = vpop.f32.mrf.mxu3  ;;  %v4867_v9 = vpop.f32.mrf.mxu1  ;;  %v8023_v47 = vld [vmem:[%s8661_s15 + $0xb58] sm:$0xff]  ;;  %v8021_v61 = vld [vmem:[%s8661_s15 + $0xb48] sm:$0xff] }
 0x190   : > { %5130 = vmatpush.bf16.msra.mxu2 %v8002_v48  ;;  %v8031_v48 = vld [vmem:[%s8661_s15 + $0xb98] sm:$0xff]  ;;  %v8028_v9 = vld [vmem:[%s8661_s15 + $0xb80] sm:$0xff] }
 0x191   : > { %5143 = vmatpush.bf16.msra.mxu3 %v8010_v49  ;;  %v4892_v6 = vadd.f32 %v4891_v4, %v4879_v3  ;;  %v8039_v49 = vld [vmem:[%s8661_s15 + $0xbd8] sm:$0xff]  ;;  %v1424_v3 = vld [vmem:[#allocation1 + $0x2d] sm:$0xff] }
 0x192   : > { %5105 = vmatpush.bf16.msra.mxu0 %v7985_v50  ;;  %v1426_v4 = vld [vmem:[#allocation1 + $0x3f] sm:$0xff] }
 0x193   : > { %5118 = vmatpush.bf16.msra.mxu1 %v7993_v51 }
 0x194   : > { %5131 = vmatpush.bf16.msra.mxu2 %v8001_v52 }
 0x195   : > { %5144 = vmatpush.bf16.msra.mxu3 %v8009_v53 }
 0x196   : > { %5106 = vmatpush.bf16.msra.mxu0 %v7984_v56  ;;  %v4880_v16 = vpop.f32.mrf.mxu2  ;;  %v8022_v56 = vld [vmem:[%s8661_s15 + $0xb50] sm:$0xff] }
 0x197   : > { %5119 = vmatpush.bf16.msra.mxu1 %v7992_v57  ;;  %v4893_v17 = vpop.f32.mrf.mxu3  ;;  %v8058_v16 = vld [vmem:[%s8661_s15 + $0xc70] sm:$0xff] }
 0x198   : > { %5132 = vmatpush.bf16.msra.mxu2 %v8000_v59  ;;  %v8038_v59 = vld [vmem:[%s8661_s15 + $0xbd0] sm:$0xff] }
 0x199   : > { %5145 = vmatpush.bf16.msra.mxu3 %v8008_v60  ;;  %v8013_v60 = vld [vmem:[%s8661_s15 + $0xb08] sm:$0xff]  ;;  %v8066_v17 = vld [vmem:[%s8661_s15 + $0xcb0] sm:$0xff] }
 0x19a   : > { %5107 = vmatpush.bf16.msra.mxu0 %v7983_v62  ;;  %v8029_v62 = vld [vmem:[%s8661_s15 + $0xb88] sm:$0xff] }
 0x19b   : > { %5120 = vmatpush.bf16.msra.mxu1 %v7991_v63  ;;  %v8037_v63 = vld [vmem:[%s8661_s15 + $0xbc8] sm:$0xff] }
 0x19c   : > { %5133 = vmatpush.bf16.msra.mxu2 %v7999_v0  ;;  %v1423_v0 = vld [vmem:[#allocation1 + $0x24] sm:$0xff] }
 0x19d   : > { %5146 = vmatpush.bf16.msra.mxu3 %v8007_v1  ;;  %v1425_v1 = vld [vmem:[#allocation1 + $0x36] sm:$0xff] }
 0x19e   : > { %5108 = vmatpush.bf16.msra.mxu0 %v7982_v7  ;;  %v8012_v7 = vld [vmem:[%s8661_s15 + $0xb00] sm:$0xff] }
 0x19f   : > { %5121 = vmatpush.bf16.msra.mxu1 %v7990_v8  ;;  %v8020_v8 = vld [vmem:[%s8661_s15 + $0xb40] sm:$0xff] }
 0x1a0   : > { %5134 = vmatpush.bf16.msra.mxu2 %v7998_v10  ;;  %v8036_v10 = vld [vmem:[%s8661_s15 + $0xbc0] sm:$0xff] }
 0x1a1   : > { %5147 = vmatpush.bf16.msra.mxu3 %v8006_v11  ;;  %v8051_v11 = vld [vmem:[%s8661_s15 + $0xc38] sm:$0xff] }
 0x1a2   : > { %5109 = vmatpush.bf16.msra.mxu0 %v7981_v12  ;;  %v8059_v12 = vld [vmem:[%s8661_s15 + $0xc78] sm:$0xff] }
 0x1a3   : > { %5122 = vmatpush.bf16.msra.mxu1 %v7989_v13  ;;  %v8067_v13 = vld [vmem:[%s8661_s15 + $0xcb8] sm:$0xff] }
 0x1a4   : > { %5135 = vmatpush.bf16.msra.mxu2 %v7997_v14  ;;  %v8075_v14 = vld [vmem:[%s8661_s15 + $0xcf8] sm:$0xff] }
 0x1a5   : > { %5148 = vmatpush.bf16.msra.mxu3 %v8005_v15  ;;  %v8050_v15 = vld [vmem:[%s8661_s15 + $0xc30] sm:$0xff] }
 0x1a6   : > { %5110 = vmatpush.bf16.msra.mxu0 %v7980_v18  ;;  %v4904_v38 = vpop.f32.mrf.mxu0  ;;  %v8074_v18 = vld [vmem:[%s8661_s15 + $0xcf0] sm:$0xff] }
 0x1a7   : > { %5123 = vmatpush.bf16.msra.mxu1 %v7988_v19  ;;  %v4905_v39 = vadd.f32 %v4904_v38, %v4892_v6  ;;  %v4917_v42 = vpop.f32.mrf.mxu1  ;;  %v341_v6 = vld [vmem:[%s8682_s10 + $0x30] sm:$0xff] }
 0x1a8   : > { %5136 = vmatpush.bf16.msra.mxu2 %v7996_v20  ;;  %1428 = vst [vmem:[#allocation1] ss:$9 sm:$0xff] %v341_v6  ;;  %v8049_v19 = vld [vmem:[%s8661_s15 + $0xc28] sm:$0xff] }
 0x1a9   : > { %5149 = vmatpush.bf16.msra.mxu3 %v8004_v21  ;;  %5111 = vmatmul.bf16.vlgmr.msra.gmra.mxu0 %v1419_v26  ;;  %v4918_v45 = vadd.f32 %v4917_v42, %v4905_v39  ;;  %v8057_v20 = vld [vmem:[%s8661_s15 + $0xc68] sm:$0xff]  ;;  %v8056_v26 = vld [vmem:[%s8661_s15 + $0xc60] sm:$0xff] }
 0x1aa   : > { %5155 = vmatpush.bf16.msrb.mxu0 %v8019_v22  ;;  %5124 = vmatmul.bf16.vlgmr.msra.gmra.mxu1 %v1420_v28  ;;  %v8065_v21 = vld [vmem:[%s8661_s15 + $0xca8] sm:$0xff]  ;;  %v8064_v28 = vld [vmem:[%s8661_s15 + $0xca0] sm:$0xff] }
 0x1ab   : > { %5168 = vmatpush.bf16.msrb.mxu1 %v8027_v23  ;;  %5137 = vmatmul.bf16.vlgmr.msra.gmra.mxu2 %v1421_v27  ;;  %v8073_v22 = vld [vmem:[%s8661_s15 + $0xce8] sm:$0xff] }
 0x1ac   : > { %5181 = vmatpush.bf16.msrb.mxu2 %v8035_v24  ;;  %5150 = vmatmul.bf16.vlgmr.msra.gmra.mxu3 %v1422_v29  ;;  %v8072_v29 = vld [vmem:[%s8661_s15 + $0xce0] sm:$0xff]  ;;  %v8105_v6 = vld [vmem:[%s8661_s15 + $0xde8] sm:$0xff] }
 0x1ad   : > { %5194 = vmatpush.bf16.msrb.mxu3 %v8043_v25  ;;  %v8048_v25 = vld [vmem:[%s8661_s15 + $0xc20] sm:$0xff] }
 0x1ae   : > { %5156 = vmatpush.bf16.msrb.mxu0 %v8018_v30  ;;  %v4930_v50 = vpop.f32.mrf.mxu2  ;;  %v4906_v53 = vpop.f32.mrf.mxu0 }
 0x1af   : > { %5169 = vmatpush.bf16.msrb.mxu1 %v8026_v31  ;;  %v4931_v51 = vadd.f32 %v4930_v50, %v4918_v45  ;;  %v4943_v52 = vpop.f32.mrf.mxu3  ;;  %v4919_v57 = vpop.f32.mrf.mxu1  ;;  %v8047_v31 = vld [vmem:[%s8661_s15 + $0xc18] sm:$0xff]  ;;  %v8045_v45 = vld [vmem:[%s8661_s15 + $0xc08] sm:$0xff]  ;;  %v8060_v53 = vld [vmem:[%s8661_s15 + $0xc80] sm:$0xff] }
 0x1b0   : > { %5182 = vmatpush.bf16.msrb.mxu2 %v8034_v32  ;;  %v8055_v32 = vld [vmem:[%s8661_s15 + $0xc58] sm:$0xff] }
 0x1b1   : > { %5195 = vmatpush.bf16.msrb.mxu3 %v8042_v33  ;;  %v9079_v54 = vadd.f32 %v4943_v52, %v4931_v51  ;;  %v8063_v33 = vld [vmem:[%s8661_s15 + $0xc98] sm:$0xff]  ;;  %v8044_v51 = vld [vmem:[%s8661_s15 + $0xc00] sm:$0xff] }
 0x1b2   : > { %5157 = vmatpush.bf16.msrb.mxu0 %v8017_v34  ;;  %v8071_v34 = vld [vmem:[%s8661_s15 + $0xcd8] sm:$0xff]  ;;  %v8052_v52 = vld [vmem:[%s8661_s15 + $0xc40] sm:$0xff] }
 0x1b3   : > { %5170 = vmatpush.bf16.msrb.mxu1 %v8025_v35  ;;  %v8099_v57 = vld [vmem:[%s8661_s15 + $0xdb8] sm:$0xff] }
 0x1b4   : > { %5183 = vmatpush.bf16.msrb.mxu2 %v8033_v36 }
 0x1b5   : > { %5196 = vmatpush.bf16.msrb.mxu3 %v8041_v37 }
 0x1b6   : > { %5158 = vmatpush.bf16.msrb.mxu0 %v8016_v40  ;;  %v4932_v2 = vpop.f32.mrf.mxu2  ;;  %v8046_v40 = vld [vmem:[%s8661_s15 + $0xc10] sm:$0xff] }
 0x1b7   : > { %5171 = vmatpush.bf16.msrb.mxu1 %v8024_v41  ;;  %v4945_v5 = vpop.f32.mrf.mxu3  ;;  %v8054_v41 = vld [vmem:[%s8661_s15 + $0xc50] sm:$0xff] }
 0x1b8   : > { %5184 = vmatpush.bf16.msrb.mxu2 %v8032_v43  ;;  %v8062_v43 = vld [vmem:[%s8661_s15 + $0xc90] sm:$0xff]  ;;  %v8097_v5 = vld [vmem:[%s8661_s15 + $0xda8] sm:$0xff] }
 0x1b9   : > { %5197 = vmatpush.bf16.msrb.mxu3 %v8040_v44  ;;  %v8070_v44 = vld [vmem:[%s8661_s15 + $0xcd0] sm:$0xff] }
 0x1ba   : > { %5159 = vmatpush.bf16.msrb.mxu0 %v8015_v46  ;;  %v8053_v46 = vld [vmem:[%s8661_s15 + $0xc48] sm:$0xff]  ;;  %v8106_v2 = vld [vmem:[%s8661_s15 + $0xdf0] sm:$0xff] }
 0x1bb   : > { %5172 = vmatpush.bf16.msrb.mxu1 %v8023_v47  ;;  %v8061_v47 = vld [vmem:[%s8661_s15 + $0xc88] sm:$0xff] }
 0x1bc   : > { %5185 = vmatpush.bf16.msrb.mxu2 %v8031_v48  ;;  %v8069_v48 = vld [vmem:[%s8661_s15 + $0xcc8] sm:$0xff] }
 0x1bd   : > { %5198 = vmatpush.bf16.msrb.mxu3 %v8039_v49 }
 0x1be   : > { %5160 = vmatpush.bf16.msrb.mxu0 %v8014_v55  ;;  %v8083_v55 = vld [vmem:[%s8661_s15 + $0xd38] sm:$0xff] }
 0x1bf   : > { %5173 = vmatpush.bf16.msrb.mxu1 %v8022_v56  ;;  %v8091_v56 = vld [vmem:[%s8661_s15 + $0xd78] sm:$0xff] }
 0x1c0   : > { %5186 = vmatpush.bf16.msrb.mxu2 %v8030_v58  ;;  %v8107_v58 = vld [vmem:[%s8661_s15 + $0xdf8] sm:$0xff] }
 0x1c1   : > { %5199 = vmatpush.bf16.msrb.mxu3 %v8038_v59  ;;  %v1429_v59 = vld [vmem:[#allocation1] sm:$0xff] }
 0x1c2   : > { %5161 = vmatpush.bf16.msrb.mxu0 %v8013_v60  ;;  %v1431_v60 = vld [vmem:[#allocation1 + $0x12] sm:$0xff] }
 0x1c3   : > { %5174 = vmatpush.bf16.msrb.mxu1 %v8021_v61  ;;  %v1430_v61 = vld [vmem:[#allocation1 + $0x9] sm:$0xff] }
 0x1c4   : > { %5187 = vmatpush.bf16.msrb.mxu2 %v8029_v62  ;;  %v1432_v62 = vld [vmem:[#allocation1 + $0x1b] sm:$0xff] }
 0x1c5   : > { %5200 = vmatpush.bf16.msrb.mxu3 %v8037_v63  ;;  %v8082_v63 = vld [vmem:[%s8661_s15 + $0xd30] sm:$0xff] }
 0x1c6   : > { %5162 = vmatpush.bf16.msrb.mxu0 %v8012_v7  ;;  %v4956_v23 = vpop.f32.mrf.mxu0 }
 0x1c7   : > { %5175 = vmatpush.bf16.msrb.mxu1 %v8020_v8  ;;  %v4957_v24 = vadd.f32 %v4956_v23, %v9079_v54  ;;  %v4969_v27 = vpop.f32.mrf.mxu1  ;;  %v8068_v54 = vld [vmem:[%s8661_s15 + $0xcc0] sm:$0xff] }
 0x1c8   : > { %5188 = vmatpush.bf16.msrb.mxu2 %v8028_v9  ;;  %v8080_v9 = vld [vmem:[%s8661_s15 + $0xd20] sm:$0xff] }
 0x1c9   : > { %5201 = vmatpush.bf16.msrb.mxu3 %v8036_v10  ;;  %5163 = vmatmul.bf16.vlgmr.msrb.gmra.mxu0 %v1423_v0  ;;  %v4970_v30 = vadd.f32 %v4969_v27, %v4957_v24  ;;  %v8090_v0 = vld [vmem:[%s8661_s15 + $0xd70] sm:$0xff]  ;;  %v8088_v10 = vld [vmem:[%s8661_s15 + $0xd60] sm:$0xff] }
 0x1ca   : > { %5207 = vmatpush.bf16.msra.mxu0 %v8051_v11  ;;  %5176 = vmatmul.bf16.vlgmr.msrb.gmra.mxu1 %v1424_v3  ;;  %v8081_v3 = vld [vmem:[%s8661_s15 + $0xd28] sm:$0xff]  ;;  %v8078_v24 = vld [vmem:[%s8661_s15 + $0xd10] sm:$0xff] }
 0x1cb   : > { %5220 = vmatpush.bf16.msra.mxu1 %v8059_v12  ;;  %5189 = vmatmul.bf16.vlgmr.msrb.gmra.mxu2 %v1425_v1  ;;  %v8098_v1 = vld [vmem:[%s8661_s15 + $0xdb0] sm:$0xff]  ;;  %v8096_v12 = vld [vmem:[%s8661_s15 + $0xda0] sm:$0xff] }
 0x1cc   : > { %5233 = vmatpush.bf16.msra.mxu2 %v8067_v13  ;;  %5202 = vmatmul.bf16.vlgmr.msrb.gmra.mxu3 %v1426_v4  ;;  %v8089_v4 = vld [vmem:[%s8661_s15 + $0xd68] sm:$0xff]  ;;  %v8104_v13 = vld [vmem:[%s8661_s15 + $0xde0] sm:$0xff]  ;;  %v8094_v27 = vld [vmem:[%s8661_s15 + $0xd90] sm:$0xff] }
 0x1cd   : > { %5246 = vmatpush.bf16.msra.mxu3 %v8075_v14 }
 0x1ce   : > { %5208 = vmatpush.bf16.msra.mxu0 %v8050_v15  ;;  %v4982_v35 = vpop.f32.mrf.mxu2  ;;  %v4958_v38 = vpop.f32.mrf.mxu0  ;;  %v8079_v15 = vld [vmem:[%s8661_s15 + $0xd18] sm:$0xff] }
 0x1cf   : > { %5221 = vmatpush.bf16.msra.mxu1 %v8058_v16  ;;  %v4983_v36 = vadd.f32 %v4982_v35, %v4970_v30  ;;  %v4995_v37 = vpop.f32.mrf.mxu3  ;;  %v4971_v42 = vpop.f32.mrf.mxu1  ;;  %v8087_v16 = vld [vmem:[%s8661_s15 + $0xd58] sm:$0xff]  ;;  %v8085_v30 = vld [vmem:[%s8661_s15 + $0xd48] sm:$0xff] }
 0x1d0   : > { %5234 = vmatpush.bf16.msra.mxu2 %v8066_v17  ;;  %v8095_v17 = vld [vmem:[%s8661_s15 + $0xd98] sm:$0xff]  ;;  %v8092_v42 = vld [vmem:[%s8661_s15 + $0xd80] sm:$0xff] }
 0x1d1   : > { %5247 = vmatpush.bf16.msra.mxu3 %v8074_v18  ;;  %v4996_v39 = vadd.f32 %v4995_v37, %v4983_v36  ;;  %v8103_v18 = vld [vmem:[%s8661_s15 + $0xdd8] sm:$0xff]  ;;  %v1434_v36 = vld [vmem:[#allocation1 + $0x2d] sm:$0xff] }
 0x1d2   : > { %5209 = vmatpush.bf16.msra.mxu0 %v8049_v19  ;;  %v1436_v37 = vld [vmem:[#allocation1 + $0x3f] sm:$0xff] }
 0x1d3   : > { %5222 = vmatpush.bf16.msra.mxu1 %v8057_v20 }
 0x1d4   : > { %5235 = vmatpush.bf16.msra.mxu2 %v8065_v21 }
 0x1d5   : > { %5248 = vmatpush.bf16.msra.mxu3 %v8073_v22 }
 0x1d6   : > { %5210 = vmatpush.bf16.msra.mxu0 %v8048_v25  ;;  %v4984_v49 = vpop.f32.mrf.mxu2  ;;  %v8086_v25 = vld [vmem:[%s8661_s15 + $0xd50] sm:$0xff] }
 0x1d7   : > { %5223 = vmatpush.bf16.msra.mxu1 %v8056_v26  ;;  %v4997_v50 = vpop.f32.mrf.mxu3  ;;  %v8122_v49 = vld [vmem:[%s8661_s15 + $0xe70] sm:$0xff] }
 0x1d8   : > { %5236 = vmatpush.bf16.msra.mxu2 %v8064_v28  ;;  %v8102_v28 = vld [vmem:[%s8661_s15 + $0xdd0] sm:$0xff] }
 0x1d9   : > { %5249 = vmatpush.bf16.msra.mxu3 %v8072_v29  ;;  %v8077_v29 = vld [vmem:[%s8661_s15 + $0xd08] sm:$0xff]  ;;  %v8130_v50 = vld [vmem:[%s8661_s15 + $0xeb0] sm:$0xff] }
 0x1da   : > { %5211 = vmatpush.bf16.msra.mxu0 %v8047_v31  ;;  %v8093_v31 = vld [vmem:[%s8661_s15 + $0xd88] sm:$0xff] }
 0x1db   : > { %5224 = vmatpush.bf16.msra.mxu1 %v8055_v32  ;;  %v8101_v32 = vld [vmem:[%s8661_s15 + $0xdc8] sm:$0xff] }
 0x1dc   : > { %5237 = vmatpush.bf16.msra.mxu2 %v8063_v33  ;;  %v1433_v33 = vld [vmem:[#allocation1 + $0x24] sm:$0xff] }
 0x1dd   : > { %5250 = vmatpush.bf16.msra.mxu3 %v8071_v34  ;;  %v1435_v34 = vld [vmem:[#allocation1 + $0x36] sm:$0xff] }
 0x1de   : > { %5212 = vmatpush.bf16.msra.mxu0 %v8046_v40  ;;  %v8076_v40 = vld [vmem:[%s8661_s15 + $0xd00] sm:$0xff] }
 0x1df   : > { %5225 = vmatpush.bf16.msra.mxu1 %v8054_v41  ;;  %v8084_v41 = vld [vmem:[%s8661_s15 + $0xd40] sm:$0xff] }
 0x1e0   : > { %5238 = vmatpush.bf16.msra.mxu2 %v8062_v43  ;;  %v8100_v43 = vld [vmem:[%s8661_s15 + $0xdc0] sm:$0xff] }
 0x1e1   : > { %5251 = vmatpush.bf16.msra.mxu3 %v8070_v44  ;;  %v8115_v44 = vld [vmem:[%s8661_s15 + $0xe38] sm:$0xff] }
 0x1e2   : > { %5213 = vmatpush.bf16.msra.mxu0 %v8045_v45  ;;  %v8123_v45 = vld [vmem:[%s8661_s15 + $0xe78] sm:$0xff] }
 0x1e3   : > { %5226 = vmatpush.bf16.msra.mxu1 %v8053_v46  ;;  %v8131_v46 = vld [vmem:[%s8661_s15 + $0xeb8] sm:$0xff] }
 0x1e4   : > { %5239 = vmatpush.bf16.msra.mxu2 %v8061_v47  ;;  %v8139_v47 = vld [vmem:[%s8661_s15 + $0xef8] sm:$0xff] }
 0x1e5   : > { %5252 = vmatpush.bf16.msra.mxu3 %v8069_v48  ;;  %v8114_v48 = vld [vmem:[%s8661_s15 + $0xe30] sm:$0xff] }
 0x1e6   : > { %5214 = vmatpush.bf16.msra.mxu0 %v8044_v51  ;;  %v5008_v7 = vpop.f32.mrf.mxu0  ;;  %v8138_v51 = vld [vmem:[%s8661_s15 + $0xef0] sm:$0xff] }
 0x1e7   : > { %5227 = vmatpush.bf16.msra.mxu1 %v8052_v52  ;;  %v5009_v8 = vadd.f32 %v5008_v7, %v4996_v39  ;;  %v5021_v11 = vpop.f32.mrf.mxu1  ;;  %v342_v39 = vld [vmem:[%s8682_s10 + $0x38] sm:$0xff] }
 0x1e8   : > { %5240 = vmatpush.bf16.msra.mxu2 %v8060_v53  ;;  %1438 = vst [vmem:[#allocation1] ss:$9 sm:$0xff] %v342_v39  ;;  %v8113_v52 = vld [vmem:[%s8661_s15 + $0xe28] sm:$0xff] }
 0x1e9   : > { %5253 = vmatpush.bf16.msra.mxu3 %v8068_v54  ;;  %5215 = vmatmul.bf16.vlgmr.msra.gmra.mxu0 %v1429_v59  ;;  %v5022_v14 = vadd.f32 %v5021_v11, %v5009_v8  ;;  %v8121_v53 = vld [vmem:[%s8661_s15 + $0xe68] sm:$0xff]  ;;  %v8120_v59 = vld [vmem:[%s8661_s15 + $0xe60] sm:$0xff] }
 0x1ea   : > { %5259 = vmatpush.bf16.msrb.mxu0 %v8083_v55  ;;  %5228 = vmatmul.bf16.vlgmr.msra.gmra.mxu1 %v1430_v61  ;;  %v8129_v54 = vld [vmem:[%s8661_s15 + $0xea8] sm:$0xff]  ;;  %v8128_v61 = vld [vmem:[%s8661_s15 + $0xea0] sm:$0xff] }
 0x1eb   : > { %5272 = vmatpush.bf16.msrb.mxu1 %v8091_v56  ;;  %5241 = vmatmul.bf16.vlgmr.msra.gmra.mxu2 %v1431_v60  ;;  %v8137_v55 = vld [vmem:[%s8661_s15 + $0xee8] sm:$0xff] }
 0x1ec   : > { %5285 = vmatpush.bf16.msrb.mxu2 %v8099_v57  ;;  %5254 = vmatmul.bf16.vlgmr.msra.gmra.mxu3 %v1432_v62  ;;  %v8136_v62 = vld [vmem:[%s8661_s15 + $0xee0] sm:$0xff]  ;;  %v8169_v39 = vld [vmem:[%s8661_s15 + $0xfe8] sm:$0xff] }
 0x1ed   : > { %5298 = vmatpush.bf16.msrb.mxu3 %v8107_v58  ;;  %v8112_v58 = vld [vmem:[%s8661_s15 + $0xe20] sm:$0xff] }
 0x1ee   : > { %5260 = vmatpush.bf16.msrb.mxu0 %v8082_v63  ;;  %v5034_v19 = vpop.f32.mrf.mxu2  ;;  %v5010_v22 = vpop.f32.mrf.mxu0 }
 0x1ef   : > { %5273 = vmatpush.bf16.msrb.mxu1 %v8090_v0  ;;  %v5035_v20 = vadd.f32 %v5034_v19, %v5022_v14  ;;  %v5047_v21 = vpop.f32.mrf.mxu3  ;;  %v5023_v26 = vpop.f32.mrf.mxu1  ;;  %v8111_v0 = vld [vmem:[%s8661_s15 + $0xe18] sm:$0xff]  ;;  %v8109_v14 = vld [vmem:[%s8661_s15 + $0xe08] sm:$0xff]  ;;  %v8124_v22 = vld [vmem:[%s8661_s15 + $0xe80] sm:$0xff] }
 0x1f0   : > { %5286 = vmatpush.bf16.msrb.mxu2 %v8098_v1  ;;  %v8119_v1 = vld [vmem:[%s8661_s15 + $0xe58] sm:$0xff] }
 0x1f1   : > { %5299 = vmatpush.bf16.msrb.mxu3 %v8106_v2  ;;  %v9147_v23 = vadd.f32 %v5047_v21, %v5035_v20  ;;  %v8127_v2 = vld [vmem:[%s8661_s15 + $0xe98] sm:$0xff]  ;;  %v8108_v20 = vld [vmem:[%s8661_s15 + $0xe00] sm:$0xff] }
 0x1f2   : > { %5261 = vmatpush.bf16.msrb.mxu0 %v8081_v3  ;;  %v8135_v3 = vld [vmem:[%s8661_s15 + $0xed8] sm:$0xff]  ;;  %v8116_v21 = vld [vmem:[%s8661_s15 + $0xe40] sm:$0xff] }
 0x1f3   : > { %5274 = vmatpush.bf16.msrb.mxu1 %v8089_v4  ;;  %v8163_v26 = vld [vmem:[%s8661_s15 + $0xfb8] sm:$0xff] }
 0x1f4   : > { %5287 = vmatpush.bf16.msrb.mxu2 %v8097_v5 }
 0x1f5   : > { %5300 = vmatpush.bf16.msrb.mxu3 %v8105_v6 }
 0x1f6   : > { %5262 = vmatpush.bf16.msrb.mxu0 %v8080_v9  ;;  %v5036_v35 = vpop.f32.mrf.mxu2  ;;  %v8110_v9 = vld [vmem:[%s8661_s15 + $0xe10] sm:$0xff] }
 0x1f7   : > { %5275 = vmatpush.bf16.msrb.mxu1 %v8088_v10  ;;  %v5049_v38 = vpop.f32.mrf.mxu3  ;;  %v8118_v10 = vld [vmem:[%s8661_s15 + $0xe50] sm:$0xff] }
 0x1f8   : > { %5288 = vmatpush.bf16.msrb.mxu2 %v8096_v12  ;;  %v8126_v12 = vld [vmem:[%s8661_s15 + $0xe90] sm:$0xff]  ;;  %v8161_v38 = vld [vmem:[%s8661_s15 + $0xfa8] sm:$0xff] }
 0x1f9   : > { %5301 = vmatpush.bf16.msrb.mxu3 %v8104_v13  ;;  %v8134_v13 = vld [vmem:[%s8661_s15 + $0xed0] sm:$0xff] }
 0x1fa   : > { %5263 = vmatpush.bf16.msrb.mxu0 %v8079_v15  ;;  %v8117_v15 = vld [vmem:[%s8661_s15 + $0xe48] sm:$0xff]  ;;  %v8170_v35 = vld [vmem:[%s8661_s15 + $0xff0] sm:$0xff] }
 0x1fb   : > { %5276 = vmatpush.bf16.msrb.mxu1 %v8087_v16  ;;  %v8125_v16 = vld [vmem:[%s8661_s15 + $0xe88] sm:$0xff] }
 0x1fc   : > { %5289 = vmatpush.bf16.msrb.mxu2 %v8095_v17  ;;  %v8133_v17 = vld [vmem:[%s8661_s15 + $0xec8] sm:$0xff] }
 0x1fd   : > { %5302 = vmatpush.bf16.msrb.mxu3 %v8103_v18 }
 0x1fe   : > { %5264 = vmatpush.bf16.msrb.mxu0 %v8078_v24  ;;  %v8147_v24 = vld [vmem:[%s8661_s15 + $0xf38] sm:$0xff] }
 0x1ff   : > { %5277 = vmatpush.bf16.msrb.mxu1 %v8086_v25  ;;  %v8155_v25 = vld [vmem:[%s8661_s15 + $0xf78] sm:$0xff] }
 0x200   : > { %5290 = vmatpush.bf16.msrb.mxu2 %v8094_v27  ;;  %v8171_v27 = vld [vmem:[%s8661_s15 + $0xff8] sm:$0xff] }
 0x201   : > { %5303 = vmatpush.bf16.msrb.mxu3 %v8102_v28  ;;  %v1439_v28 = vld [vmem:[#allocation1] sm:$0xff] }
 0x202   : > { %5265 = vmatpush.bf16.msrb.mxu0 %v8077_v29  ;;  %v1441_v29 = vld [vmem:[#allocation1 + $0x12] sm:$0xff] }
 0x203   : > { %5278 = vmatpush.bf16.msrb.mxu1 %v8085_v30  ;;  %v1440_v30 = vld [vmem:[#allocation1 + $0x9] sm:$0xff] }
 0x204   : > { %5291 = vmatpush.bf16.msrb.mxu2 %v8093_v31  ;;  %v1442_v31 = vld [vmem:[#allocation1 + $0x1b] sm:$0xff] }
 0x205   : > { %5304 = vmatpush.bf16.msrb.mxu3 %v8101_v32  ;;  %v8146_v32 = vld [vmem:[%s8661_s15 + $0xf30] sm:$0xff] }
 0x206   : > { %5266 = vmatpush.bf16.msrb.mxu0 %v8076_v40  ;;  %v5060_v56 = vpop.f32.mrf.mxu0 }
 0x207   : > { %5279 = vmatpush.bf16.msrb.mxu1 %v8084_v41  ;;  %v5061_v57 = vadd.f32 %v5060_v56, %v9147_v23  ;;  %v5073_v60 = vpop.f32.mrf.mxu1  ;;  %v8132_v23 = vld [vmem:[%s8661_s15 + $0xec0] sm:$0xff] }
 0x208   : > { %5292 = vmatpush.bf16.msrb.mxu2 %v8092_v42  ;;  %v8144_v42 = vld [vmem:[%s8661_s15 + $0xf20] sm:$0xff] }
 0x209   : > { %5305 = vmatpush.bf16.msrb.mxu3 %v8100_v43  ;;  %5267 = vmatmul.bf16.vlgmr.msrb.gmra.mxu0 %v1433_v33  ;;  %v5074_v63 = vadd.f32 %v5073_v60, %v5061_v57  ;;  %v8154_v33 = vld [vmem:[%s8661_s15 + $0xf70] sm:$0xff]  ;;  %v8152_v43 = vld [vmem:[%s8661_s15 + $0xf60] sm:$0xff] }
 0x20a   : > { %5311 = vmatpush.bf16.msra.mxu0 %v8115_v44  ;;  %5280 = vmatmul.bf16.vlgmr.msrb.gmra.mxu1 %v1434_v36  ;;  %v8145_v36 = vld [vmem:[%s8661_s15 + $0xf28] sm:$0xff]  ;;  %v8142_v57 = vld [vmem:[%s8661_s15 + $0xf10] sm:$0xff] }
 0x20b   : > { %5324 = vmatpush.bf16.msra.mxu1 %v8123_v45  ;;  %5293 = vmatmul.bf16.vlgmr.msrb.gmra.mxu2 %v1435_v34  ;;  %v8162_v34 = vld [vmem:[%s8661_s15 + $0xfb0] sm:$0xff]  ;;  %v8160_v45 = vld [vmem:[%s8661_s15 + $0xfa0] sm:$0xff] }
 0x20c   : > { %5337 = vmatpush.bf16.msra.mxu2 %v8131_v46  ;;  %5306 = vmatmul.bf16.vlgmr.msrb.gmra.mxu3 %v1436_v37  ;;  %v8153_v37 = vld [vmem:[%s8661_s15 + $0xf68] sm:$0xff]  ;;  %v8168_v46 = vld [vmem:[%s8661_s15 + $0xfe0] sm:$0xff]  ;;  %v8158_v60 = vld [vmem:[%s8661_s15 + $0xf90] sm:$0xff] }
 0x20d   : > { %5350 = vmatpush.bf16.msra.mxu3 %v8139_v47 }
 0x20e   : > { %5312 = vmatpush.bf16.msra.mxu0 %v8114_v48  ;;  %v5086_v4 = vpop.f32.mrf.mxu2  ;;  %v5062_v7 = vpop.f32.mrf.mxu0  ;;  %v8143_v48 = vld [vmem:[%s8661_s15 + $0xf18] sm:$0xff] }
 0x20f   : > { %5325 = vmatpush.bf16.msra.mxu1 %v8122_v49  ;;  %v5087_v5 = vadd.f32 %v5086_v4, %v5074_v63  ;;  %v5099_v6 = vpop.f32.mrf.mxu3  ;;  %v5075_v11 = vpop.f32.mrf.mxu1  ;;  %v8151_v49 = vld [vmem:[%s8661_s15 + $0xf58] sm:$0xff]  ;;  %v8149_v63 = vld [vmem:[%s8661_s15 + $0xf48] sm:$0xff]  ;;  %v8140_v4 = vld [vmem:[%s8661_s15 + $0xf00] sm:$0xff] }
 0x210   : > { %5338 = vmatpush.bf16.msra.mxu2 %v8130_v50  ;;  %v8159_v50 = vld [vmem:[%s8661_s15 + $0xf98] sm:$0xff]  ;;  %v8164_v7 = vld [vmem:[%s8661_s15 + $0xfc0] sm:$0xff] }
 0x211   : > { %5351 = vmatpush.bf16.msra.mxu3 %v8138_v51  ;;  %v5100_v8 = vadd.f32 %v5099_v6, %v5087_v5  ;;  %v8167_v51 = vld [vmem:[%s8661_s15 + $0xfd8] sm:$0xff]  ;;  %v8148_v5 = vld [vmem:[%s8661_s15 + $0xf40] sm:$0xff] }
 0x212   : > { %5313 = vmatpush.bf16.msra.mxu0 %v8113_v52  ;;  %v8156_v6 = vld [vmem:[%s8661_s15 + $0xf80] sm:$0xff]  ;;  %v1446_v11 = vld [vmem:[#allocation1 + $0x3f] sm:$0xff] }
 0x213   : > { %5326 = vmatpush.bf16.msra.mxu1 %v8121_v53 }
 0x214   : > { %5339 = vmatpush.bf16.msra.mxu2 %v8129_v54 }
 0x215   : > { %5352 = vmatpush.bf16.msra.mxu3 %v8137_v55 }
 0x216   : > { %5314 = vmatpush.bf16.msra.mxu0 %v8112_v58  ;;  %v5088_v18 = vpop.f32.mrf.mxu2  ;;  %v8150_v58 = vld [vmem:[%s8661_s15 + $0xf50] sm:$0xff] }
 0x217   : > { %5327 = vmatpush.bf16.msra.mxu1 %v8120_v59  ;;  %v5101_v19 = vpop.f32.mrf.mxu3 }
 0x218   : > { %5340 = vmatpush.bf16.msra.mxu2 %v8128_v61  ;;  %v8166_v61 = vld [vmem:[%s8661_s15 + $0xfd0] sm:$0xff] }
 0x219   : > { %5353 = vmatpush.bf16.msra.mxu3 %v8136_v62  ;;  %v8141_v62 = vld [vmem:[%s8661_s15 + $0xf08] sm:$0xff] }
 0x21a   : > { %5315 = vmatpush.bf16.msra.mxu0 %v8111_v0  ;;  %v8157_v0 = vld [vmem:[%s8661_s15 + $0xf88] sm:$0xff] }
 0x21b   : > { %5328 = vmatpush.bf16.msra.mxu1 %v8119_v1  ;;  %v8165_v1 = vld [vmem:[%s8661_s15 + $0xfc8] sm:$0xff] }
 0x21c   : > { %5341 = vmatpush.bf16.msra.mxu2 %v8127_v2 }
 0x21d   : > { %5354 = vmatpush.bf16.msra.mxu3 %v8135_v3 }
 0x21e   : > { %5316 = vmatpush.bf16.msra.mxu0 %v8110_v9  ;;  %v1444_v9 = vld [vmem:[#allocation1 + $0x2d] sm:$0xff] }
 0x21f   : > { %5329 = vmatpush.bf16.msra.mxu1 %v8118_v10  ;;  %v1445_v10 = vld [vmem:[#allocation1 + $0x36] sm:$0xff] }
 0x220   : > { %5342 = vmatpush.bf16.msra.mxu2 %v8126_v12 }
 0x221   : > { %5355 = vmatpush.bf16.msra.mxu3 %v8134_v13 }
 0x222   : > { %5317 = vmatpush.bf16.msra.mxu0 %v8109_v14 }
 0x223   : > { %5330 = vmatpush.bf16.msra.mxu1 %v8117_v15 }
 0x224   : > { %5343 = vmatpush.bf16.msra.mxu2 %v8125_v16 }
 0x225   : > { %5356 = vmatpush.bf16.msra.mxu3 %v8133_v17 }
 0x226   : > { %5318 = vmatpush.bf16.msra.mxu0 %v8108_v20  ;;  %v5112_v40 = vpop.f32.mrf.mxu0 }
 0x227   : > { %5331 = vmatpush.bf16.msra.mxu1 %v8116_v21  ;;  %v5113_v41 = vadd.f32 %v5112_v40, %v5100_v8  ;;  %v5125_v44 = vpop.f32.mrf.mxu1  ;;  %v1443_v8 = vld [vmem:[#allocation1 + $0x24] sm:$0xff] }
 0x228   : > { %5344 = vmatpush.bf16.msra.mxu2 %v8124_v22 }
 0x229   : > { %5357 = vmatpush.bf16.msra.mxu3 %v8132_v23  ;;  %5319 = vmatmul.bf16.vlgmr.msra.gmra.mxu0 %v1439_v28  ;;  %v5126_v47 = vadd.f32 %v5125_v44, %v5113_v41 }
 0x22a   : > { %5363 = vmatpush.bf16.msrb.mxu0 %v8147_v24  ;;  %5332 = vmatmul.bf16.vlgmr.msra.gmra.mxu1 %v1440_v30 }
 0x22b   : > { %5376 = vmatpush.bf16.msrb.mxu1 %v8155_v25  ;;  %5345 = vmatmul.bf16.vlgmr.msra.gmra.mxu2 %v1441_v29 }
 0x22c   : > { %5389 = vmatpush.bf16.msrb.mxu2 %v8163_v26  ;;  %5358 = vmatmul.bf16.vlgmr.msra.gmra.mxu3 %v1442_v31 }
 0x22d   : > { %5402 = vmatpush.bf16.msrb.mxu3 %v8171_v27 }
 0x22e   : > { %5364 = vmatpush.bf16.msrb.mxu0 %v8146_v32  ;;  %v5138_v52 = vpop.f32.mrf.mxu2  ;;  %v5114_v55 = vpop.f32.mrf.mxu0 }
 0x22f   : > { %5377 = vmatpush.bf16.msrb.mxu1 %v8154_v33  ;;  %v5139_v53 = vadd.f32 %v5138_v52, %v5126_v47  ;;  %v5151_v54 = vpop.f32.mrf.mxu3  ;;  %v5127_v59 = vpop.f32.mrf.mxu1 }
 0x230   : > { %5390 = vmatpush.bf16.msrb.mxu2 %v8162_v34 }
 0x231   : > { %5403 = vmatpush.bf16.msrb.mxu3 %v8170_v35  ;;  %v5152_v56 = vadd.f32 %v5151_v54, %v5139_v53 }
 0x232   : > { %5365 = vmatpush.bf16.msrb.mxu0 %v8145_v36 }
 0x233   : > { %5378 = vmatpush.bf16.msrb.mxu1 %v8153_v37 }
 0x234   : > { %5391 = vmatpush.bf16.msrb.mxu2 %v8161_v38 }
 0x235   : > { %5404 = vmatpush.bf16.msrb.mxu3 %v8169_v39 }
 0x236   : > { %5366 = vmatpush.bf16.msrb.mxu0 %v8144_v42  ;;  %v5140_v2 = vpop.f32.mrf.mxu2 }
 0x237   : > { %5379 = vmatpush.bf16.msrb.mxu1 %v8152_v43  ;;  %v5153_v3 = vpop.f32.mrf.mxu3 }
 0x238   : > { %5392 = vmatpush.bf16.msrb.mxu2 %v8160_v45 }
 0x239   : > { %5405 = vmatpush.bf16.msrb.mxu3 %v8168_v46 }
 0x23a   : > { %5367 = vmatpush.bf16.msrb.mxu0 %v8143_v48 }
 0x23b   : > { %5380 = vmatpush.bf16.msrb.mxu1 %v8151_v49 }
 0x23c   : > { %5393 = vmatpush.bf16.msrb.mxu2 %v8159_v50 }
 0x23d   : > { %5406 = vmatpush.bf16.msrb.mxu3 %v8167_v51 }
 0x23e   : > { %5368 = vmatpush.bf16.msrb.mxu0 %v8142_v57 }
 0x23f   : > { %5381 = vmatpush.bf16.msrb.mxu1 %v8150_v58 }
 0x240   : > { %5394 = vmatpush.bf16.msrb.mxu2 %v8158_v60 }
 0x241   : > { %5407 = vmatpush.bf16.msrb.mxu3 %v8166_v61 }
 0x242   : > { %5369 = vmatpush.bf16.msrb.mxu0 %v8141_v62 }
 0x243   : > { %5382 = vmatpush.bf16.msrb.mxu1 %v8149_v63 }
 0x244   : > { %5395 = vmatpush.bf16.msrb.mxu2 %v8157_v0 }
 0x245   : > { %5408 = vmatpush.bf16.msrb.mxu3 %v8165_v1 }
 0x246   : > { %5370 = vmatpush.bf16.msrb.mxu0 %v8140_v4  ;;  %v5164_v12 = vpop.f32.mrf.mxu0 }
 0x247   : > { %5383 = vmatpush.bf16.msrb.mxu1 %v8148_v5  ;;  %v5165_v13 = vadd.f32 %v5164_v12, %v5152_v56  ;;  %v5177_v14 = vpop.f32.mrf.mxu1  ;;  %v334_v5 = vld [vmem:[#allocation2] sm:$0x3] }
 0x248   : > { %5396 = vmatpush.bf16.msrb.mxu2 %v8156_v6 }
 0x249   : > { %5409 = vmatpush.bf16.msrb.mxu3 %v8164_v7  ;;  %5371 = vmatmul.bf16.vlgmr.msrb.gmra.mxu0 %v1443_v8  ;;  %v5178_v15 = vadd.f32 %v5177_v14, %v5165_v13 }
 0x24a   : > { %5384 = vmatmul.bf16.vlgmr.msrb.gmra.mxu1 %v1444_v9 }
 0x24b   : > { %5397 = vmatmul.bf16.vlgmr.msrb.gmra.mxu2 %v1445_v10 }
 0x24c   : > { %5410 = vmatmul.bf16.vlgmr.msrb.gmra.mxu3 %v1446_v11 }
 0x24e   : > { %v5190_v16 = vpop.f32.mrf.mxu2  ;;  %v5166_v19 = vpop.f32.mrf.mxu0 }
 0x24f   : > { %v5191_v17 = vadd.f32 %v5190_v16, %v5178_v15  ;;  %v5203_v18 = vpop.f32.mrf.mxu3  ;;  %v5179_v21 = vpop.f32.mrf.mxu1 }
 0x251   : > { %v5204_v20 = vadd.f32 %v5203_v18, %v5191_v17 }
 0x256   : > { %v5192_v22 = vpop.f32.mrf.mxu2 }
 0x257   : > { %v5205_v23 = vpop.f32.mrf.mxu3 }
 0x266   : > { %v5216_v24 = vpop.f32.mrf.mxu0 }
 0x267   : > { %v5217_v25 = vadd.f32 %v5216_v24, %v5204_v20  ;;  %v5229_v26 = vpop.f32.mrf.mxu1 }
 0x269   : > { %v5230_v27 = vadd.f32 %v5229_v26, %v5217_v25 }
 0x26e   : > { %v5242_v28 = vpop.f32.mrf.mxu2  ;;  %v5218_v31 = vpop.f32.mrf.mxu0 }
 0x26f   : > { %v5243_v29 = vadd.f32 %v5242_v28, %v5230_v27  ;;  %v5255_v30 = vpop.f32.mrf.mxu3  ;;  %v5231_v33 = vpop.f32.mrf.mxu1 }
 0x271   : > { %v5256_v32 = vadd.f32 %v5255_v30, %v5243_v29 }
 0x276   : > { %v5244_v34 = vpop.f32.mrf.mxu2 }
 0x277   : > { %v5257_v35 = vpop.f32.mrf.mxu3 }
 0x286   : > { %v5268_v36 = vpop.f32.mrf.mxu0 }
 0x287   : > { %v5281_v37 = vpop.f32.mrf.mxu1  ;;  %v5269_v47 = vadd.f32 %v5268_v36, %v5256_v32 }
 0x289   : > { %v5282_v51 = vadd.f32 %v5281_v37, %v5269_v47 }
 0x28e   : > { %v5294_v38 = vpop.f32.mrf.mxu2  ;;  %v5270_v40 = vpop.f32.mrf.mxu0 }
 0x28f   : > { %v5307_v39 = vpop.f32.mrf.mxu3  ;;  %v5283_v41 = vpop.f32.mrf.mxu1  ;;  %v5295_v52 = vadd.f32 %v5294_v38, %v5282_v51 }
 0x291   : > { %v5308_v55 = vadd.f32 %v5307_v39, %v5295_v52 }
 0x296   : > { %v5296_v42 = vpop.f32.mrf.mxu2 }
 0x297   : > { %v5309_v43 = vpop.f32.mrf.mxu3 }
 0x2a6   : > { %v5320_v44 = vpop.f32.mrf.mxu0 }
 0x2a7   : > { %v5333_v45 = vpop.f32.mrf.mxu1  ;;  %v5321_v56 = vadd.f32 %v5320_v44, %v5308_v55 }
 0x2a9   : > { %v5334_v57 = vadd.f32 %v5333_v45, %v5321_v56 }
 0x2ae   : > { %v5346_v46 = vpop.f32.mrf.mxu2  ;;  %v5322_v49 = vpop.f32.mrf.mxu0 }
 0x2af   : > { %v5359_v48 = vpop.f32.mrf.mxu3  ;;  %v5335_v50 = vpop.f32.mrf.mxu1  ;;  %v5347_v58 = vadd.f32 %v5346_v46, %v5334_v57 }
 0x2b1   : > { %v5360_v59 = vadd.f32 %v5359_v48, %v5347_v58 }
 0x2b6   : > { %v5348_v53 = vpop.f32.mrf.mxu2 }
 0x2b7   : > { %v5361_v54 = vpop.f32.mrf.mxu3 }
 0x2c6   : > { %v5372_v60 = vpop.f32.mrf.mxu0 }
 0x2c7   : > { %v5385_v61 = vpop.f32.mrf.mxu1  ;;  %v5373_v62 = vadd.f32 %v5372_v60, %v5360_v59 }
 0x2c9   : > { %v5386_v63 = vadd.f32 %v5385_v61, %v5373_v62 }
 0x2ce   : > { %v5398_v0 = vpop.f32.mrf.mxu2  ;;  %v5374_v3 = vpop.f32.mrf.mxu0 }
 0x2cf   : > { %v5411_v1 = vpop.f32.mrf.mxu3  ;;  %v5399_v2 = vadd.f32 %v5398_v0, %v5386_v63  ;;  %v5387_v4 = vpop.f32.mrf.mxu1 }
 0x2d1   : > { %v5412_v6 = vadd.f32 %v5411_v1, %v5399_v2 }
 0x2d3   : > { %v5415_v7 = vadd.f32 %v5412_v6, %v334_v5  ;;  %5420 = sbr.rel (%p7655_p9) target bundleno = 887 (0x377), region = 56 }
 0x2d5   : > { %5416 = vst [vmem:[#allocation2] sm:$0x3] %v5415_v7 }
 0x2d6   : > { %v5400_v8 = vpop.f32.mrf.mxu2 }
 0x2d7   : > { %v5413_v9 = vpop.f32.mrf.mxu3 }
 0x2d8   : > { %v5442_v10 = vld [vmem:[%s8689_s14 + $0x78] sm:$0xff]  ;;  %v5441_v11 = vld [vmem:[%s8689_s14 + $0x70] sm:$0xff]  ;;  %v5440_v12 = vld [vmem:[%s8689_s14 + $0x68] sm:$0xff] }
 0x2d9   : > { %5443 = vmatpush.msra.mxu0 %v5442_v10  ;;  %v5439_v13 = vld [vmem:[%s8689_s14 + $0x60] sm:$0xff]  ;;  %v5438_v14 = vld [vmem:[%s8689_s14 + $0x58] sm:$0xff]  ;;  %v5437_v15 = vld [vmem:[%s8689_s14 + $0x50] sm:$0xff] }
 0x2da   : > { %v5436_v16 = vld [vmem:[%s8689_s14 + $0x48] sm:$0xff]  ;;  %v5435_v17 = vld [vmem:[%s8689_s14 + $0x40] sm:$0xff]  ;;  %v5434_v18 = vld [vmem:[%s8689_s14 + $0x38] sm:$0xff] }
 0x2db   : > { %5444 = vmatpush.msra.mxu0 %v5441_v11  ;;  %v5433_v19 = vld [vmem:[%s8689_s14 + $0x30] sm:$0xff]  ;;  %v5432_v20 = vld [vmem:[%s8689_s14 + $0x28] sm:$0xff]  ;;  %v5431_v21 = vld [vmem:[%s8689_s14 + $0x20] sm:$0xff] }
 0x2dc   : > { %v5430_v22 = vld [vmem:[%s8689_s14 + $0x18] sm:$0xff]  ;;  %v5429_v23 = vld [vmem:[%s8689_s14 + $0x10] sm:$0xff]  ;;  %v5428_v26 = vld [vmem:[%s8689_s14 + $0x8] sm:$0xff] }
 0x2dd   : > { %5445 = vmatpush.msra.mxu0 %v5440_v12  ;;  %v8282_v24 = vld [vmem:[%s8670_s22] ss:$0 sm:$0xff]  ;;  %v5421_v25 = vld [vmem:[#allocation2] sm:$0x3]  ;;  %v5427_v27 = vld [vmem:[%s8689_s14] sm:$0xff] }
 0x2de   : > { %v5426_v28 = vadd.f32 %v8282_v24, %v5421_v25 }
 0x2df   : > { %5446 = vmatpush.msra.mxu0 %v5439_v13 }
 0x2e1   : > { %5447 = vmatpush.msra.mxu0 %v5438_v14 }
 0x2e3   : > { %5448 = vmatpush.msra.mxu0 %v5437_v15 }
 0x2e5   : > { %5449 = vmatpush.msra.mxu0 %v5436_v16 }
 0x2e7   : > { %5450 = vmatpush.msra.mxu0 %v5435_v17 }
 0x2e9   : > { %5451 = vmatpush.msra.mxu0 %v5434_v18 }
 0x2eb   : > { %5452 = vmatpush.msra.mxu0 %v5433_v19 }
 0x2ed   : > { %5453 = vmatpush.msra.mxu0 %v5432_v20 }
 0x2ef   : > { %5454 = vmatpush.msra.mxu0 %v5431_v21 }
 0x2f1   : > { %5455 = vmatpush.msra.mxu0 %v5430_v22 }
 0x2f3   : > { %5456 = vmatpush.msra.mxu0 %v5429_v23 }
 0x2f5   : > { %5457 = vmatpush.msra.mxu0 %v5428_v26 }
 0x2f7   : > { %5458 = vmatpush.msra.mxu0 %v5427_v27 }
 0x2f8   : > { %5459 = vmatmul.f32.vlgmr.msra.gmra.mxu0 %v5426_v28 }
 0x375   : > { %v5460_v29 = vpop.f32.mrf.mxu0 }
 0x376   : > { %5463 = vst [vmem:[%s8687_s18] sm:$0x3] %v5460_v29 }
 0x377 PF: > { %s20_s25 = sadd.s32 1, %s8467_s25   ;;  %s9315_s21 = sld [smem:[#allocation10_spill]] }
 0x378   : > { %p17_p10 = scmp.ge.s32.totalorder %s20_s25, 6   ;;  %s9316_s17 = sld [smem:[#allocation16_spill]] }
 0x379   : > { %s9317_s6 = sld [smem:[#allocation11_spill]]  ;;  %s9322_s15 = smov %s8431_s16 }
 0x37a   : > { %s9318_s20 = sld [smem:[#allocation17_spill]]  ;;  %s9324_s18 = smov %s8443_s19 }
 0x37b   : > { %s9319_s13 = sld [smem:[#allocation13_spill]]  ;;  %s9327_s22 = smov %s8463_s24 }
 0x37c   : > { %s9320_s23 = sld [smem:[#allocation14_spill]] }
 0x37d   : > { %s9321_s2 = sld [smem:[#allocation15_spill]]  ;;  %s9323_s16 = smov %s9315_s21 }
 0x37f   : > { %s9325_s19 = smov %s9317_s6  ;;  %19 = sbr.rel (!%p17_p10) target bundleno = 13 (0xd), region = 111 }
 0x381   : > { %s9326_s21 = smov %s9319_s13 }
 0x383   : > { %s9328_s24 = smov %s9321_s2 }
 0x384   :  { %5483 = vsyncpa [#allocation4], 1 }
 0x385   :  { %5485 = vsyncpa [#allocation4 + $0x1], 1 }
 0x386   :  { %5486 = vsyncpa [#allocation6], 1 }
 0x387   :  { %5488 = vsyncpa [#allocation6 + $0x1], 1 }

</bundles_post_ra>
